<compile_context>
chip_gen: v7x
topology: tpu7x:2x2x1
jax: 0.10.0
libtpu: 0.0.40
codegen_flags: <defaults>
</compile_context>

<pallas_src>
import jax
import jax.numpy as jnp
from jax import lax
from jax.experimental import pallas as pl
from jax.experimental.pallas import tpu as pltpu

D_MODEL = 128
N_HEAD = 4
N_LAYER = 4
D_FF = 2048                      # nn.TransformerEncoderLayer default
HEAD_DIM = D_MODEL // N_HEAD
LN_EPS = 1e-5


def _layernorm(x, gamma, beta):
    mean = jnp.mean(x, axis=-1, keepdims=True)
    var = jnp.mean((x - mean) ** 2, axis=-1, keepdims=True)
    return (x - mean) * lax.rsqrt(var + LN_EPS) * gamma + beta


# ---------------- Fused whole-model kernel ----------------
def _make_gpt_kernel(B, S, vocab):
    BS = B * S
    D = D_MODEL
    HD = HEAD_DIM
    scale = 1.0 / (HD ** 0.5)

    def kernel(tok_ref, emb_ref,
               w_qkv_ref, b_qkv_ref, w_o_ref, b_o_ref,
               g1_ref, be1_ref, w1_ref, b1_ref, w2_ref, b2_ref,
               g2_ref, be2_ref,
               fc_w_ref, fc_b_ref,
               logits_ref, x_scratch):
        layer = pl.program_id(0)

        # ---- grid step 0: fused embedding gather (one-hot matmul on the MXU) ----
        @pl.when(layer == 0)
        def _():
            tok = tok_ref[...]                                            # (BS, 1) int32
            vocab_ids = lax.broadcasted_iota(jnp.int32, (BS, vocab), 1)   # (BS, vocab)
            onehot = jnp.where(vocab_ids == tok, 1.0, 0.0).astype(emb_ref.dtype)
            x_scratch[...] = jnp.dot(onehot, emb_ref[...],
                                     preferred_element_type=jnp.float32)

        x = x_scratch[...]                                                # (BS, D) f32
        xb = x.astype(jnp.bfloat16)

        # ---- multi-head self attention ----
        qkv = jnp.dot(xb, w_qkv_ref[...],
                      preferred_element_type=jnp.float32) + b_qkv_ref[...]   # (BS, 3D) f32
        q = (qkv[:, 0:D] * scale).reshape(B, S, D)      # scale folded into Q
        k = qkv[:, D:2 * D].reshape(B, S, D)
        v = qkv[:, 2 * D:3 * D].reshape(B, S, D)

        attn = jnp.zeros((BS, D), jnp.float32)
        for h in range(N_HEAD):                         # static unroll; no concat
            lo = h * HD
            qh = q[:, :, lo:lo + HD]
            kh = k[:, :, lo:lo + HD]
            vh = v[:, :, lo:lo + HD]
            s = jnp.einsum('bqd,bkd->bqk', qh, kh,
                           preferred_element_type=jnp.float32)            # (B, S, S)
            s = s - jnp.max(s, axis=-1, keepdims=True)
            p = jnp.exp(s)
            p = p * pl.reciprocal(jnp.sum(p, axis=-1, keepdims=True), approx=True)
            oh = jnp.einsum('bqk,bkd->bqd', p, vh,
                            preferred_element_type=jnp.float32)           # (B, S, HD)
            # fold this head straight through its slice of the output projection
            attn = attn + jnp.dot(oh.reshape(BS, HD).astype(jnp.bfloat16),
                                  w_o_ref[lo:lo + HD, :],
                                  preferred_element_type=jnp.float32)
        attn = attn + b_o_ref[...]

        # residual + post-norm (dropout = identity)
        x1 = _layernorm(x + attn, g1_ref[...], be1_ref[...])

        # ---- feed-forward: Linear -> ReLU -> Linear ----
        h1 = jnp.dot(x1.astype(jnp.bfloat16), w1_ref[...],
                     preferred_element_type=jnp.float32) + b1_ref[...]
        h1 = jnp.maximum(h1, 0.0)
        ff = jnp.dot(h1.astype(jnp.bfloat16), w2_ref[...],
                     preferred_element_type=jnp.float32) + b2_ref[...]

        x2 = _layernorm(x1 + ff, g2_ref[...], be2_ref[...])
        x_scratch[...] = x2

        # ---- last grid step: fused vocab projection (lane-dense (BS, vocab) store) ----
        @pl.when(layer == N_LAYER - 1)
        def _():
            logits_ref[...] = (jnp.dot(x2.astype(jnp.bfloat16), fc_w_ref[...],
                                       preferred_element_type=jnp.float32)
                               + fc_b_ref[...])

    return kernel


def gpt_pallas_forward(params, tokens):
    """tokens: (S, B) int32 -> logits (S, B, vocab). Matches PyTorch batch_first=False."""
    S, B = tokens.shape
    BS = B * S
    D = D_MODEL
    vocab = params['embedding'].shape[0]

    # token ids in (b, s) row order to match the kernel's (B*S, D) activation layout
    tok_bs = jnp.transpose(tokens, (1, 0)).reshape(BS, 1).astype(jnp.int32)

    def layer_spec(*trail):                       # weight stacked along layer axis
        n = len(trail)
        return pl.BlockSpec((None,) + tuple(trail),
                            lambda l, _n=n: (l,) + (0,) * _n)

    def const_spec(*shape):                       # resident across the whole grid
        n = len(shape)
        return pl.BlockSpec(tuple(shape), lambda l, _n=n: (0,) * _n)

    in_specs = [
        const_spec(BS, 1),            # token ids
        const_spec(vocab, D),         # embedding table (bf16)
        layer_spec(D, 3 * D),         # w_qkv (bf16)
        layer_spec(1, 3 * D),         # b_qkv
        layer_spec(D, D),             # w_o   (bf16)
        layer_spec(1, D),             # b_o
        layer_spec(1, D),             # ln1 gamma
        layer_spec(1, D),             # ln1 beta
        layer_spec(D, D_FF),          # w1    (bf16)
        layer_spec(1, D_FF),          # b1
        layer_spec(D_FF, D),          # w2    (bf16)
        layer_spec(1, D),             # b2
        layer_spec(1, D),             # ln2 gamma
        layer_spec(1, D),             # ln2 beta
        const_spec(D, vocab),         # fc_w  (bf16)
        const_spec(1, vocab),         # fc_b
    ]

    logits2d = pl.pallas_call(
        _make_gpt_kernel(B, S, vocab),
        out_shape=jax.ShapeDtypeStruct((BS, vocab), jnp.float32),
        grid_spec=pltpu.PrefetchScalarGridSpec(
            num_scalar_prefetch=0,
            grid=(N_LAYER,),
            in_specs=in_specs,
            out_specs=pl.BlockSpec((BS, vocab), lambda l: (0, 0)),
            scratch_shapes=[pltpu.VMEM((BS, D), jnp.float32)],   # resident activations
        ),
        compiler_params=pltpu.CompilerParams(
            dimension_semantics=("arbitrary",)),
    )(tok_bs, params['embedding'], *params['layers_stacked'],
      params['fc_w'], params['fc_b'])

    return jnp.transpose(logits2d.reshape(B, S, vocab), (1, 0, 2))   # (S, B, vocab)


# ---------------- Parameter init (deterministic, synthetic) ----------------
def init_gpt_params(key, vocab_size):
    k_emb, k_fc, k_layers = jax.random.split(key, 3)
    params = {
        'embedding': (jax.random.normal(k_emb, (vocab_size, D_MODEL), jnp.float32)
                      * 0.02).astype(jnp.bfloat16),
        'fc_w': (jax.random.normal(k_fc, (D_MODEL, vocab_size), jnp.float32)
                 / jnp.sqrt(D_MODEL)).astype(jnp.bfloat16),
        'fc_b': jnp.zeros((1, vocab_size), jnp.float32),
    }
    per_layer = []
    for lk in jax.random.split(k_layers, N_LAYER):
        ks = jax.random.split(lk, 4)
        w_qkv = (jax.random.normal(ks[0], (D_MODEL, 3 * D_MODEL), jnp.float32)
                 / jnp.sqrt(D_MODEL)).astype(jnp.bfloat16)
        b_qkv = jnp.zeros((1, 3 * D_MODEL), jnp.float32)
        w_o = (jax.random.normal(ks[1], (D_MODEL, D_MODEL), jnp.float32)
               / jnp.sqrt(D_MODEL)).astype(jnp.bfloat16)
        b_o = jnp.zeros((1, D_MODEL), jnp.float32)
        g1 = jnp.ones((1, D_MODEL), jnp.float32)
        be1 = jnp.zeros((1, D_MODEL), jnp.float32)
        w1 = (jax.random.normal(ks[2], (D_MODEL, D_FF), jnp.float32)
              / jnp.sqrt(D_MODEL)).astype(jnp.bfloat16)
        b1 = jnp.zeros((1, D_FF), jnp.float32)
        w2 = (jax.random.normal(ks[3], (D_FF, D_MODEL), jnp.float32)
              / jnp.sqrt(D_FF)).astype(jnp.bfloat16)
        b2 = jnp.zeros((1, D_MODEL), jnp.float32)
        g2 = jnp.ones((1, D_MODEL), jnp.float32)
        be2 = jnp.zeros((1, D_MODEL), jnp.float32)
        per_layer.append((w_qkv, b_qkv, w_o, b_o, g1, be1,
                          w1, b1, w2, b2, g2, be2))
    # stack each parameter along a leading layer axis -> 12 arrays of shape (N_LAYER, ...)
    params['layers_stacked'] = tuple(jnp.stack(ws, axis=0) for ws in zip(*per_layer))
    return params


if __name__ == "__main__":
    VOCAB = 512          # small synthetic vocab (stand-in for GPT2's 50257)
    S, B = 8, 2
    key = jax.random.PRNGKey(0)
    kp, kt = jax.random.split(key)
    params = init_gpt_params(kp, VOCAB)
    tokens = jax.random.randint(kt, (S, B), 0, VOCAB, dtype=jnp.int32)

    forward = jax.jit(gpt_pallas_forward)
    logits = forward(params, tokens)
    jax.block_until_ready(logits)

    assert logits.shape == (S, B, VOCAB)
    assert logits.dtype == jnp.float32
    assert bool(jnp.all(jnp.isfinite(logits)))
    print("KERNEL_OK")
</pallas_src>

<mosaic_0001>
module attributes {stable_mosaic.version = 11 : i64} {
  func.func @kernel(%arg0: i32, %arg1: memref<16x1xi32, #tpu.memory_space<vmem>>, %arg2: memref<512x128xbf16, #tpu.memory_space<vmem>>, %arg3: memref<1x128x384xbf16, #tpu.memory_space<vmem>>, %arg4: memref<1x1x384xf32, #tpu.memory_space<vmem>>, %arg5: memref<1x128x128xbf16, #tpu.memory_space<vmem>>, %arg6: memref<1x1x128xf32, #tpu.memory_space<vmem>>, %arg7: memref<1x1x128xf32, #tpu.memory_space<vmem>>, %arg8: memref<1x1x128xf32, #tpu.memory_space<vmem>>, %arg9: memref<1x128x2048xbf16, #tpu.memory_space<vmem>>, %arg10: memref<1x1x2048xf32, #tpu.memory_space<vmem>>, %arg11: memref<1x2048x128xbf16, #tpu.memory_space<vmem>>, %arg12: memref<1x1x128xf32, #tpu.memory_space<vmem>>, %arg13: memref<1x1x128xf32, #tpu.memory_space<vmem>>, %arg14: memref<1x1x128xf32, #tpu.memory_space<vmem>>, %arg15: memref<128x512xbf16, #tpu.memory_space<vmem>>, %arg16: memref<1x512xf32, #tpu.memory_space<vmem>>, %arg17: memref<16x512xf32, #tpu.memory_space<vmem>>, %arg18: memref<16x128xf32, #tpu.memory_space<vmem>>) attributes {dimension_semantics = [#tpu.dimension_semantics<arbitrary>], iteration_bounds = array<i64: 4>, scalar_prefetch = 0 : i64, scratch_operands = 1 : i64, tpu.core_type = #tpu.core_type<tc>, window_params = [{pipeline_mode = #tpu.pipeline_mode<synchronous>, transform_indices = @transform_0, window_bounds = array<i64: 16, 1>}, {pipeline_mode = #tpu.pipeline_mode<synchronous>, transform_indices = @transform_1, window_bounds = array<i64: 512, 128>}, {transform_indices = @transform_2, window_bounds = array<i64: 1, 128, 384>}, {transform_indices = @transform_3, window_bounds = array<i64: 1, 1, 384>}, {transform_indices = @transform_4, window_bounds = array<i64: 1, 128, 128>}, {transform_indices = @transform_5, window_bounds = array<i64: 1, 1, 128>}, {transform_indices = @transform_6, window_bounds = array<i64: 1, 1, 128>}, {transform_indices = @transform_7, window_bounds = array<i64: 1, 1, 128>}, {transform_indices = @transform_8, window_bounds = array<i64: 1, 128, 2048>}, {transform_indices = @transform_9, window_bounds = array<i64: 1, 1, 2048>}, {transform_indices = @transform_10, window_bounds = array<i64: 1, 2048, 128>}, {transform_indices = @transform_11, window_bounds = array<i64: 1, 1, 128>}, {transform_indices = @transform_12, window_bounds = array<i64: 1, 1, 128>}, {transform_indices = @transform_13, window_bounds = array<i64: 1, 1, 128>}, {pipeline_mode = #tpu.pipeline_mode<synchronous>, transform_indices = @transform_14, window_bounds = array<i64: 128, 512>}, {pipeline_mode = #tpu.pipeline_mode<synchronous>, transform_indices = @transform_15, window_bounds = array<i64: 1, 512>}, {pipeline_mode = #tpu.pipeline_mode<synchronous>, transform_indices = @transform_16, window_bounds = array<i64: 16, 512>}]} {
    %c0_i32 = arith.constant 0 : i32
    %0 = arith.cmpi eq, %arg0, %c0_i32 : i32
    %1 = arith.extui %0 : i1 to i32
    %c0_i32_0 = arith.constant 0 : i32
    %2 = arith.cmpi ne, %1, %c0_i32_0 : i32
    scf.if %2 {
      %c0_82 = arith.constant 0 : index
      %c0_83 = arith.constant 0 : index
      %185 = vector.load %arg1[%c0_82, %c0_83] : memref<16x1xi32, #tpu.memory_space<vmem>>, vector<16x1xi32>
      %186 = tpu.iota {dimensions = array<i32: 1>} : vector<16x512xi32>
      %187 = vector.broadcast %185 : vector<16x1xi32> to vector<16x512xi32>
      %188 = arith.cmpi eq, %186, %187 : vector<16x512xi32>
      %cst_84 = arith.constant 1.000000e+00 : f32
      %cst_85 = arith.constant 0.000000e+00 : f32
      %189 = vector.broadcast %cst_84 : f32 to vector<16x512xf32>
      %190 = vector.broadcast %cst_85 : f32 to vector<16x512xf32>
      %191 = arith.select %188, %189, %190 : vector<16x512xi1>, vector<16x512xf32>
      %192 = arith.truncf %191 : vector<16x512xf32> to vector<16x512xbf16>
      %c0_86 = arith.constant 0 : index
      %c0_87 = arith.constant 0 : index
      %193 = vector.load %arg2[%c0_86, %c0_87] : memref<512x128xbf16, #tpu.memory_space<vmem>>, vector<512x128xbf16>
      %cst_88 = arith.constant dense<0.000000e+00> : vector<16x128xf32>
      %194 = tpu.matmul %192, %193, %cst_88 {dimension_numbers = #tpu.dot_dimension_numbers<[1], [0], [0], [1], [0, 0, 1, 1], [], []>} : vector<16x512xbf16>, vector<512x128xbf16>, vector<16x128xf32> -> vector<16x128xf32>
      %c0_89 = arith.constant 0 : index
      %c0_90 = arith.constant 0 : index
      %195 = vector.load %arg18[%c0_89, %c0_90] : memref<16x128xf32, #tpu.memory_space<vmem>>, vector<16x128xf32>
      tpu.vector_store %arg18[%c0_89, %c0_90], %194 {strides = array<i32>} : memref<16x128xf32, #tpu.memory_space<vmem>>, vector<16x128xf32>,
    } else {
    }
    %c0 = arith.constant 0 : index
    %c0_1 = arith.constant 0 : index
    %3 = vector.load %arg18[%c0, %c0_1] : memref<16x128xf32, #tpu.memory_space<vmem>>, vector<16x128xf32>
    %4 = arith.truncf %3 : vector<16x128xf32> to vector<16x128xbf16>
    %c0_2 = arith.constant 0 : index
    %c0_3 = arith.constant 0 : index
    %c0_4 = arith.constant 0 : index
    %5 = vector.load %arg3[%c0_2, %c0_3, %c0_4] : memref<1x128x384xbf16, #tpu.memory_space<vmem>>, vector<1x128x384xbf16>
    %6 = vector.shape_cast %5 : vector<1x128x384xbf16> to vector<128x384xbf16>
    %cst = arith.constant dense<0.000000e+00> : vector<16x384xf32>
    %7 = tpu.matmul %4, %6, %cst {dimension_numbers = #tpu.dot_dimension_numbers<[1], [0], [0], [1], [0, 0, 1, 1], [], []>} : vector<16x128xbf16>, vector<128x384xbf16>, vector<16x384xf32> -> vector<16x384xf32>
    %c0_5 = arith.constant 0 : index
    %c0_6 = arith.constant 0 : index
    %c0_7 = arith.constant 0 : index
    %8 = vector.load %arg4[%c0_5, %c0_6, %c0_7] : memref<1x1x384xf32, #tpu.memory_space<vmem>>, vector<1x1x384xf32>
    %9 = vector.shape_cast %8 : vector<1x1x384xf32> to vector<1x384xf32>
    %10 = vector.broadcast %9 : vector<1x384xf32> to vector<16x384xf32>
    %11 = arith.addf %7, %10 : vector<16x384xf32>
    %12 = vector.extract_strided_slice %11 {offsets = [0, 0], sizes = [16, 128], strides = [1, 1]} : vector<16x384xf32> to vector<16x128xf32>
    %cst_8 = arith.constant 0.176776692 : f32
    %13 = vector.broadcast %cst_8 : f32 to vector<16x128xf32>
    %14 = arith.mulf %12, %13 : vector<16x128xf32>
    %15 = vector.shape_cast %14 : vector<16x128xf32> to vector<2x8x128xf32>
    %16 = vector.extract_strided_slice %11 {offsets = [0, 128], sizes = [16, 128], strides = [1, 1]} : vector<16x384xf32> to vector<16x128xf32>
    %17 = vector.shape_cast %16 : vector<16x128xf32> to vector<2x8x128xf32>
    %18 = vector.extract_strided_slice %11 {offsets = [0, 256], sizes = [16, 128], strides = [1, 1]} : vector<16x384xf32> to vector<16x128xf32>
    %19 = vector.shape_cast %18 : vector<16x128xf32> to vector<2x8x128xf32>
    %cst_9 = arith.constant 0.000000e+00 : f32
    %20 = vector.broadcast %cst_9 : f32 to vector<16x128xf32>
    %21 = vector.extract_strided_slice %15 {offsets = [0, 0, 0], sizes = [2, 8, 32], strides = [1, 1, 1]} : vector<2x8x128xf32> to vector<2x8x32xf32>
    %22 = vector.extract_strided_slice %17 {offsets = [0, 0, 0], sizes = [2, 8, 32], strides = [1, 1, 1]} : vector<2x8x128xf32> to vector<2x8x32xf32>
    %23 = vector.extract_strided_slice %19 {offsets = [0, 0, 0], sizes = [2, 8, 32], strides = [1, 1, 1]} : vector<2x8x128xf32> to vector<2x8x32xf32>
    "tpu.trace_start"() <{level = 10 : i32, message = "bqd,bkd->bqk"}> : () -> ()
    %cst_10 = arith.constant dense<0.000000e+00> : vector<2x8x8xf32>
    %24 = tpu.matmul %21, %22, %cst_10 {dimension_numbers = #tpu.dot_dimension_numbers<[2], [2], [1], [1], [0, 0, 0, 1, 1, 1], [0], [0]>} : vector<2x8x32xf32>, vector<2x8x32xf32>, vector<2x8x8xf32> -> vector<2x8x8xf32>
    "tpu.trace_stop"() : () -> ()
    %cst_11 = arith.constant dense<0xFF800000> : vector<2x8xf32>
    %25 = vector.multi_reduction <maximumf>, %24, %cst_11 [2] : vector<2x8x8xf32> to vector<2x8xf32>
    %26 = vector.shape_cast %25 : vector<2x8xf32> to vector<2x8x1xf32>
    %27 = vector.broadcast %26 : vector<2x8x1xf32> to vector<2x8x8xf32>
    %28 = arith.subf %24, %27 : vector<2x8x8xf32>
    %29 = math.exp %28 : vector<2x8x8xf32>
    %cst_12 = arith.constant dense<0.000000e+00> : vector<2x8xf32>
    %30 = vector.multi_reduction <add>, %29, %cst_12 [2] : vector<2x8x8xf32> to vector<2x8xf32>
    %31 = vector.shape_cast %30 : vector<2x8xf32> to vector<2x8x1xf32>
    %32 = tpu.reciprocal %31 {approx = true} : vector<2x8x1xf32> -> vector<2x8x1xf32>
    %33 = vector.broadcast %32 : vector<2x8x1xf32> to vector<2x8x8xf32>
    %34 = arith.mulf %29, %33 : vector<2x8x8xf32>
    "tpu.trace_start"() <{level = 10 : i32, message = "bqk,bkd->bqd"}> : () -> ()
    %cst_13 = arith.constant dense<0.000000e+00> : vector<2x8x32xf32>
    %35 = tpu.matmul %34, %23, %cst_13 {dimension_numbers = #tpu.dot_dimension_numbers<[2], [1], [1], [2], [0, 0, 0, 1, 1, 2], [0], [0]>} : vector<2x8x8xf32>, vector<2x8x32xf32>, vector<2x8x32xf32> -> vector<2x8x32xf32>
    "tpu.trace_stop"() : () -> ()
    %36 = vector.shape_cast %35 : vector<2x8x32xf32> to vector<16x32xf32>
    %37 = arith.truncf %36 : vector<16x32xf32> to vector<16x32xbf16>
    %c0_14 = arith.constant 0 : index
    %c0_15 = arith.constant 0 : index
    %c0_16 = arith.constant 0 : index
    %38 = vector.load %arg5[%c0_14, %c0_15, %c0_16] : memref<1x128x128xbf16, #tpu.memory_space<vmem>>, vector<1x32x128xbf16>
    %39 = vector.shape_cast %38 : vector<1x32x128xbf16> to vector<32x128xbf16>
    %cst_17 = arith.constant dense<0.000000e+00> : vector<16x128xf32>
    %40 = tpu.matmul %37, %39, %cst_17 {dimension_numbers = #tpu.dot_dimension_numbers<[1], [0], [0], [1], [0, 0, 1, 1], [], []>} : vector<16x32xbf16>, vector<32x128xbf16>, vector<16x128xf32> -> vector<16x128xf32>
    %41 = arith.addf %20, %40 : vector<16x128xf32>
    %42 = vector.extract_strided_slice %15 {offsets = [0, 0, 32], sizes = [2, 8, 32], strides = [1, 1, 1]} : vector<2x8x128xf32> to vector<2x8x32xf32>
    %43 = vector.extract_strided_slice %17 {offsets = [0, 0, 32], sizes = [2, 8, 32], strides = [1, 1, 1]} : vector<2x8x128xf32> to vector<2x8x32xf32>
    %44 = vector.extract_strided_slice %19 {offsets = [0, 0, 32], sizes = [2, 8, 32], strides = [1, 1, 1]} : vector<2x8x128xf32> to vector<2x8x32xf32>
    "tpu.trace_start"() <{level = 10 : i32, message = "bqd,bkd->bqk"}> : () -> ()
    %cst_18 = arith.constant dense<0.000000e+00> : vector<2x8x8xf32>
    %45 = tpu.matmul %42, %43, %cst_18 {dimension_numbers = #tpu.dot_dimension_numbers<[2], [2], [1], [1], [0, 0, 0, 1, 1, 1], [0], [0]>} : vector<2x8x32xf32>, vector<2x8x32xf32>, vector<2x8x8xf32> -> vector<2x8x8xf32>
    "tpu.trace_stop"() : () -> ()
    %cst_19 = arith.constant dense<0xFF800000> : vector<2x8xf32>
    %46 = vector.multi_reduction <maximumf>, %45, %cst_19 [2] : vector<2x8x8xf32> to vector<2x8xf32>
    %47 = vector.shape_cast %46 : vector<2x8xf32> to vector<2x8x1xf32>
    %48 = vector.broadcast %47 : vector<2x8x1xf32> to vector<2x8x8xf32>
    %49 = arith.subf %45, %48 : vector<2x8x8xf32>
    %50 = math.exp %49 : vector<2x8x8xf32>
    %cst_20 = arith.constant dense<0.000000e+00> : vector<2x8xf32>
    %51 = vector.multi_reduction <add>, %50, %cst_20 [2] : vector<2x8x8xf32> to vector<2x8xf32>
    %52 = vector.shape_cast %51 : vector<2x8xf32> to vector<2x8x1xf32>
    %53 = tpu.reciprocal %52 {approx = true} : vector<2x8x1xf32> -> vector<2x8x1xf32>
    %54 = vector.broadcast %53 : vector<2x8x1xf32> to vector<2x8x8xf32>
    %55 = arith.mulf %50, %54 : vector<2x8x8xf32>
    "tpu.trace_start"() <{level = 10 : i32, message = "bqk,bkd->bqd"}> : () -> ()
    %cst_21 = arith.constant dense<0.000000e+00> : vector<2x8x32xf32>
    %56 = tpu.matmul %55, %44, %cst_21 {dimension_numbers = #tpu.dot_dimension_numbers<[2], [1], [1], [2], [0, 0, 0, 1, 1, 2], [0], [0]>} : vector<2x8x8xf32>, vector<2x8x32xf32>, vector<2x8x32xf32> -> vector<2x8x32xf32>
    "tpu.trace_stop"() : () -> ()
    %57 = vector.shape_cast %56 : vector<2x8x32xf32> to vector<16x32xf32>
    %58 = arith.truncf %57 : vector<16x32xf32> to vector<16x32xbf16>
    %c0_22 = arith.constant 0 : index
    %c32 = arith.constant 32 : index
    %c0_23 = arith.constant 0 : index
    %59 = vector.load %arg5[%c0_22, %c32, %c0_23] : memref<1x128x128xbf16, #tpu.memory_space<vmem>>, vector<1x32x128xbf16>
    %60 = vector.shape_cast %59 : vector<1x32x128xbf16> to vector<32x128xbf16>
    %cst_24 = arith.constant dense<0.000000e+00> : vector<16x128xf32>
    %61 = tpu.matmul %58, %60, %cst_24 {dimension_numbers = #tpu.dot_dimension_numbers<[1], [0], [0], [1], [0, 0, 1, 1], [], []>} : vector<16x32xbf16>, vector<32x128xbf16>, vector<16x128xf32> -> vector<16x128xf32>
    %62 = arith.addf %41, %61 : vector<16x128xf32>
    %63 = vector.extract_strided_slice %15 {offsets = [0, 0, 64], sizes = [2, 8, 32], strides = [1, 1, 1]} : vector<2x8x128xf32> to vector<2x8x32xf32>
    %64 = vector.extract_strided_slice %17 {offsets = [0, 0, 64], sizes = [2, 8, 32], strides = [1, 1, 1]} : vector<2x8x128xf32> to vector<2x8x32xf32>
    %65 = vector.extract_strided_slice %19 {offsets = [0, 0, 64], sizes = [2, 8, 32], strides = [1, 1, 1]} : vector<2x8x128xf32> to vector<2x8x32xf32>
    "tpu.trace_start"() <{level = 10 : i32, message = "bqd,bkd->bqk"}> : () -> ()
    %cst_25 = arith.constant dense<0.000000e+00> : vector<2x8x8xf32>
    %66 = tpu.matmul %63, %64, %cst_25 {dimension_numbers = #tpu.dot_dimension_numbers<[2], [2], [1], [1], [0, 0, 0, 1, 1, 1], [0], [0]>} : vector<2x8x32xf32>, vector<2x8x32xf32>, vector<2x8x8xf32> -> vector<2x8x8xf32>
    "tpu.trace_stop"() : () -> ()
    %cst_26 = arith.constant dense<0xFF800000> : vector<2x8xf32>
    %67 = vector.multi_reduction <maximumf>, %66, %cst_26 [2] : vector<2x8x8xf32> to vector<2x8xf32>
    %68 = vector.shape_cast %67 : vector<2x8xf32> to vector<2x8x1xf32>
    %69 = vector.broadcast %68 : vector<2x8x1xf32> to vector<2x8x8xf32>
    %70 = arith.subf %66, %69 : vector<2x8x8xf32>
    %71 = math.exp %70 : vector<2x8x8xf32>
    %cst_27 = arith.constant dense<0.000000e+00> : vector<2x8xf32>
    %72 = vector.multi_reduction <add>, %71, %cst_27 [2] : vector<2x8x8xf32> to vector<2x8xf32>
    %73 = vector.shape_cast %72 : vector<2x8xf32> to vector<2x8x1xf32>
    %74 = tpu.reciprocal %73 {approx = true} : vector<2x8x1xf32> -> vector<2x8x1xf32>
    %75 = vector.broadcast %74 : vector<2x8x1xf32> to vector<2x8x8xf32>
    %76 = arith.mulf %71, %75 : vector<2x8x8xf32>
    "tpu.trace_start"() <{level = 10 : i32, message = "bqk,bkd->bqd"}> : () -> ()
    %cst_28 = arith.constant dense<0.000000e+00> : vector<2x8x32xf32>
    %77 = tpu.matmul %76, %65, %cst_28 {dimension_numbers = #tpu.dot_dimension_numbers<[2], [1], [1], [2], [0, 0, 0, 1, 1, 2], [0], [0]>} : vector<2x8x8xf32>, vector<2x8x32xf32>, vector<2x8x32xf32> -> vector<2x8x32xf32>
    "tpu.trace_stop"() : () -> ()
    %78 = vector.shape_cast %77 : vector<2x8x32xf32> to vector<16x32xf32>
    %79 = arith.truncf %78 : vector<16x32xf32> to vector<16x32xbf16>
    %c0_29 = arith.constant 0 : index
    %c64 = arith.constant 64 : index
    %c0_30 = arith.constant 0 : index
    %80 = vector.load %arg5[%c0_29, %c64, %c0_30] : memref<1x128x128xbf16, #tpu.memory_space<vmem>>, vector<1x32x128xbf16>
    %81 = vector.shape_cast %80 : vector<1x32x128xbf16> to vector<32x128xbf16>
    %cst_31 = arith.constant dense<0.000000e+00> : vector<16x128xf32>
    %82 = tpu.matmul %79, %81, %cst_31 {dimension_numbers = #tpu.dot_dimension_numbers<[1], [0], [0], [1], [0, 0, 1, 1], [], []>} : vector<16x32xbf16>, vector<32x128xbf16>, vector<16x128xf32> -> vector<16x128xf32>
    %83 = arith.addf %62, %82 : vector<16x128xf32>
    %84 = vector.extract_strided_slice %15 {offsets = [0, 0, 96], sizes = [2, 8, 32], strides = [1, 1, 1]} : vector<2x8x128xf32> to vector<2x8x32xf32>
    %85 = vector.extract_strided_slice %17 {offsets = [0, 0, 96], sizes = [2, 8, 32], strides = [1, 1, 1]} : vector<2x8x128xf32> to vector<2x8x32xf32>
    %86 = vector.extract_strided_slice %19 {offsets = [0, 0, 96], sizes = [2, 8, 32], strides = [1, 1, 1]} : vector<2x8x128xf32> to vector<2x8x32xf32>
    "tpu.trace_start"() <{level = 10 : i32, message = "bqd,bkd->bqk"}> : () -> ()
    %cst_32 = arith.constant dense<0.000000e+00> : vector<2x8x8xf32>
    %87 = tpu.matmul %84, %85, %cst_32 {dimension_numbers = #tpu.dot_dimension_numbers<[2], [2], [1], [1], [0, 0, 0, 1, 1, 1], [0], [0]>} : vector<2x8x32xf32>, vector<2x8x32xf32>, vector<2x8x8xf32> -> vector<2x8x8xf32>
    "tpu.trace_stop"() : () -> ()
    %cst_33 = arith.constant dense<0xFF800000> : vector<2x8xf32>
    %88 = vector.multi_reduction <maximumf>, %87, %cst_33 [2] : vector<2x8x8xf32> to vector<2x8xf32>
    %89 = vector.shape_cast %88 : vector<2x8xf32> to vector<2x8x1xf32>
    %90 = vector.broadcast %89 : vector<2x8x1xf32> to vector<2x8x8xf32>
    %91 = arith.subf %87, %90 : vector<2x8x8xf32>
    %92 = math.exp %91 : vector<2x8x8xf32>
    %cst_34 = arith.constant dense<0.000000e+00> : vector<2x8xf32>
    %93 = vector.multi_reduction <add>, %92, %cst_34 [2] : vector<2x8x8xf32> to vector<2x8xf32>
    %94 = vector.shape_cast %93 : vector<2x8xf32> to vector<2x8x1xf32>
    %95 = tpu.reciprocal %94 {approx = true} : vector<2x8x1xf32> -> vector<2x8x1xf32>
    %96 = vector.broadcast %95 : vector<2x8x1xf32> to vector<2x8x8xf32>
    %97 = arith.mulf %92, %96 : vector<2x8x8xf32>
    "tpu.trace_start"() <{level = 10 : i32, message = "bqk,bkd->bqd"}> : () -> ()
    %cst_35 = arith.constant dense<0.000000e+00> : vector<2x8x32xf32>
    %98 = tpu.matmul %97, %86, %cst_35 {dimension_numbers = #tpu.dot_dimension_numbers<[2], [1], [1], [2], [0, 0, 0, 1, 1, 2], [0], [0]>} : vector<2x8x8xf32>, vector<2x8x32xf32>, vector<2x8x32xf32> -> vector<2x8x32xf32>
    "tpu.trace_stop"() : () -> ()
    %99 = vector.shape_cast %98 : vector<2x8x32xf32> to vector<16x32xf32>
    %100 = arith.truncf %99 : vector<16x32xf32> to vector<16x32xbf16>
    %c0_36 = arith.constant 0 : index
    %c96 = arith.constant 96 : index
    %c0_37 = arith.constant 0 : index
    %101 = vector.load %arg5[%c0_36, %c96, %c0_37] : memref<1x128x128xbf16, #tpu.memory_space<vmem>>, vector<1x32x128xbf16>
    %102 = vector.shape_cast %101 : vector<1x32x128xbf16> to vector<32x128xbf16>
    %cst_38 = arith.constant dense<0.000000e+00> : vector<16x128xf32>
    %103 = tpu.matmul %100, %102, %cst_38 {dimension_numbers = #tpu.dot_dimension_numbers<[1], [0], [0], [1], [0, 0, 1, 1], [], []>} : vector<16x32xbf16>, vector<32x128xbf16>, vector<16x128xf32> -> vector<16x128xf32>
    %104 = arith.addf %83, %103 : vector<16x128xf32>
    %c0_39 = arith.constant 0 : index
    %c0_40 = arith.constant 0 : index
    %c0_41 = arith.constant 0 : index
    %105 = vector.load %arg6[%c0_39, %c0_40, %c0_41] : memref<1x1x128xf32, #tpu.memory_space<vmem>>, vector<1x1x128xf32>
    %106 = vector.shape_cast %105 : vector<1x1x128xf32> to vector<1x128xf32>
    %107 = vector.broadcast %106 : vector<1x128xf32> to vector<16x128xf32>
    %108 = arith.addf %104, %107 : vector<16x128xf32>
    %109 = arith.addf %3, %108 : vector<16x128xf32>
    %c0_42 = arith.constant 0 : index
    %c0_43 = arith.constant 0 : index
    %c0_44 = arith.constant 0 : index
    %110 = vector.load %arg7[%c0_42, %c0_43, %c0_44] : memref<1x1x128xf32, #tpu.memory_space<vmem>>, vector<1x1x128xf32>
    %111 = vector.shape_cast %110 : vector<1x1x128xf32> to vector<1x128xf32>
    %c0_45 = arith.constant 0 : index
    %c0_46 = arith.constant 0 : index
    %c0_47 = arith.constant 0 : index
    %112 = vector.load %arg8[%c0_45, %c0_46, %c0_47] : memref<1x1x128xf32, #tpu.memory_space<vmem>>, vector<1x1x128xf32>
    %113 = vector.shape_cast %112 : vector<1x1x128xf32> to vector<1x128xf32>
    %cst_48 = arith.constant dense<0.000000e+00> : vector<16xf32>
    %114 = vector.multi_reduction <add>, %109, %cst_48 [1] : vector<16x128xf32> to vector<16xf32>
    %115 = vector.shape_cast %114 : vector<16xf32> to vector<16x1xf32>
    %cst_49 = arith.constant 1.280000e+02 : f32
    %116 = vector.broadcast %cst_49 : f32 to vector<16x1xf32>
    %117 = arith.divf %115, %116 : vector<16x1xf32>
    %118 = vector.broadcast %117 : vector<16x1xf32> to vector<16x128xf32>
    %119 = arith.subf %109, %118 : vector<16x128xf32>
    %120 = arith.mulf %119, %119 : vector<16x128xf32>
    %cst_50 = arith.constant dense<0.000000e+00> : vector<16xf32>
    %121 = vector.multi_reduction <add>, %120, %cst_50 [1] : vector<16x128xf32> to vector<16xf32>
    %122 = vector.shape_cast %121 : vector<16xf32> to vector<16x1xf32>
    %cst_51 = arith.constant 1.280000e+02 : f32
    %123 = vector.broadcast %cst_51 : f32 to vector<16x1xf32>
    %124 = arith.divf %122, %123 : vector<16x1xf32>
    %125 = vector.broadcast %117 : vector<16x1xf32> to vector<16x128xf32>
    %126 = arith.subf %109, %125 : vector<16x128xf32>
    %cst_52 = arith.constant 9.99999974E-6 : f32
    %127 = vector.broadcast %cst_52 : f32 to vector<16x1xf32>
    %128 = arith.addf %124, %127 : vector<16x1xf32>
    %129 = math.rsqrt %128 : vector<16x1xf32>
    %130 = vector.broadcast %129 : vector<16x1xf32> to vector<16x128xf32>
    %131 = arith.mulf %126, %130 : vector<16x128xf32>
    %132 = vector.broadcast %111 : vector<1x128xf32> to vector<16x128xf32>
    %133 = arith.mulf %131, %132 : vector<16x128xf32>
    %134 = vector.broadcast %113 : vector<1x128xf32> to vector<16x128xf32>
    %135 = arith.addf %133, %134 : vector<16x128xf32>
    %136 = arith.truncf %135 : vector<16x128xf32> to vector<16x128xbf16>
    %c0_53 = arith.constant 0 : index
    %c0_54 = arith.constant 0 : index
    %c0_55 = arith.constant 0 : index
    %137 = vector.load %arg9[%c0_53, %c0_54, %c0_55] : memref<1x128x2048xbf16, #tpu.memory_space<vmem>>, vector<1x128x2048xbf16>
    %138 = vector.shape_cast %137 : vector<1x128x2048xbf16> to vector<128x2048xbf16>
    %cst_56 = arith.constant dense<0.000000e+00> : vector<16x2048xf32>
    %139 = tpu.matmul %136, %138, %cst_56 {dimension_numbers = #tpu.dot_dimension_numbers<[1], [0], [0], [1], [0, 0, 1, 1], [], []>} : vector<16x128xbf16>, vector<128x2048xbf16>, vector<16x2048xf32> -> vector<16x2048xf32>
    %c0_57 = arith.constant 0 : index
    %c0_58 = arith.constant 0 : index
    %c0_59 = arith.constant 0 : index
    %140 = vector.load %arg10[%c0_57, %c0_58, %c0_59] : memref<1x1x2048xf32, #tpu.memory_space<vmem>>, vector<1x1x2048xf32>
    %141 = vector.shape_cast %140 : vector<1x1x2048xf32> to vector<1x2048xf32>
    %142 = vector.broadcast %141 : vector<1x2048xf32> to vector<16x2048xf32>
    %143 = arith.addf %139, %142 : vector<16x2048xf32>
    %cst_60 = arith.constant 0.000000e+00 : f32
    %144 = vector.broadcast %cst_60 : f32 to vector<16x2048xf32>
    %145 = arith.maximumf %143, %144 : vector<16x2048xf32>
    %146 = arith.truncf %145 : vector<16x2048xf32> to vector<16x2048xbf16>
    %c0_61 = arith.constant 0 : index
    %c0_62 = arith.constant 0 : index
    %c0_63 = arith.constant 0 : index
    %147 = vector.load %arg11[%c0_61, %c0_62, %c0_63] : memref<1x2048x128xbf16, #tpu.memory_space<vmem>>, vector<1x2048x128xbf16>
    %148 = vector.shape_cast %147 : vector<1x2048x128xbf16> to vector<2048x128xbf16>
    %cst_64 = arith.constant dense<0.000000e+00> : vector<16x128xf32>
    %149 = tpu.matmul %146, %148, %cst_64 {dimension_numbers = #tpu.dot_dimension_numbers<[1], [0], [0], [1], [0, 0, 1, 1], [], []>} : vector<16x2048xbf16>, vector<2048x128xbf16>, vector<16x128xf32> -> vector<16x128xf32>
    %c0_65 = arith.constant 0 : index
    %c0_66 = arith.constant 0 : index
    %c0_67 = arith.constant 0 : index
    %150 = vector.load %arg12[%c0_65, %c0_66, %c0_67] : memref<1x1x128xf32, #tpu.memory_space<vmem>>, vector<1x1x128xf32>
    %151 = vector.shape_cast %150 : vector<1x1x128xf32> to vector<1x128xf32>
    %152 = vector.broadcast %151 : vector<1x128xf32> to vector<16x128xf32>
    %153 = arith.addf %149, %152 : vector<16x128xf32>
    %154 = arith.addf %135, %153 : vector<16x128xf32>
    %c0_68 = arith.constant 0 : index
    %c0_69 = arith.constant 0 : index
    %c0_70 = arith.constant 0 : index
    %155 = vector.load %arg13[%c0_68, %c0_69, %c0_70] : memref<1x1x128xf32, #tpu.memory_space<vmem>>, vector<1x1x128xf32>
    %156 = vector.shape_cast %155 : vector<1x1x128xf32> to vector<1x128xf32>
    %c0_71 = arith.constant 0 : index
    %c0_72 = arith.constant 0 : index
    %c0_73 = arith.constant 0 : index
    %157 = vector.load %arg14[%c0_71, %c0_72, %c0_73] : memref<1x1x128xf32, #tpu.memory_space<vmem>>, vector<1x1x128xf32>
    %158 = vector.shape_cast %157 : vector<1x1x128xf32> to vector<1x128xf32>
    %cst_74 = arith.constant dense<0.000000e+00> : vector<16xf32>
    %159 = vector.multi_reduction <add>, %154, %cst_74 [1] : vector<16x128xf32> to vector<16xf32>
    %160 = vector.shape_cast %159 : vector<16xf32> to vector<16x1xf32>
    %cst_75 = arith.constant 1.280000e+02 : f32
    %161 = vector.broadcast %cst_75 : f32 to vector<16x1xf32>
    %162 = arith.divf %160, %161 : vector<16x1xf32>
    %163 = vector.broadcast %162 : vector<16x1xf32> to vector<16x128xf32>
    %164 = arith.subf %154, %163 : vector<16x128xf32>
    %165 = arith.mulf %164, %164 : vector<16x128xf32>
    %cst_76 = arith.constant dense<0.000000e+00> : vector<16xf32>
    %166 = vector.multi_reduction <add>, %165, %cst_76 [1] : vector<16x128xf32> to vector<16xf32>
    %167 = vector.shape_cast %166 : vector<16xf32> to vector<16x1xf32>
    %cst_77 = arith.constant 1.280000e+02 : f32
    %168 = vector.broadcast %cst_77 : f32 to vector<16x1xf32>
    %169 = arith.divf %167, %168 : vector<16x1xf32>
    %170 = vector.broadcast %162 : vector<16x1xf32> to vector<16x128xf32>
    %171 = arith.subf %154, %170 : vector<16x128xf32>
    %cst_78 = arith.constant 9.99999974E-6 : f32
    %172 = vector.broadcast %cst_78 : f32 to vector<16x1xf32>
    %173 = arith.addf %169, %172 : vector<16x1xf32>
    %174 = math.rsqrt %173 : vector<16x1xf32>
    %175 = vector.broadcast %174 : vector<16x1xf32> to vector<16x128xf32>
    %176 = arith.mulf %171, %175 : vector<16x128xf32>
    %177 = vector.broadcast %156 : vector<1x128xf32> to vector<16x128xf32>
    %178 = arith.mulf %176, %177 : vector<16x128xf32>
    %179 = vector.broadcast %158 : vector<1x128xf32> to vector<16x128xf32>
    %180 = arith.addf %178, %179 : vector<16x128xf32>
    %c0_79 = arith.constant 0 : index
    %c0_80 = arith.constant 0 : index
    %181 = vector.load %arg18[%c0_79, %c0_80] : memref<16x128xf32, #tpu.memory_space<vmem>>, vector<16x128xf32>
    tpu.vector_store %arg18[%c0_79, %c0_80], %180 {strides = array<i32>} : memref<16x128xf32, #tpu.memory_space<vmem>>, vector<16x128xf32>,
    %c3_i32 = arith.constant 3 : i32
    %182 = arith.cmpi eq, %arg0, %c3_i32 : i32
    %183 = arith.extui %182 : i1 to i32
    %c0_i32_81 = arith.constant 0 : i32
    %184 = arith.cmpi ne, %183, %c0_i32_81 : i32
    scf.if %184 {
      %185 = arith.truncf %180 : vector<16x128xf32> to vector<16x128xbf16>
      %c0_82 = arith.constant 0 : index
      %c0_83 = arith.constant 0 : index
      %186 = vector.load %arg15[%c0_82, %c0_83] : memref<128x512xbf16, #tpu.memory_space<vmem>>, vector<128x512xbf16>
      %cst_84 = arith.constant dense<0.000000e+00> : vector<16x512xf32>
      %187 = tpu.matmul %185, %186, %cst_84 {dimension_numbers = #tpu.dot_dimension_numbers<[1], [0], [0], [1], [0, 0, 1, 1], [], []>} : vector<16x128xbf16>, vector<128x512xbf16>, vector<16x512xf32> -> vector<16x512xf32>
      %c0_85 = arith.constant 0 : index
      %c0_86 = arith.constant 0 : index
      %188 = vector.load %arg16[%c0_85, %c0_86] : memref<1x512xf32, #tpu.memory_space<vmem>>, vector<1x512xf32>
      %189 = vector.broadcast %188 : vector<1x512xf32> to vector<16x512xf32>
      %190 = arith.addf %187, %189 : vector<16x512xf32>
      %c0_87 = arith.constant 0 : index
      %c0_88 = arith.constant 0 : index
      %191 = vector.load %arg17[%c0_87, %c0_88] : memref<16x512xf32, #tpu.memory_space<vmem>>, vector<16x512xf32>
      tpu.vector_store %arg17[%c0_87, %c0_88], %190 {strides = array<i32>} : memref<16x512xf32, #tpu.memory_space<vmem>>, vector<16x512xf32>,
    } else {
    }
    return
  }
  func.func @transform_0(%arg0: i32) -> (i32, i32) {
    %c0_i32 = arith.constant 0 : i32
    %c0_i32_0 = arith.constant 0 : i32
    %c0_i32_1 = arith.constant 0 : i32
    return %c0_i32, %c0_i32_0 : i32, i32
  }
  func.func @transform_1(%arg0: i32) -> (i32, i32) {
    %c0_i32 = arith.constant 0 : i32
    %c0_i32_0 = arith.constant 0 : i32
    %c0_i32_1 = arith.constant 0 : i32
    return %c0_i32, %c0_i32_0 : i32, i32
  }
  func.func @transform_2(%arg0: i32) -> (i32, i32, i32) {
    %c0_i32 = arith.constant 0 : i32
    %c0_i32_0 = arith.constant 0 : i32
    %c0_i32_1 = arith.constant 0 : i32
    return %arg0, %c0_i32, %c0_i32_0 : i32, i32, i32
  }
  func.func @transform_3(%arg0: i32) -> (i32, i32, i32) {
    %c0_i32 = arith.constant 0 : i32
    %c0_i32_0 = arith.constant 0 : i32
    %c0_i32_1 = arith.constant 0 : i32
    return %arg0, %c0_i32, %c0_i32_0 : i32, i32, i32
  }
  func.func @transform_4(%arg0: i32) -> (i32, i32, i32) {
    %c0_i32 = arith.constant 0 : i32
    %c0_i32_0 = arith.constant 0 : i32
    %c0_i32_1 = arith.constant 0 : i32
    return %arg0, %c0_i32, %c0_i32_0 : i32, i32, i32
  }
  func.func @transform_5(%arg0: i32) -> (i32, i32, i32) {
    %c0_i32 = arith.constant 0 : i32
    %c0_i32_0 = arith.constant 0 : i32
    %c0_i32_1 = arith.constant 0 : i32
    return %arg0, %c0_i32, %c0_i32_0 : i32, i32, i32
  }
  func.func @transform_6(%arg0: i32) -> (i32, i32, i32) {
    %c0_i32 = arith.constant 0 : i32
    %c0_i32_0 = arith.constant 0 : i32
    %c0_i32_1 = arith.constant 0 : i32
    return %arg0, %c0_i32, %c0_i32_0 : i32, i32, i32
  }
  func.func @transform_7(%arg0: i32) -> (i32, i32, i32) {
    %c0_i32 = arith.constant 0 : i32
    %c0_i32_0 = arith.constant 0 : i32
    %c0_i32_1 = arith.constant 0 : i32
    return %arg0, %c0_i32, %c0_i32_0 : i32, i32, i32
  }
  func.func @transform_8(%arg0: i32) -> (i32, i32, i32) {
    %c0_i32 = arith.constant 0 : i32
    %c0_i32_0 = arith.constant 0 : i32
    %c0_i32_1 = arith.constant 0 : i32
    return %arg0, %c0_i32, %c0_i32_0 : i32, i32, i32
  }
  func.func @transform_9(%arg0: i32) -> (i32, i32, i32) {
    %c0_i32 = arith.constant 0 : i32
    %c0_i32_0 = arith.constant 0 : i32
    %c0_i32_1 = arith.constant 0 : i32
    return %arg0, %c0_i32, %c0_i32_0 : i32, i32, i32
  }
  func.func @transform_10(%arg0: i32) -> (i32, i32, i32) {
    %c0_i32 = arith.constant 0 : i32
    %c0_i32_0 = arith.constant 0 : i32
    %c0_i32_1 = arith.constant 0 : i32
    return %arg0, %c0_i32, %c0_i32_0 : i32, i32, i32
  }
  func.func @transform_11(%arg0: i32) -> (i32, i32, i32) {
    %c0_i32 = arith.constant 0 : i32
    %c0_i32_0 = arith.constant 0 : i32
    %c0_i32_1 = arith.constant 0 : i32
    return %arg0, %c0_i32, %c0_i32_0 : i32, i32, i32
  }
  func.func @transform_12(%arg0: i32) -> (i32, i32, i32) {
    %c0_i32 = arith.constant 0 : i32
    %c0_i32_0 = arith.constant 0 : i32
    %c0_i32_1 = arith.constant 0 : i32
    return %arg0, %c0_i32, %c0_i32_0 : i32, i32, i32
  }
  func.func @transform_13(%arg0: i32) -> (i32, i32, i32) {
    %c0_i32 = arith.constant 0 : i32
    %c0_i32_0 = arith.constant 0 : i32
    %c0_i32_1 = arith.constant 0 : i32
    return %arg0, %c0_i32, %c0_i32_0 : i32, i32, i32
  }
  func.func @transform_14(%arg0: i32) -> (i32, i32) {
    %c0_i32 = arith.constant 0 : i32
    %c0_i32_0 = arith.constant 0 : i32
    %c0_i32_1 = arith.constant 0 : i32
    return %c0_i32, %c0_i32_0 : i32, i32
  }
  func.func @transform_15(%arg0: i32) -> (i32, i32) {
    %c0_i32 = arith.constant 0 : i32
    %c0_i32_0 = arith.constant 0 : i32
    %c0_i32_1 = arith.constant 0 : i32
    return %c0_i32, %c0_i32_0 : i32, i32
  }
  func.func @transform_16(%arg0: i32) -> (i32, i32) {
    %c0_i32 = arith.constant 0 : i32
    %c0_i32_0 = arith.constant 0 : i32
    %c0_i32_1 = arith.constant 0 : i32
    return %c0_i32, %c0_i32_0 : i32, i32
  }
}

</mosaic_0001>

<bundles_post_ra>
// kernel: gpt_pallas_forward.1
= control target key start
LH: loop header
LB: loop body
LE: loop exit
PB: predicated region body
PF: predicated region fallthrough
CT: control target
= control target key end

     0   :  { %s9571_s0 = inlined_call_operand.vmem [shape: s32[16,1], index: 0, kind: input, shape index: {}]   ;;  %s9572_s1 = inlined_call_operand.hbm [shape: bf16[512,128], index: 1, kind: input, shape index: {}]   ;;  %s9573_s2 = inlined_call_operand.hbm [shape: bf16[4,128,384], index: 2, kind: input, shape index: {}]   ;;  %s9574_s3 = inlined_call_operand.hbm [shape: f32[4,1,384], index: 3, kind: input, shape index: {}]   ;;  %s9575_s4 = inlined_call_operand.hbm [shape: bf16[4,128,128], index: 4, kind: input, shape index: {}]   ;;  %s9576_s5 = inlined_call_operand.hbm [shape: f32[4,1,128], index: 5, kind: input, shape index: {}]   ;;  %s9577_s6 = inlined_call_operand.hbm [shape: f32[4,1,128], index: 6, kind: input, shape index: {}]   ;;  %s9578_s7 = inlined_call_operand.hbm [shape: f32[4,1,128], index: 7, kind: input, shape index: {}]   ;;  %s9579_s8 = inlined_call_operand.hbm [shape: bf16[4,128,2048], index: 8, kind: input, shape index: {}]   ;;  %s9580_s9 = inlined_call_operand.hbm [shape: f32[4,1,2048], index: 9, kind: input, shape index: {}]   ;;  %s9581_s10 = inlined_call_operand.hbm [shape: bf16[4,2048,128], index: 10, kind: input, shape index: {}]   ;;  %s9582_s11 = inlined_call_operand.hbm [shape: f32[4,1,128], index: 11, kind: input, shape index: {}]   ;;  %s9583_s12 = inlined_call_operand.hbm [shape: f32[4,1,128], index: 12, kind: input, shape index: {}]   ;;  %s9584_s13 = inlined_call_operand.hbm [shape: f32[4,1,128], index: 13, kind: input, shape index: {}]   ;;  %s9585_s14 = inlined_call_operand.hbm [shape: bf16[128,512], index: 14, kind: input, shape index: {}]   ;;  %s9586_s15 = inlined_call_operand.hbm [shape: f32[1,512], index: 15, kind: input, shape index: {}]   ;;  %s9587_s16 = inlined_call_operand.vmem [shape: f32[16,512], index: 16, kind: output, shape index: {}]  }
   0x1   :  { %9623 = sst [smem:[#allocation41_spill]] %s9571_s0 }
   0x2   :  { %9624 = sst [smem:[#allocation42_spill]] %s9573_s2 }
   0x3   :  { %9625 = sst [smem:[#allocation43_spill]] %s9575_s4 }
   0x4   :  { %9626 = sst [smem:[#allocation44_spill]] %s9578_s7 }
   0x5   :  { %9627 = sst [smem:[#allocation45_spill]] %s9580_s9 }
   0x6   :  { %9628 = sst [smem:[#allocation46_spill]] %s9582_s11 }
   0x7   :  { %9629 = sst [smem:[#allocation47_spill]] %s9584_s13 }
   0x8   :  { %9630 = sst [smem:[#allocation48_spill]] %s9585_s14 }
   0x9   :  { %9631 = sst [smem:[#allocation49_spill]] %s9587_s16 }
   0xa   :  { %21 = vsyncpa [#allocation4], 0 }
   0xb   :  { %22 = vsyncpa [#allocation6], 0 }
   0xc   :  { %24 = vsyncpa [#allocation6 + $0x1], 0 }
   0xd   :  { %25 = vsyncpa [#allocation9], 0 }
   0xe   :  { %27 = vsyncpa [#allocation9 + $0x1], 0 }
   0xf   :  { %28 = vsyncpa [#allocation12], 0 }
  0x10   :  { %30 = vsyncpa [#allocation12 + $0x1], 0 }
  0x11   :  { %31 = vsyncpa [#allocation15], 0 }
  0x12   :  { %33 = vsyncpa [#allocation15 + $0x1], 0 }
  0x13   :  { %34 = vsyncpa [#allocation18], 0 }
  0x14   :  { %36 = vsyncpa [#allocation18 + $0x1], 0 }
  0x15   :  { %37 = vsyncpa [#allocation21], 0 }
  0x16   :  { %39 = vsyncpa [#allocation21 + $0x1], 0 }
  0x17   :  { %40 = vsyncpa [#allocation24], 0  ;;  %s8360_s21 = smov 0   ;;  %s8362_s22 = smov 0  }
  0x18   :  { %s8364_s23 = smov 0   ;;  %s8366_s24 = smov 0  }
  0x19 LB: > { %9632 = sst [smem:[#allocation34_spill]] %s8234_s22  ;;  %s8379_s25 = sadd.s32 4294967295, %s8242_s24   ;;  %s8242_s24 = sphi %s8366_s24, %s9690_s24   ;;  %s8238_s23 = sphi %s8364_s23, %s9693_s23   ;;  %s8234_s22 = sphi %s8362_s22, %s9692_s22   ;;  %s8230_s21 = sphi %s8360_s21, %s9691_s21  }
  0x1a   : > { %9633 = sst [smem:[#allocation35_spill]] %s8238_s23  ;;  %s8382_s26 = sadd.s32 1, %s8242_s24  }
  0x1b   : > { %9634 = sst [smem:[#allocation36_spill]] %s8379_s25  ;;  %s92_s27 = ssub.s32 %s8242_s24, %s8382_s26 }
  0x1c   : > { %9635 = sst [smem:[#allocation37_spill]] %s8382_s26  ;;  %s95_s28 = sadd.s32 1, %s8238_s23 }
  0x1d   : > { %p93_p0 = scmp.eq.s32.totalorder %s92_s27, 0  ;;  %p102_p1 = scmp.ne.s32.totalorder %s8238_s23, %s8234_s22 }
  0x1e   : > { %p103_p2 = scmp.eq.s32.totalorder %s8242_s24, 0  ;;  %p108_p3 = scmp.ne.s32.totalorder %s8234_s22, %s8230_s21 }
  0x1f   : > { %s8392_s29 = scalar_select %p93_p0, %s8238_s23, %s95_s28  }
  0x20   : > { %p8394_p4 = por %p103_p2, %p102_p1  ;;  %p9596_p5 = scmp.eq.s32.totalorder %s8379_s25, 0 }
  0x21   : > { %9636 = sst [smem:[#allocation38_spill]] %s8392_s29  ;;  %p6458_p6 = scmp.ge.s32.totalorder %s8242_s24, 1 }
  0x22   : > { %p468_p7 = scmp.lt.s32.totalorder %s8242_s24, 5  ;;  %p8403_p8 = por %p9596_p5, %p108_p3 }
  0x23   : > { %s8244_s18 = smov [#allocation23]   ;;  %p7390_p13 = scmp.lt.s32.totalorder %s8242_s24, 4 }
  0x24   : > { %s9638_s0 = scalar_select %p8403_p8, 1, 0 }
  0x25   : > { %p8408_p10 = pnand %p6458_p6, %p468_p7  ;;  %s496_s19 = sshll.u32 %s8244_s18, 4  ;;  %s497_s19 = int_to_ptr.vmem [resolvable:$true] %s496_s19 }
  0x26   : > { %9639 = sst [smem:[#allocation39_spill]] %s9638_s0  ;;  %s8422_s21 = sand.u32 1, %s8238_s23  }
  0x27   : > { %s9640_s17 = scalar_select %p8408_p10, 1, 0 }
  0x28   : > { %p7340_p11 = pneg %p8408_p10  ;;  %s8425_s27 = sand.u32 1, %s8242_s24  }
  0x29   : > { %9641 = sst [smem:[#allocation40_spill]] %s9640_s17  ;;  %p8429_p0 = pnand %p7390_p13, %p8394_p4 }
  0x2a   : > { %p8416_p12 = pnand %p7340_p11, %p9596_p5  ;;  %s9644_s14 = sld [smem:[#allocation48_spill]] }
  0x2b   : > { %s9643_s28 = scalar_select %p8429_p0, 1, 0 }
  0x2c   : > { %s9642_s20 = scalar_select %p8416_p12, 1, 0 }
  0x2d   : > { %p8441_p2 = pneg %p8416_p12 }
  0x2f   : > { %s9645_s22 = scalar_select %p8441_p2, 1, 0 }
  0x30   : > { %s7736_s26 = scalar_lea.hbm %s9644_s14, 4096 }
  0x31   : > { %p7737_p1 = scmp.ne.s32.totalorder %s9644_s14, %s7736_s26  ;;  %p7743_p6 = scmp.lt.u32.totalorder %s7736_s26, %s9644_s14 }
  0x33   : > { %p7739_p3 = pnand %p8441_p2, %p7737_p1 }
  0x35   : > { %p7740_p4 = pneg %p7739_p3 }
  0x37   : > { %p7745_p7 = pnand %p7743_p6, %p7740_p4 }
  0x39   : > { %7748 = shalt.err (!%p7745_p7)
}
  0x3a   : > { %s7749_s29 = scalar_lea.vmem %s497_s19, 4096  ;;  %p7757_p5 = scmp.lt.s32.totalorder %s497_s19, %s497_s19 }
  0x3b   : > { %p7750_p11 = scmp.ne.s32.totalorder %s497_s19, %s7749_s29  ;;  %p7758_p8 = scmp.lt.s32.totalorder %s7749_s29, %s7749_s29 }
  0x3d   : > { %p7752_p13 = pnand %p7750_p11, %p8441_p2  ;;  %p7759_p10 = por %p7758_p8, %p7757_p5 }
  0x3f   : > { %p7753_p9 = pneg %p7752_p13 }
  0x41   : > { %p7760_p0 = pnand %p7759_p10, %p7753_p9 }
  0x43   : > { %7763 = shalt.err (!%p7760_p0)
}
  0x44   : > { %s8245_s16 = smov 256   ;;  %s8246_s23 = smov 16  }
  0x45   : > { %7346 = dma.hbm_to_vmem [thread:$0]  (!%p8416_p12), %s9644_s14, 4096, %s497_s19, [#allocation24], %s8245_s16, %s8245_s16, %s8246_s23  }
  0x46   : > { %s7298_s18 = smul.u32 192, %s8422_s21  ;;  %s9646_s2 = sld [smem:[#allocation42_spill]] }
  0x47   : > { %s7299_s30 = smul.u32 3072, %s8242_s24  ;;  %s9612_s9 = scalar_lea.sflag [#allocation6], %s8425_s27 }
  0x48   : > { %s525_s13 = scalar_lea.vmem [#allocation5], %s7298_s18  ;;  %p9647_p8 = scmp.ne.s32.totalorder %s9643_s28, 0 }
  0x49   : > { %s532_s11 = sshll.u32 %s525_s13, 4  ;;  %s8464_s11 = int_to_ptr.vmem [resolvable:$true] %s532_s11 }
  0x4a   : > { %p8471_p9 = pneg %p9647_p8 }
  0x4c   : > { %s8462_s29 = scalar_lea.hbm %s9646_s2, %s7299_s30  ;;  %s7769_s16 = scalar_lea.hbm %s9646_s2, 12288 }
  0x4d   : > { %s7764_s7 = scalar_lea.hbm %s8462_s29, 3072  ;;  %p7770_p1 = scmp.lt.u32.totalorder %s8462_s29, %s9646_s2 }
  0x4e   : > { %p7765_p5 = scmp.ne.s32.totalorder %s8462_s29, %s7764_s7  ;;  %p7771_p3 = scmp.lt.u32.totalorder %s7769_s16, %s7764_s7 }
  0x4f   : > { %s9648_s19 = scalar_select %p8471_p9, 1, 0 }
  0x50   : > { %p7767_p10 = pnand %p8471_p9, %p7765_p5  ;;  %p7772_p4 = por %p7771_p3, %p7770_p1 }
  0x51   : > { %p7773_p6 = scmp.lt.u32.totalorder %s7764_s7, %s8462_s29 }
  0x52   : > { %p7768_p0 = pneg %p7767_p10 }
  0x53   : > { %p7774_p7 = por %p7773_p6, %p7772_p4 }
  0x55   : > { %p7775_p11 = pnand %p7774_p7, %p7768_p0 }
  0x57   : > { %7778 = shalt.err (!%p7775_p11)
}
  0x58   : > { %s7779_s26 = scalar_lea.vmem %s8464_s11, 3072  ;;  %s8247_s0 = smov [#allocation5]  }
  0x59   : > { %p7780_p13 = scmp.ne.s32.totalorder %s8464_s11, %s7779_s26  ;;  %s7784_s18 = sshll.u32 %s8247_s0, 4  ;;  %s7785_s18 = int_to_ptr.vmem [resolvable:$false] %s7784_s18 }
  0x5a   : > { %s7786_s30 = scalar_lea.vmem %s7785_s18, 6144  ;;  %p7787_p12 = scmp.lt.s32.totalorder %s8464_s11, %s7785_s18 }
  0x5b   : > { %p7782_p5 = pnand %p7780_p13, %p8471_p9  ;;  %p7788_p2 = scmp.lt.s32.totalorder %s7786_s30, %s7779_s26 }
  0x5d   : > { %p7783_p10 = pneg %p7782_p5  ;;  %p7789_p1 = por %p7788_p2, %p7787_p12 }
  0x5f   : > { %p7790_p3 = pnand %p7789_p1, %p7783_p10 }
  0x61   : > { %7793 = shalt.err (!%p7790_p3)
}
  0x62   : > { %s8248_s7 = smov 192   ;;  %s8249_s25 = smov 12  }
  0x63   : > { %7353 = dma.hbm_to_vmem [thread:$0]  (!%p9647_p8), %s8462_s29, 3072, %s8464_s11, %s9612_s9, %s8248_s7, %s8248_s7, %s8249_s25  }
  0x64   : > { %s6465_s17 = sshll.u32 %s8422_s21, 6  ;;  %s6889_s16 = sshll.u32 %s8242_s24, 10 }
  0x65   : > { %s9649_s4 = sld [smem:[#allocation43_spill]]  ;;  %s565_s0 = scalar_lea.vmem [#allocation8], %s6465_s17 }
  0x66   : > { %s572_s18 = sshll.u32 %s565_s0, 4  ;;  %s8506_s30 = sshll.u32 %s8242_s24, 4  ;;  %s8503_s18 = int_to_ptr.vmem [resolvable:$true] %s572_s18 }
  0x67   : > { %s9611_s2 = scalar_lea.sflag [#allocation9], %s8425_s27 }
  0x6b   : > { %s8501_s26 = scalar_lea.hbm %s9649_s4, %s6889_s16  ;;  %s7799_s7 = scalar_lea.hbm %s9649_s4, 4096 }
  0x6c   : > { %s7794_s14 = scalar_lea.hbm %s8501_s26, 1024  ;;  %p7800_p4 = scmp.lt.u32.totalorder %s8501_s26, %s9649_s4 }
  0x6d   : > { %p7795_p12 = scmp.ne.s32.totalorder %s8501_s26, %s7794_s14  ;;  %p7801_p6 = scmp.lt.u32.totalorder %s7799_s7, %s7794_s14 }
  0x6e   : > { %p7803_p11 = scmp.lt.u32.totalorder %s7794_s14, %s8501_s26 }
  0x6f   : > { %p7797_p2 = pnand %p7795_p12, %p8471_p9  ;;  %p7802_p7 = por %p7801_p6, %p7800_p4 }
  0x71   : > { %p7798_p0 = pneg %p7797_p2  ;;  %p7804_p13 = por %p7803_p11, %p7802_p7 }
  0x73   : > { %p7805_p5 = pnand %p7804_p13, %p7798_p0 }
  0x75   : > { %7808 = shalt.err (!%p7805_p5)
}
  0x76   : > { %s7809_s17 = scalar_lea.vmem %s8503_s18, 1024  ;;  %s8250_s23 = smov [#allocation8]  }
  0x77   : > { %p7810_p10 = scmp.ne.s32.totalorder %s8503_s18, %s7809_s17  ;;  %s7814_s13 = sshll.u32 %s8250_s23, 4  ;;  %s7815_s13 = int_to_ptr.vmem [resolvable:$false] %s7814_s13 }
  0x78   : > { %s7816_s0 = scalar_lea.vmem %s7815_s13, 2048  ;;  %p7817_p12 = scmp.lt.s32.totalorder %s8503_s18, %s7815_s13 }
  0x79   : > { %p7812_p1 = pnand %p7810_p10, %p8471_p9  ;;  %p7818_p2 = scmp.lt.s32.totalorder %s7816_s0, %s7809_s17 }
  0x7b   : > { %p7813_p3 = pneg %p7812_p1  ;;  %p7819_p4 = por %p7818_p2, %p7817_p12 }
  0x7d   : > { %p7820_p6 = pnand %p7819_p4, %p7813_p3 }
  0x7f   : > { %7823 = shalt.err (!%p7820_p6)
}
  0x80   : > { %s9620_s14 = smov 64   ;;  %s9615_s11 = smov 4  }
  0x81   : > { %7359 = dma.hbm_to_vmem [thread:$0]  (!%p9647_p8), %s8501_s26, 1024, %s8503_s18, %s9611_s2, %s9620_s14, %s9620_s14, %s9615_s11  }
  0x82   : > { %s8539_s25 = scalar_lea.hbm %s9577_s6, %s8506_s30  ;;  %s602_s16 = scalar_lea.vmem [#allocation11], %s8422_s21 }
  0x83   : > { %s609_s17 = sshll.u32 %s602_s16, 4  ;;  %s9614_s23 = scalar_lea.sflag [#allocation12], %s8425_s27  ;;  %s610_s17 = int_to_ptr.vmem [resolvable:$true] %s609_s17 }
  0x84   : > { %s7824_s13 = scalar_lea.hbm %s8539_s25, 16  ;;  %s7829_s18 = scalar_lea.hbm %s9577_s6, 64 }
  0x85   : > { %p7825_p0 = scmp.ne.s32.totalorder %s8539_s25, %s7824_s13  ;;  %p7830_p13 = scmp.lt.u32.totalorder %s8539_s25, %s9577_s6 }
  0x86   : > { %p7831_p5 = scmp.lt.u32.totalorder %s7829_s18, %s7824_s13  ;;  %p7833_p1 = scmp.lt.u32.totalorder %s7824_s13, %s8539_s25 }
  0x87   : > { %p7827_p7 = pnand %p7825_p0, %p8471_p9 }
  0x88   : > { %p7832_p10 = por %p7831_p5, %p7830_p13 }
  0x89   : > { %p7828_p11 = pneg %p7827_p7 }
  0x8a   : > { %p7834_p3 = por %p7833_p1, %p7832_p10 }
  0x8c   : > { %p7835_p12 = pnand %p7834_p3, %p7828_p11 }
  0x8e   : > { %7838 = shalt.err (!%p7835_p12)
}
  0x8f   : > { %s7839_s16 = scalar_lea.vmem %s610_s17, 16  ;;  %s8253_s2 = smov [#allocation11]  }
  0x90   : > { %p7840_p2 = scmp.ne.s32.totalorder %s610_s17, %s7839_s16  ;;  %s7844_s9 = sshll.u32 %s8253_s2, 4  ;;  %s7845_s9 = int_to_ptr.vmem [resolvable:$false] %s7844_s9 }
  0x91   : > { %s7846_s0 = scalar_lea.vmem %s7845_s9, 32  ;;  %p7847_p0 = scmp.lt.s32.totalorder %s610_s17, %s7845_s9 }
  0x92   : > { %p7842_p4 = pnand %p7840_p2, %p8471_p9  ;;  %p7848_p7 = scmp.lt.s32.totalorder %s7846_s0, %s7839_s16 }
  0x94   : > { %p7843_p6 = pneg %p7842_p4  ;;  %p7849_p8 = por %p7848_p7, %p7847_p0 }
  0x96   : > { %p7850_p5 = pnand %p7849_p8, %p7843_p6 }
  0x98   : > { %7853 = shalt.err (!%p7850_p5)
}
  0x99   : > { %p9650_p13 = scmp.ne.s32.totalorder %s9643_s28, 0  ;;  %s6471_s2 = sshll.u32 %s8422_s21, 10 }
  0x9a   : > { %s6890_s13 = sshll.u32 %s8242_s24, 14  ;;  %s637_s29 = scalar_lea.vmem [#allocation14], %s6471_s2 }
  0x9b   : > { %7365 = dma.hbm_to_vmem [thread:$0]  (!%p9650_p13), %s8539_s25, 16, %s610_s17, %s9614_s23  }
  0x9c   : > { %s8569_s18 = scalar_lea.hbm %s9579_s8, %s6890_s13  ;;  %s644_s7 = sshll.u32 %s637_s29, 4  ;;  %s8573_s7 = int_to_ptr.vmem [resolvable:$true] %s644_s7 }
  0x9d   : > { %s9618_s16 = scalar_lea.sflag [#allocation15], %s8425_s27  ;;  %s7854_s0 = scalar_lea.hbm %s8569_s18, 16384 }
  0x9e   : > { %p7855_p8 = scmp.ne.s32.totalorder %s8569_s18, %s7854_s0  ;;  %s7859_s9 = scalar_lea.hbm %s9579_s8, 65536 }
  0x9f   : > { %p7860_p1 = scmp.lt.u32.totalorder %s8569_s18, %s9579_s8  ;;  %p7861_p3 = scmp.lt.u32.totalorder %s7859_s9, %s7854_s0 }
  0xa0   : > { %p7857_p11 = pnand %p7855_p8, %p8471_p9  ;;  %p7863_p2 = scmp.lt.u32.totalorder %s7854_s0, %s8569_s18 }
  0xa1   : > { %p7862_p12 = por %p7861_p3, %p7860_p1 }
  0xa2   : > { %p7858_p10 = pneg %p7857_p11 }
  0xa3   : > { %p7864_p4 = por %p7863_p2, %p7862_p12 }
  0xa5   : > { %p7865_p6 = pnand %p7864_p4, %p7858_p10 }
  0xa7   : > { %7868 = shalt.err (!%p7865_p6)
}
  0xa8   : > { %s7869_s29 = scalar_lea.vmem %s8573_s7, 16384  ;;  %s8254_s25 = smov [#allocation14]  }
  0xa9   : > { %p7870_p0 = scmp.ne.s32.totalorder %s8573_s7, %s7869_s29  ;;  %s7874_s17 = sshll.u32 %s8254_s25, 4  ;;  %s7875_s17 = int_to_ptr.vmem [resolvable:$false] %s7874_s17 }
  0xaa   : > { %s7876_s23 = scalar_lea.vmem %s7875_s17, 32768  ;;  %p7877_p8 = scmp.lt.s32.totalorder %s8573_s7, %s7875_s17 }
  0xab   : > { %p7872_p7 = pnand %p7870_p0, %p8471_p9  ;;  %p7878_p11 = scmp.lt.s32.totalorder %s7876_s23, %s7869_s29 }
  0xad   : > { %p7873_p5 = pneg %p7872_p7  ;;  %p7879_p1 = por %p7878_p11, %p7877_p8 }
  0xaf   : > { %p7880_p3 = pnand %p7879_p1, %p7873_p5 }
  0xb1   : > { %7883 = shalt.err (!%p7880_p3)
}
  0xb2   : > { %s8255_s0 = smov 1024   ;;  %s8605_s29 = scalar_lea.hbm %s9581_s10, %s6890_s13 }
  0xb3   : > { %7371 = dma.hbm_to_vmem [thread:$0]  (!%p9650_p13), %s8569_s18, 16384, %s8573_s7, %s9618_s16, %s8255_s0, %s8255_s0, %s9620_s14  }
  0xb4   : > { %s677_s25 = scalar_lea.vmem [#allocation17], %s6471_s2  ;;  %s9617_s23 = scalar_lea.sflag [#allocation18], %s8425_s27 }
  0xb5   : > { %s684_s17 = sshll.u32 %s677_s25, 4  ;;  %s7884_s11 = scalar_lea.hbm %s8605_s29, 16384  ;;  %s8609_s17 = int_to_ptr.vmem [resolvable:$true] %s684_s17 }
  0xb6   : > { %p7885_p10 = scmp.ne.s32.totalorder %s8605_s29, %s7884_s11  ;;  %s7889_s13 = scalar_lea.hbm %s9581_s10, 65536 }
  0xb7   : > { %p7890_p4 = scmp.lt.u32.totalorder %s8605_s29, %s9581_s10  ;;  %p7891_p6 = scmp.lt.u32.totalorder %s7889_s13, %s7884_s11 }
  0xb8   : > { %p7887_p12 = pnand %p7885_p10, %p8471_p9  ;;  %p7893_p7 = scmp.lt.u32.totalorder %s7884_s11, %s8605_s29 }
  0xb9   : > { %p7892_p0 = por %p7891_p6, %p7890_p4 }
  0xba   : > { %p7888_p2 = pneg %p7887_p12 }
  0xbb   : > { %p7894_p5 = por %p7893_p7, %p7892_p0 }
  0xbd   : > { %p7895_p8 = pnand %p7894_p5, %p7888_p2 }
  0xbf   : > { %7898 = shalt.err (!%p7895_p8)
}
  0xc0   : > { %s7899_s2 = scalar_lea.vmem %s8609_s17, 16384  ;;  %s8256_s26 = smov [#allocation17]  }
  0xc1   : > { %p7900_p11 = scmp.ne.s32.totalorder %s8609_s17, %s7899_s2  ;;  %s7904_s25 = sshll.u32 %s8256_s26, 4  ;;  %s7905_s25 = int_to_ptr.vmem [resolvable:$false] %s7904_s25 }
  0xc2   : > { %s7906_s18 = scalar_lea.vmem %s7905_s25, 32768  ;;  %p7907_p10 = scmp.lt.s32.totalorder %s8609_s17, %s7905_s25 }
  0xc3   : > { %p7902_p1 = pnand %p7900_p11, %p8471_p9  ;;  %p7908_p12 = scmp.lt.s32.totalorder %s7906_s18, %s7899_s2 }
  0xc5   : > { %p7903_p3 = pneg %p7902_p1  ;;  %p7909_p4 = por %p7908_p12, %p7907_p10 }
  0xc7   : > { %p7910_p6 = pnand %p7909_p4, %p7903_p3 }
  0xc9   : > { %7913 = shalt.err (!%p7910_p6)
}
  0xca   : > { %s9651_s11 = smov 4   ;;  %s8642_s0 = scalar_lea.hbm %s9583_s12, %s8506_s30 }
  0xcb   : > { %7377 = dma.hbm_to_vmem [thread:$0]  (!%p9650_p13), %s8605_s29, 16384, %s8609_s17, %s9617_s23, %s9620_s14, %s9620_s14, %s9651_s11  }
  0xcc   : > { %s714_s9 = scalar_lea.vmem [#allocation20], %s8422_s21  ;;  %s712_s26 = scalar_lea.sflag [#allocation21], %s8425_s27 }
  0xcd   : > { %s721_s2 = sshll.u32 %s714_s9, 4  ;;  %s7914_s25 = scalar_lea.hbm %s8642_s0, 16  ;;  %s722_s2 = int_to_ptr.vmem [resolvable:$true] %s721_s2 }
  0xce   : > { %p7915_p2 = scmp.ne.s32.totalorder %s8642_s0, %s7914_s25  ;;  %s7919_s17 = scalar_lea.hbm %s9583_s12, 64 }
  0xcf   : > { %p7920_p5 = scmp.lt.u32.totalorder %s8642_s0, %s9583_s12  ;;  %p7921_p8 = scmp.lt.u32.totalorder %s7919_s17, %s7914_s25 }
  0xd0   : > { %p7917_p0 = pnand %p7915_p2, %p8471_p9  ;;  %p7923_p1 = scmp.lt.u32.totalorder %s7914_s25, %s8642_s0 }
  0xd1   : > { %p7922_p11 = por %p7921_p8, %p7920_p5 }
  0xd2   : > { %p7918_p7 = pneg %p7917_p0 }
  0xd3   : > { %p7924_p3 = por %p7923_p1, %p7922_p11 }
  0xd5   : > { %p7925_p10 = pnand %p7924_p3, %p7918_p7 }
  0xd7   : > { %7928 = shalt.err (!%p7925_p10)
}
  0xd8   : > { %s7929_s9 = scalar_lea.vmem %s722_s2, 16  ;;  %s8257_s23 = smov [#allocation20]  }
  0xd9   : > { %p7930_p12 = scmp.ne.s32.totalorder %s722_s2, %s7929_s9  ;;  %s7934_s16 = sshll.u32 %s8257_s23, 4  ;;  %s7935_s16 = int_to_ptr.vmem [resolvable:$false] %s7934_s16 }
  0xda   : > { %s7936_s18 = scalar_lea.vmem %s7935_s16, 32  ;;  %p7937_p2 = scmp.lt.s32.totalorder %s722_s2, %s7935_s16 }
  0xdb   : > { %p7932_p4 = pnand %p7930_p12, %p8471_p9  ;;  %p7938_p0 = scmp.lt.s32.totalorder %s7936_s18, %s7929_s9 }
  0xdd   : > { %p7933_p6 = pneg %p7932_p4  ;;  %p7939_p13 = por %p7938_p0, %p7937_p2 }
  0xdf   : > { %p7940_p5 = pnand %p7939_p13, %p7933_p6 }
  0xe1   : > { %7943 = shalt.err (!%p7940_p5)
}
  0xe2   : > { %p9652_p8 = scmp.ne.s32.totalorder %s9643_s28, 0  ;;  %s8258_s25 = smov [#allocation3]  }
  0xe3   : > { %s483_s29 = sshll.u32 %s8258_s25, 4  ;;  %s8259_s17 = smov [#allocation25]   ;;  %s484_s29 = int_to_ptr.vmem [resolvable:$true] %s483_s29 }
  0xe4   : > { %7383 = dma.hbm_to_vmem [thread:$0]  (!%p9652_p8), %s8642_s0, 16, %s722_s2, %s712_s26  }
  0xe5   : > { %s510_s7 = sshll.u32 %s8259_s17, 4  ;;  %s7944_s16 = scalar_lea.hbm %s9572_s1, 4096  ;;  %s511_s7 = int_to_ptr.vmem [resolvable:$true] %s510_s7 }
  0xe6   : > { %p7945_p13 = scmp.ne.s32.totalorder %s9572_s1, %s7944_s16  ;;  %p9653_p7 = scmp.ne.s32.totalorder %s9645_s22, 0 }
  0xe7   : > { %p7951_p3 = scmp.lt.u32.totalorder %s7944_s16, %s9572_s1 }
  0xe8   : > { %p7947_p11 = pnand %p7945_p13, %p9653_p7 }
  0xea   : > { %p7948_p1 = pneg %p7947_p11 }
  0xec   : > { %p7953_p10 = pnand %p7951_p3, %p7948_p1 }
  0xee   : > { %7956 = shalt.err (!%p7953_p10)
}
  0xef   : > { %s7957_s0 = scalar_lea.vmem %s484_s29, 4096  ;;  %p7965_p2 = scmp.lt.s32.totalorder %s484_s29, %s484_s29 }
  0xf0   : > { %p7958_p12 = scmp.ne.s32.totalorder %s484_s29, %s7957_s0  ;;  %p7966_p0 = scmp.lt.s32.totalorder %s7957_s0, %s7957_s0 }
  0xf2   : > { %p7960_p4 = pnand %p7958_p12, %p9653_p7  ;;  %p7967_p5 = por %p7966_p0, %p7965_p2 }
  0xf4   : > { %p7961_p6 = pneg %p7960_p4 }
  0xf6   : > { %p7968_p8 = pnand %p7967_p5, %p7961_p6 }
  0xf8   : > { %7971 = shalt.err (!%p7968_p8)
}
  0xf9   : > { %p9654_p13 = scmp.ne.s32.totalorder %s9642_s20, 0  ;;  %s9655_s2 = smov 64  }
  0xfa   : > { %s7300_s25 = smul.u32 3, %s8422_s21  ;;  %s7972_s13 = scalar_lea.hbm %s9586_s15, 64 }
  0xfb   : > { %7343 = dma.hbm_to_vmem [thread:$0]  (!%p9654_p13), %s9572_s1, 4096, %s484_s29, [#allocation4], %s9655_s2, %s9655_s2, %s9651_s11  }
  0xfc   : > { %p7973_p8 = scmp.ne.s32.totalorder %s9586_s15, %s7972_s13  ;;  %p7979_p3 = scmp.lt.u32.totalorder %s7972_s13, %s9586_s15 }
  0xfe   : > { %p7975_p11 = pnand %p7973_p8, %p9653_p7 }
 0x100   : > { %p7976_p1 = pneg %p7975_p11 }
 0x102   : > { %p7981_p10 = pnand %p7979_p3, %p7976_p1 }
 0x104   : > { %7984 = shalt.err (!%p7981_p10)
}
 0x105   : > { %s7985_s11 = scalar_lea.vmem %s511_s7, 64  ;;  %p7993_p2 = scmp.lt.s32.totalorder %s511_s7, %s511_s7 }
 0x106   : > { %p7986_p12 = scmp.ne.s32.totalorder %s511_s7, %s7985_s11  ;;  %p7994_p0 = scmp.lt.s32.totalorder %s7985_s11, %s7985_s11 }
 0x108   : > { %p7988_p4 = pnand %p7986_p12, %p9653_p7  ;;  %p7995_p5 = por %p7994_p0, %p7993_p2 }
 0x10a   : > { %p7989_p6 = pneg %p7988_p4 }
 0x10c   : > { %p7996_p9 = pnand %p7995_p5, %p7989_p6 }
 0x10e   : > { %7999 = shalt.err (!%p7996_p9)
}
 0x10f   : > { %7349 = dma.hbm_to_vmem [thread:$0]  (!%p9654_p13), %s9586_s15, 64, %s511_s7, [#allocation24]  }
 0x110   : > { %s7301_s4 = smul.u32 48, %s8242_s24  ;;  %s546_s14 = scalar_lea.vmem [#allocation7], %s7300_s25 }
 0x111   : > { %s554_s17 = sshll.u32 %s546_s14, 4  ;;  %p9656_p8 = scmp.ne.s32.totalorder %s9648_s19, 0  ;;  %s555_s17 = int_to_ptr.vmem [resolvable:$true] %s554_s17 }
 0x112   : > { %s552_s13 = scalar_lea.hbm %s9574_s3, %s7301_s4  ;;  %s8005_s18 = scalar_lea.hbm %s9574_s3, 192 }
 0x113   : > { %s8000_s16 = scalar_lea.hbm %s552_s13, 48  ;;  %p8006_p13 = scmp.lt.u32.totalorder %s552_s13, %s9574_s3 }
 0x114   : > { %p8001_p7 = scmp.ne.s32.totalorder %s552_s13, %s8000_s16  ;;  %p8007_p1 = scmp.lt.u32.totalorder %s8005_s18, %s8000_s16 }
 0x115   : > { %p8009_p10 = scmp.lt.u32.totalorder %s8000_s16, %s552_s13 }
 0x116   : > { %p8003_p9 = pnand %p8001_p7, %p9656_p8  ;;  %p8008_p3 = por %p8007_p1, %p8006_p13 }
 0x118   : > { %p8004_p11 = pneg %p8003_p9  ;;  %p8010_p12 = por %p8009_p10, %p8008_p3 }
 0x11a   : > { %p8011_p4 = pnand %p8010_p12, %p8004_p11 }
 0x11c   : > { %8014 = shalt.err (!%p8011_p4)
}
 0x11d   : > { %s8015_s7 = scalar_lea.vmem %s555_s17, 48  ;;  %s8260_s25 = smov [#allocation7]  }
 0x11e   : > { %p8016_p6 = scmp.ne.s32.totalorder %s555_s17, %s8015_s7  ;;  %s8020_s29 = sshll.u32 %s8260_s25, 4  ;;  %s8021_s29 = int_to_ptr.vmem [resolvable:$false] %s8020_s29 }
 0x11f   : > { %s8022_s2 = scalar_lea.vmem %s8021_s29, 96  ;;  %p8023_p5 = scmp.lt.s32.totalorder %s555_s17, %s8021_s29 }
 0x120   : > { %p8018_p2 = pnand %p8016_p6, %p9656_p8  ;;  %p8024_p7 = scmp.lt.s32.totalorder %s8022_s2, %s8015_s7 }
 0x122   : > { %p8019_p0 = pneg %p8018_p2  ;;  %p8025_p9 = por %p8024_p7, %p8023_p5 }
 0x124   : > { %p8026_p1 = pnand %p8025_p9, %p8019_p0 }
 0x126   : > { %8029 = shalt.err (!%p8026_p1)
}
 0x127   : > { %p9657_p13 = scmp.ne.s32.totalorder %s9643_s28, 0  ;;  %s9658_s4 = scalar_lea.sflag [#allocation6], %s8425_s27 }
 0x128   : > { %s8727_s22 = scalar_lea.hbm %s9576_s5, %s8506_s30  ;;  %s585_s16 = scalar_lea.vmem [#allocation10], %s8422_s21 }
 0x129   : > { %7356 = dma.hbm_to_vmem [thread:$0]  (!%p9657_p13), %s552_s13, 48, %s555_s17, %s9658_s4  }
 0x12a   : > { %s592_s20 = sshll.u32 %s585_s16, 4  ;;  %s8030_s9 = scalar_lea.hbm %s8727_s22, 16  ;;  %s593_s20 = int_to_ptr.vmem [resolvable:$true] %s592_s20 }
 0x12b   : > { %p8031_p11 = scmp.ne.s32.totalorder %s8727_s22, %s8030_s9  ;;  %s8035_s17 = scalar_lea.hbm %s9576_s5, 64 }
 0x12c   : > { %p8036_p12 = scmp.lt.u32.totalorder %s8727_s22, %s9576_s5  ;;  %p8037_p4 = scmp.lt.u32.totalorder %s8035_s17, %s8030_s9 }
 0x12d   : > { %p8033_p3 = pnand %p8031_p11, %p9656_p8  ;;  %p8039_p2 = scmp.lt.u32.totalorder %s8030_s9, %s8727_s22 }
 0x12e   : > { %p8038_p6 = por %p8037_p4, %p8036_p12 }
 0x12f   : > { %p8034_p10 = pneg %p8033_p3 }
 0x130   : > { %p8040_p0 = por %p8039_p2, %p8038_p6 }
 0x132   : > { %p8041_p5 = pnand %p8040_p0, %p8034_p10 }
 0x134   : > { %8044 = shalt.err (!%p8041_p5)
}
 0x135   : > { %s8045_s7 = scalar_lea.vmem %s593_s20, 16  ;;  %s8261_s25 = smov [#allocation10]  }
 0x136   : > { %p8046_p7 = scmp.ne.s32.totalorder %s593_s20, %s8045_s7  ;;  %s8050_s29 = sshll.u32 %s8261_s25, 4  ;;  %s8051_s29 = int_to_ptr.vmem [resolvable:$false] %s8050_s29 }
 0x137   : > { %s8052_s2 = scalar_lea.vmem %s8051_s29, 32  ;;  %p8053_p11 = scmp.lt.s32.totalorder %s593_s20, %s8051_s29 }
 0x138   : > { %p8048_p9 = pnand %p8046_p7, %p9656_p8  ;;  %p8054_p3 = scmp.lt.s32.totalorder %s8052_s2, %s8045_s7 }
 0x13a   : > { %p8049_p1 = pneg %p8048_p9  ;;  %p8055_p13 = por %p8054_p3, %p8053_p11 }
 0x13c   : > { %p8056_p4 = pnand %p8055_p13, %p8049_p1 }
 0x13e   : > { %8059 = shalt.err (!%p8056_p4)
}
 0x13f   : > { %p9659_p12 = scmp.ne.s32.totalorder %s9643_s28, 0  ;;  %s9660_s4 = scalar_lea.sflag [#allocation9], %s8425_s27 }
 0x140   : > { %s9661_s16 = sld [smem:[#allocation44_spill]]  ;;  %s619_s18 = scalar_lea.vmem [#allocation13], %s8422_s21 }
 0x141   : > { %7362 = dma.hbm_to_vmem [thread:$0]  (!%p9659_p12), %s8727_s22, 16, %s593_s20, %s9660_s4  }
 0x142   : > { %s626_s0 = sshll.u32 %s619_s18, 4  ;;  %s6474_s17 = sshll.u32 %s8422_s21, 4  ;;  %s627_s0 = int_to_ptr.vmem [resolvable:$true] %s626_s0 }
 0x146   : > { %s8753_s9 = scalar_lea.hbm %s9661_s16, %s8506_s30  ;;  %s8065_s20 = scalar_lea.hbm %s9661_s16, 64 }
 0x147   : > { %s8060_s13 = scalar_lea.hbm %s8753_s9, 16  ;;  %p8066_p2 = scmp.lt.u32.totalorder %s8753_s9, %s9661_s16 }
 0x148   : > { %p8061_p13 = scmp.ne.s32.totalorder %s8753_s9, %s8060_s13  ;;  %p8067_p0 = scmp.lt.u32.totalorder %s8065_s20, %s8060_s13 }
 0x149   : > { %p8069_p7 = scmp.lt.u32.totalorder %s8060_s13, %s8753_s9 }
 0x14a   : > { %p8063_p10 = pnand %p8061_p13, %p9656_p8  ;;  %p8068_p5 = por %p8067_p0, %p8066_p2 }
 0x14c   : > { %p8064_p6 = pneg %p8063_p10  ;;  %p8070_p9 = por %p8069_p7, %p8068_p5 }
 0x14e   : > { %p8071_p1 = pnand %p8070_p9, %p8064_p6 }
 0x150   : > { %8074 = shalt.err (!%p8071_p1)
}
 0x151   : > { %s8075_s29 = scalar_lea.vmem %s627_s0, 16  ;;  %s8262_s2 = smov [#allocation13]  }
 0x152   : > { %p8076_p11 = scmp.ne.s32.totalorder %s627_s0, %s8075_s29  ;;  %s8080_s4 = sshll.u32 %s8262_s2, 4  ;;  %s8081_s4 = int_to_ptr.vmem [resolvable:$false] %s8080_s4 }
 0x153   : > { %s8082_s14 = scalar_lea.vmem %s8081_s4, 32  ;;  %p8083_p13 = scmp.lt.s32.totalorder %s627_s0, %s8081_s4 }
 0x154   : > { %p8078_p3 = pnand %p8076_p11, %p9656_p8  ;;  %p8084_p10 = scmp.lt.s32.totalorder %s8082_s14, %s8075_s29 }
 0x156   : > { %p8079_p4 = pneg %p8078_p3  ;;  %p8085_p12 = por %p8084_p10, %p8083_p13 }
 0x158   : > { %p8086_p0 = pnand %p8085_p12, %p8079_p4 }
 0x15a   : > { %8089 = shalt.err (!%p8086_p0)
}
 0x15b   : > { %p9662_p2 = scmp.ne.s32.totalorder %s9643_s28, 0  ;;  %s9663_s23 = scalar_lea.sflag [#allocation12], %s8425_s27 }
 0x15c   : > { %s6891_s18 = sshll.u32 %s8242_s24, 8  ;;  %s9664_s22 = sld [smem:[#allocation45_spill]] }
 0x15d   : > { %7368 = dma.hbm_to_vmem [thread:$0]  (!%p9662_p2), %s8753_s9, 16, %s627_s0, %s9663_s23  }
 0x15e   : > { %s658_s25 = scalar_lea.vmem [#allocation16], %s6474_s17 }
 0x15f   : > { %s666_s29 = sshll.u32 %s658_s25, 4  ;;  %s667_s29 = int_to_ptr.vmem [resolvable:$true] %s666_s29 }
 0x162   : > { %s9665_s20 = smov %s9664_s22  ;;  %s8780_s7 = scalar_lea.hbm %s9664_s22, %s6891_s18 }
 0x163   : > { %s8090_s2 = scalar_lea.hbm %s8780_s7, 256  ;;  %s8095_s0 = scalar_lea.hbm %s9665_s20, 1024 }
 0x164   : > { %p8091_p12 = scmp.ne.s32.totalorder %s8780_s7, %s8090_s2  ;;  %p8096_p7 = scmp.lt.u32.totalorder %s8780_s7, %s9665_s20 }
 0x165   : > { %p8097_p9 = scmp.lt.u32.totalorder %s8095_s0, %s8090_s2  ;;  %p8099_p11 = scmp.lt.u32.totalorder %s8090_s2, %s8780_s7 }
 0x166   : > { %p8093_p6 = pnand %p8091_p12, %p9656_p8 }
 0x167   : > { %p8098_p1 = por %p8097_p9, %p8096_p7 }
 0x168   : > { %p8094_p5 = pneg %p8093_p6 }
 0x169   : > { %p8100_p3 = por %p8099_p11, %p8098_p1 }
 0x16b   : > { %p8101_p4 = pnand %p8100_p3, %p8094_p5 }
 0x16d   : > { %8104 = shalt.err (!%p8101_p4)
}
 0x16e   : > { %s8105_s17 = scalar_lea.vmem %s667_s29, 256  ;;  %s8263_s23 = smov [#allocation16]  }
 0x16f   : > { %p8106_p13 = scmp.ne.s32.totalorder %s667_s29, %s8105_s17  ;;  %s8110_s18 = sshll.u32 %s8263_s23, 4  ;;  %s8111_s18 = int_to_ptr.vmem [resolvable:$false] %s8110_s18 }
 0x170   : > { %s8112_s13 = scalar_lea.vmem %s8111_s18, 512  ;;  %p8113_p12 = scmp.lt.s32.totalorder %s667_s29, %s8111_s18 }
 0x171   : > { %p8108_p10 = pnand %p8106_p13, %p9656_p8  ;;  %p8114_p6 = scmp.lt.s32.totalorder %s8112_s13, %s8105_s17 }
 0x173   : > { %p8109_p0 = pneg %p8108_p10  ;;  %p8115_p2 = por %p8114_p6, %p8113_p12 }
 0x175   : > { %p8116_p7 = pnand %p8115_p2, %p8109_p0 }
 0x177   : > { %8119 = shalt.err (!%p8116_p7)
}
 0x178   : > { %p9666_p9 = scmp.ne.s32.totalorder %s9643_s28, 0  ;;  %s9667_s11 = scalar_lea.sflag [#allocation15], %s8425_s27 }
 0x179   : > { %s9668_s2 = sld [smem:[#allocation46_spill]]  ;;  %s697_s24 = scalar_lea.vmem [#allocation19], %s8422_s21 }
 0x17a   : > { %7374 = dma.hbm_to_vmem [thread:$0]  (!%p9666_p9), %s8780_s7, 256, %s667_s29, %s9667_s11  }
 0x17b   : > { %s704_s0 = sshll.u32 %s697_s24, 4  ;;  %s705_s0 = int_to_ptr.vmem [resolvable:$true] %s704_s0 }
 0x17f   : > { %s8807_s9 = scalar_lea.hbm %s9668_s2, %s8506_s30  ;;  %s8125_s7 = scalar_lea.hbm %s9668_s2, 64 }
 0x180   : > { %s8120_s4 = scalar_lea.hbm %s8807_s9, 16  ;;  %p8126_p11 = scmp.lt.u32.totalorder %s8807_s9, %s9668_s2 }
 0x181   : > { %p8121_p2 = scmp.ne.s32.totalorder %s8807_s9, %s8120_s4  ;;  %p8127_p3 = scmp.lt.u32.totalorder %s8125_s7, %s8120_s4 }
 0x182   : > { %p8129_p13 = scmp.lt.u32.totalorder %s8120_s4, %s8807_s9 }
 0x183   : > { %p8123_p5 = pnand %p8121_p2, %p9656_p8  ;;  %p8128_p4 = por %p8127_p3, %p8126_p11 }
 0x185   : > { %p8124_p1 = pneg %p8123_p5  ;;  %p8130_p10 = por %p8129_p13, %p8128_p4 }
 0x187   : > { %p8131_p0 = pnand %p8130_p10, %p8124_p1 }
 0x189   : > { %8134 = shalt.err (!%p8131_p0)
}
 0x18a   : > { %s8135_s18 = scalar_lea.vmem %s705_s0, 16  ;;  %s8264_s13 = smov [#allocation19]  }
 0x18b   : > { %p8136_p12 = scmp.ne.s32.totalorder %s705_s0, %s8135_s18  ;;  %s8140_s11 = sshll.u32 %s8264_s13, 4  ;;  %s8141_s11 = int_to_ptr.vmem [resolvable:$false] %s8140_s11 }
 0x18c   : > { %s8142_s22 = scalar_lea.vmem %s8141_s11, 32  ;;  %p8143_p2 = scmp.lt.s32.totalorder %s705_s0, %s8141_s11 }
 0x18d   : > { %p8138_p6 = pnand %p8136_p12, %p9656_p8  ;;  %p8144_p5 = scmp.lt.s32.totalorder %s8142_s22, %s8135_s18 }
 0x18f   : > { %p8139_p7 = pneg %p8138_p6  ;;  %p8145_p9 = por %p8144_p5, %p8143_p2 }
 0x191   : > { %p8146_p3 = pnand %p8145_p9, %p8139_p7 }
 0x193   : > { %8149 = shalt.err (!%p8146_p3)
}
 0x194   : > { %p9669_p11 = scmp.ne.s32.totalorder %s9643_s28, 0  ;;  %s9670_s25 = scalar_lea.sflag [#allocation18], %s8425_s27 }
 0x195   : > { %s9671_s14 = sld [smem:[#allocation47_spill]]  ;;  %s731_s7 = scalar_lea.vmem [#allocation22], %s8422_s21 }
 0x196   : > { %7380 = dma.hbm_to_vmem [thread:$0]  (!%p9669_p11), %s8807_s9, 16, %s705_s0, %s9670_s25  }
 0x197   : > { %s738_s29 = sshll.u32 %s731_s7, 4  ;;  %s739_s29 = int_to_ptr.vmem [resolvable:$true] %s738_s29 }
 0x19b   : > { %s8833_s17 = scalar_lea.hbm %s9671_s14, %s8506_s30  ;;  %s8155_s9 = scalar_lea.hbm %s9671_s14, 64 }
 0x19c   : > { %s8150_s23 = scalar_lea.hbm %s8833_s17, 16  ;;  %p8156_p13 = scmp.lt.u32.totalorder %s8833_s17, %s9671_s14 }
 0x19d   : > { %p8151_p9 = scmp.ne.s32.totalorder %s8833_s17, %s8150_s23  ;;  %p8157_p10 = scmp.lt.u32.totalorder %s8155_s9, %s8150_s23 }
 0x19e   : > { %p8159_p12 = scmp.lt.u32.totalorder %s8150_s23, %s8833_s17 }
 0x19f   : > { %p8153_p1 = pnand %p8151_p9, %p9656_p8  ;;  %p8158_p0 = por %p8157_p10, %p8156_p13 }
 0x1a1   : > { %p8154_p4 = pneg %p8153_p1  ;;  %p8160_p6 = por %p8159_p12, %p8158_p0 }
 0x1a3   : > { %p8161_p7 = pnand %p8160_p6, %p8154_p4 }
 0x1a5   : > { %8164 = shalt.err (!%p8161_p7)
}
 0x1a6   : > { %s8165_s21 = scalar_lea.vmem %s739_s29, 16  ;;  %s8265_s30 = smov [#allocation22]  }
 0x1a7   : > { %p8166_p2 = scmp.ne.s32.totalorder %s739_s29, %s8165_s21  ;;  %s8170_s22 = sshll.u32 %s8265_s30, 4  ;;  %s8171_s22 = int_to_ptr.vmem [resolvable:$false] %s8170_s22 }
 0x1a8   : > { %s8172_s25 = scalar_lea.vmem %s8171_s22, 32  ;;  %p8173_p9 = scmp.lt.s32.totalorder %s739_s29, %s8171_s22 }
 0x1a9   : > { %p8168_p5 = pnand %p8166_p2, %p9656_p8  ;;  %p8174_p1 = scmp.lt.s32.totalorder %s8172_s25, %s8165_s21 }
 0x1ab   : > { %p8169_p3 = pneg %p8168_p5  ;;  %p8175_p11 = por %p8174_p1, %p8173_p9 }
 0x1ad   : > { %p8176_p10 = pnand %p8175_p11, %p8169_p3 }
 0x1af   : > { %8179 = shalt.err (!%p8176_p10)
}
 0x1b0   : > { %p9672_p13 = scmp.ne.s32.totalorder %s9643_s28, 0  ;;  %s9673_s24 = sld [smem:[#allocation40_spill]] }
 0x1b2   : > { %7386 = dma.hbm_to_vmem [thread:$0]  (!%p9672_p13), %s8833_s17, 16, %s739_s29, %s712_s26  }
 0x1b6   : > { %p9674_p4 = scmp.ne.s32.totalorder %s9673_s24, 0 }
 0x1b7   : > { %s9675_s19 = sld [smem:[#allocation36_spill]] (!%p9674_p4) }
 0x1b8   : > { %747 = sbr.rel (%p9674_p4) target bundleno = 5054 (0x13be), region = 84 }
 0x1bd   : > { %p9676_p8 = scmp.eq.s32.totalorder (!%p9674_p4), %s9675_s19, 0 }
 0x1bf   : > { %8197 = dma.done.wait (%p9676_p8), [#allocation4], 4096   ;;  %p9677_p0 = pmov %p9676_p8 }
 0x1c0   : > { %s9678_s4 = sld [smem:[#allocation34_spill]]  ;;  %s9679_s7 = sld [smem:[#allocation39_spill]] }
 0x1c1   : > { %8199 = vsyncadd (%p9677_p0), [#allocation4], 4294963200  ;;  %s8862_s23 = sand.u32 1, %s9675_s19  }
 0x1c2   : > { %s754_s26 = scalar_lea.sflag [#allocation6], %s8862_s23 }
 0x1c6   : > { %s8865_s28 = sand.u32 1, %s9678_s4   ;;  %p9680_p11 = scmp.ne.s32.totalorder %s9679_s7, 0 }
 0x1c7   : > { %s7302_s27 = smul.u32 192, %s8865_s28 }
 0x1c9   : > { %s8869_s17 = scalar_lea.vmem [#allocation5], %s7302_s27 }
 0x1ca   : > { %8201 = dma.done.wait (%p9680_p11), %s754_s26, 3120  }
 0x1cb   : > { %8203 = vsyncadd (%p9680_p11), %s754_s26, 4294964176  ;;  %s7303_s29 = smul.u32 3, %s8865_s28  ;;  %s6485_s18 = sshll.u32 %s8865_s28, 6 }
 0x1cc   : > { %s772_s9 = scalar_lea.sflag [#allocation9], %s8862_s23  ;;  %s8880_s0 = scalar_lea.vmem [#allocation8], %s6485_s18 }
 0x1cd   : > { %s8877_s13 = scalar_lea.vmem [#allocation7], %s7303_s29 }
 0x1ce   : > { %8205 = dma.done.wait (%p9680_p11), %s772_s9, 1040  }
 0x1cf   : > { %8207 = vsyncadd (%p9680_p11), %s772_s9, 4294966256  ;;  %s783_s11 = scalar_lea.vmem [#allocation10], %s8865_s28  ;;  %s789_s21 = scalar_lea.sflag [#allocation12], %s8862_s23 }
 0x1d0   : > { %s791_s30 = scalar_lea.vmem [#allocation11], %s8865_s28 }
 0x1d1   : > { %8209 = dma.done.wait (%p9680_p11), %s789_s21, 32  }
 0x1d2   : > { %8211 = vsyncadd (%p9680_p11), %s789_s21, 4294967264  ;;  %s6486_s22 = sshll.u32 %s8865_s28, 10  ;;  %s799_s25 = scalar_lea.vmem [#allocation13], %s8865_s28 }
 0x1d3   : > { %s805_s24 = scalar_lea.sflag [#allocation15], %s8862_s23  ;;  %s8896_s4 = scalar_lea.vmem [#allocation14], %s6486_s22 }
 0x1d4   : > { %8213 = dma.done.wait (%p9680_p11), %s805_s24, 16640  }
 0x1d5   : > { %8215 = vsyncadd (%p9680_p11), %s805_s24, 4294950656  ;;  %s6487_s27 = sshll.u32 %s8865_s28, 4  ;;  %s823_s29 = scalar_lea.sflag [#allocation18], %s8862_s23 }
 0x1d6   : > { %s8903_s26 = scalar_lea.vmem [#allocation16], %s6487_s27  ;;  %s8906_s18 = scalar_lea.vmem [#allocation17], %s6486_s22 }
 0x1d7   : > { %8217 = dma.done.wait (%p9680_p11), %s823_s29, 16400  }
 0x1d8   : > { %8219 = vsyncadd (%p9680_p11), %s823_s29, 4294950896  ;;  %s840_s21 = scalar_lea.sflag [#allocation21], %s8862_s23 }
 0x1d9   : > { %8221 = dma.done.wait (%p9680_p11), %s840_s21, 32  }
 0x1da   : > { %8223 = vsyncadd (%p9680_p11), %s840_s21, 4294967264  ;;  %s850_s22 = scalar_lea.vmem [#allocation22], %s8865_s28  ;;  %p9681_p12 = pmov %p9677_p0 }
 0x1db   : > { %p9682_p6 = pmov %p9677_p0 }
 0x1dc   : > { %8225 = dma.done.wait (%p9681_p12), [#allocation24], 4160  }
 0x1dd   : > { %8227 = vsyncadd (%p9682_p6), [#allocation24], 4294963136  ;;  %p9683_p7 = scmp.ne.s32.totalorder %s9675_s19, 0 }
 0x1de   : > { %s9684_s23 = sld [smem:[#allocation41_spill]] (!%p9683_p7)  ;;  %v8266_v1 = vmov (!%p9683_p7), 0   ;;  %v7446_v3 = vld [vmem:[#allocation3 + $0x40] sm:$0xff] (!%p9683_p7)   ;;  %v7450_v7 = vld [vmem:[#allocation3 + $0x48] sm:$0xff] (!%p9683_p7)   ;;  %v7454_v11 = vld [vmem:[#allocation3 + $0x50] sm:$0xff] (!%p9683_p7)   ;;  %v958_v35 = vlaneseq (!%p9683_p7) }
 0x1df   : > { %955 = sbr.rel (%p9683_p7) target bundleno = 842 (0x34a), region = 148  ;;  %7445 = vset.pattern.permute.xlu0 (!%p9683_p7), %v8266_v1  ;;  %v7447_v4 = vld [vmem:[#allocation3 + $0xc0] sm:$0xff] (!%p9683_p7)   ;;  %6893 = vmatprep.subr.bf16.mxu0 (!%p9683_p7), %v7446_v3  ;;  %v7451_v8 = vld [vmem:[#allocation3 + $0xc8] sm:$0xff] (!%p9683_p7)   ;;  %v7455_v12 = vld [vmem:[#allocation3 + $0xd0] sm:$0xff] (!%p9683_p7)   ;;  %v8267_v42 = vmov (!%p9683_p7), 1.0|1.0  }
 0x1e0   : > { %v7448_v5 = vld [vmem:[#allocation3] sm:$0xff] (!%p9683_p7)   ;;  %6915 = vmatprep.subr.bf16.mxu1 (!%p9683_p7), %v7447_v4  ;;  %v7452_v9 = vld [vmem:[#allocation3 + $0x8] sm:$0xff] (!%p9683_p7)   ;;  %v7456_v13 = vld [vmem:[#allocation3 + $0x10] sm:$0xff] (!%p9683_p7)   ;;  %v959_v36 = vand.u32 (!%p9683_p7), 127, %v958_v35 }
 0x1e1   : > { %v7449_v6 = vld [vmem:[#allocation3 + $0x80] sm:$0xff] (!%p9683_p7)   ;;  %6894 = vmatpush3.bf16.msra.mxu0 (!%p9683_p7), %v7448_v5  ;;  %v7453_v10 = vld [vmem:[#allocation3 + $0x88] sm:$0xff] (!%p9683_p7)   ;;  %v7457_v14 = vld [vmem:[#allocation3 + $0x90] sm:$0xff] (!%p9683_p7)  }
 0x1e2   : > { %6916 = vmatpush3.bf16.msra.mxu1 (!%p9683_p7), %v7449_v6  ;;  %6895 = vmatprep.subr.bf16.mxu0 (!%p9683_p7), %v7450_v7  ;;  %v7458_v15 = vld [vmem:[#allocation3 + $0x58] sm:$0xff] (!%p9683_p7)   ;;  %v7462_v19 = vld [vmem:[#allocation3 + $0x60] sm:$0xff] (!%p9683_p7)   ;;  %v7466_v23 = vld [vmem:[#allocation3 + $0x68] sm:$0xff] (!%p9683_p7)   ;;  %v960_v38 = vadd.s32 (!%p9683_p7), 128, %v959_v36  ;;  %v962_v39 = vadd.s32 (!%p9683_p7), 384, %v959_v36  ;;  %v961_v40 = vadd.s32 (!%p9683_p7), 256, %v959_v36 }
 0x1e3   : > { %6917 = vmatprep.subr.bf16.mxu1 (!%p9683_p7), %v7451_v8  ;;  %v7459_v16 = vld [vmem:[#allocation3 + $0xd8] sm:$0xff] (!%p9683_p7)   ;;  %v7463_v20 = vld [vmem:[#allocation3 + $0xe0] sm:$0xff] (!%p9683_p7)   ;;  %v7467_v24 = vld [vmem:[#allocation3 + $0xe8] sm:$0xff] (!%p9683_p7)  }
 0x1e4   : > { %s9685_s9 = smov (!%p9683_p7), %s9684_s23  ;;  %v956_v0 = vld [vmem:[%s9684_s23] sm:$0xff] (!%p9683_p7)  ;;  %v7460_v17 = vld [vmem:[#allocation3 + $0x18] sm:$0xff] (!%p9683_p7)   ;;  %v7464_v21 = vld [vmem:[#allocation3 + $0x20] sm:$0xff] (!%p9683_p7)  }
 0x1e5   : > { %v957_v2 = vld [vmem:[%s9685_s9 + $0x8] sm:$0xff] (!%p9683_p7)  ;;  %964 = vperm.xlu0 (!%p9683_p7), %7445, %v956_v0   ;;  %6896 = vmatpush3.bf16.msra.mxu0 (!%p9683_p7), %v7452_v9  ;;  %v7465_v22 = vld [vmem:[#allocation3 + $0xa0] sm:$0xff] (!%p9683_p7)   ;;  %v7468_v25 = vld [vmem:[#allocation3 + $0x28] sm:$0xff] (!%p9683_p7)  }
 0x1e6   : > { %6918 = vmatpush3.bf16.msra.mxu1 %v7453_v10  ;;  %6897 = vmatprep.subr.bf16.mxu0 %v7454_v11  ;;  %v7461_v18 = vld [vmem:[#allocation3 + $0x98] sm:$0xff]   ;;  %v7469_v26 = vld [vmem:[#allocation3 + $0xa8] sm:$0xff]   ;;  %v7470_v27 = vld [vmem:[#allocation3 + $0x70] sm:$0xff]  }
 0x1e7   : > { %6919 = vmatprep.subr.bf16.mxu1 %v7455_v12  ;;  %v7471_v28 = vld [vmem:[#allocation3 + $0xf0] sm:$0xff]   ;;  %v7474_v31 = vld [vmem:[#allocation3 + $0x78] sm:$0xff]  }
 0x1e8   : > { %v7472_v29 = vld [vmem:[#allocation3 + $0x30] sm:$0xff]   ;;  %v7475_v32 = vld [vmem:[#allocation3 + $0xf8] sm:$0xff]  }
 0x1e9   : > { %967 = vperm.xlu0 %7445, %v957_v2   ;;  %6898 = vmatpush3.bf16.msra.mxu0 %v7456_v13  ;;  %v7473_v30 = vld [vmem:[#allocation3 + $0xb0] sm:$0xff]   ;;  %v7476_v33 = vld [vmem:[#allocation3 + $0x38] sm:$0xff]  }
 0x1ea   : > { %6920 = vmatpush3.bf16.msra.mxu1 %v7457_v14  ;;  %6899 = vmatprep.subr.bf16.mxu0 %v7458_v15  ;;  %v7477_v34 = vld [vmem:[#allocation3 + $0xb8] sm:$0xff]  }
 0x1eb   : > { %6921 = vmatprep.subr.bf16.mxu1 %v7459_v16 }
 0x1ed   : > { %6900 = vmatpush3.bf16.msra.mxu0 %v7460_v17 }
 0x1ee   : > { %6922 = vmatpush3.bf16.msra.mxu1 %v7461_v18  ;;  %6901 = vmatprep.subr.bf16.mxu0 %v7462_v19 }
 0x1ef   : > { %6923 = vmatprep.subr.bf16.mxu1 %v7463_v20 }
 0x1f1   : > { %6902 = vmatpush3.bf16.msra.mxu0 %v7464_v21 }
 0x1f2   : > { %6924 = vmatpush3.bf16.msra.mxu1 %v7465_v22  ;;  %6903 = vmatprep.subr.bf16.mxu0 %v7466_v23 }
 0x1f3   : > { %6925 = vmatprep.subr.bf16.mxu1 %v7467_v24 }
 0x1f5   : > { %6904 = vmatpush3.bf16.msra.mxu0 %v7468_v25 }
 0x1f6   : > { %6926 = vmatpush3.bf16.msra.mxu1 %v7469_v26  ;;  %6905 = vmatprep.subr.bf16.mxu0 %v7470_v27 }
 0x1f7   : > { %6927 = vmatprep.subr.bf16.mxu1 %v7471_v28 }
 0x1f9   : > { %6906 = vmatpush3.bf16.msra.mxu0 %v7472_v29 }
 0x1fa   : > { %6928 = vmatpush3.bf16.msra.mxu1 %v7473_v30  ;;  %6907 = vmatprep.subr.bf16.mxu0 %v7474_v31 }
 0x1fb   : > { %6929 = vmatprep.subr.bf16.mxu1 %v7475_v32 }
 0x1fd   : > { %6908 = vmatpush3.bf16.msra.mxu0 %v7476_v33 }
 0x1fe   : > { %6930 = vmatpush3.bf16.msra.mxu1 %v7477_v34 }
 0x264   : > { %v965_v37 = vpop.permute.xlu0 %964 }
 0x265   : > { %vm970_vm1 = vcmp.eq.s32.totalorder %v960_v38, %v965_v37  ;;  %vm972_vm6 = vcmp.eq.s32.totalorder %v962_v39, %v965_v37  ;;  %vm969_vm8 = vcmp.eq.s32.totalorder %v959_v36, %v965_v37  ;;  %vm971_vm10 = vcmp.eq.s32.totalorder %v961_v40, %v965_v37 }
 0x268   : > { %v968_v41 = vpop.permute.xlu0 %967 }
 0x269   : > { %vm973_vm0 = vcmp.eq.s32.totalorder %v959_v36, %v968_v41  ;;  %vm974_vm2 = vcmp.eq.s32.totalorder %v960_v38, %v968_v41  ;;  %vm976_vm3 = vcmp.eq.s32.totalorder %v962_v39, %v968_v41  ;;  %vm975_vm4 = vcmp.eq.s32.totalorder %v961_v40, %v968_v41 }
 0x26a   : > { %vm6524_vm5 = vmpackc.low %vm974_vm2, %vm970_vm1 }
 0x26b   : > { %6525 = vmatprep.mubr.msk.bf16.mxu0 %vm6524_vm5, %v8267_v42  ;;  %vm6528_vm7 = vmpackc.low %vm976_vm3, %vm972_vm6 }
 0x26c   : > { %6529 = vmatprep.mubr.msk.bf16.mxu1 %vm6528_vm7, %v8267_v42  ;;  %vm6526_vm9 = vmpackc.low %vm973_vm0, %vm969_vm8 }
 0x26d   : > { %6527 = vmatmul.mubr.msk.bf16.vlgmr.msra.gmra.mrb[0].mxu0 %vm6526_vm9, %v8267_v42  ;;  %vm6530_vm11 = vmpackc.low %vm975_vm4, %vm971_vm10 }
 0x26e   : > { %6531 = vmatmul.mubr.msk.bf16.vlgmr.msra.gmra.mrb[0].mxu1 %vm6530_vm11, %v8267_v42 }
 0x340   : > { %v6909_v43 = vpop.f32.mrb[0].mxu0 }
 0x341   : > { %v6931_v44 = vpop.f32.mrb[0].mxu1  ;;  %v6910_v45 = vpop.f32.mrb[1].mxu0 }
 0x342   : > { %v6911_v46 = vadd.f32 %v6910_v45, %v6909_v43  ;;  %v6932_v47 = vpop.f32.mrb[1].mxu1  ;;  %v6912_v48 = vpop.f32.mrb[2].mxu0 }
 0x343   : > { %v6933_v49 = vadd.f32 %v6932_v47, %v6931_v44  ;;  %v6934_v50 = vpop.f32.mrb[2].mxu1  ;;  %v6913_v51 = vpop.f32.mrb[3].mxu0 }
 0x344   : > { %v6914_v52 = vadd.f32 %v6913_v51, %v6912_v48  ;;  %v6935_v53 = vpop.f32.mrb[3].mxu1 }
 0x345   : > { %v1321_v54 = vadd.f32 %v6933_v49, %v6911_v46  ;;  %v6936_v55 = vadd.f32 %v6935_v53, %v6934_v50 }
 0x347   : > { %1327 = vst [vmem:[#allocation2] sm:$0xff] %v1321_v54  ;;  %v1324_v56 = vadd.f32 %v6936_v55, %v6914_v52 }
 0x349   : > { %1328 = vst [vmem:[#allocation2 + $0x8] sm:$0xff] %v1324_v56 }
 0x34a PF: > { %v7478_v57 = vld [vmem:[%s8869_s17 + $0x4] ss:$12 sps:$4 sm:$0xff]   ;;  %v7480_v58 = vld [vmem:[%s8869_s17] ss:$12 sps:$4 sm:$0xff]   ;;  %v8268_v59 = vmov 0   ;;  %v8269_v60 = vmov 0.0   ;;  %v1366_v22 = vlaneseq }
 0x34b   : > { %1541 = vmatprep.mubr.bf16.mxu0 %v8268_v59  ;;  %7166 = vmatprep.subr.bf16.mxu1 %v8269_v60  ;;  %v7481_v61 = vld [vmem:[%s8869_s17 + $0x1c] ss:$12 sps:$4 sm:$0xff]   ;;  %vm8270_vm12 = vmmov 0   ;;  %v7483_v62 = vld [vmem:[%s8869_s17 + $0x18] ss:$12 sps:$4 sm:$0xff]   ;;  %vm1595_vm13 = vcmask 261120  }
 0x34c   : > { %1509 = vmatprep.subr.bf16.mxu0 %v7478_v57  ;;  %7182 = vmatprep.mubr.msk.bf16.mxu1 %vm8270_vm12, %v8269_v60  ;;  %v7484_v63 = vld [vmem:[%s8869_s17 + $0x34] ss:$12 sps:$4 sm:$0xff]   ;;  %v7486_v0 = vld [vmem:[%s8869_s17 + $0x30] ss:$12 sps:$4 sm:$0xff]   ;;  %v7487_v1 = vld [vmem:[%s8869_s17 + $0x4c] ss:$12 sps:$4 sm:$0xff]  }
 0x34d   : > { %1510 = vmatpush1.bf16.msra.mxu0 %v7480_v58  ;;  %v7489_v2 = vld [vmem:[%s8869_s17 + $0x48] ss:$12 sps:$4 sm:$0xff]   ;;  %v7490_v3 = vld [vmem:[%s8869_s17 + $0x64] ss:$12 sps:$4 sm:$0xff]   ;;  %v7503_v5 = vld [vmem:[%s8869_s17 + $0x20] ss:$12 sps:$4 sm:$0xff]  }
 0x34e   : > { %1511 = vmatprep.subr.bf16.mxu0 %v7481_v61  ;;  %v7502_v4 = vld [vmem:[%s8869_s17 + $0x8] ss:$12 sps:$4 sm:$0xff]   ;;  %v7492_v6 = vld [vmem:[%s8869_s17 + $0x60] ss:$12 sps:$4 sm:$0xff]   ;;  %v7504_v8 = vld [vmem:[%s8869_s17 + $0x38] ss:$12 sps:$4 sm:$0xff]  }
 0x34f   : > { %7167 = vmatpush3.bf16.msra.mxu1 %v7502_v4  ;;  %v7493_v7 = vld [vmem:[%s8869_s17 + $0x7c] ss:$12 sps:$4 sm:$0xff]   ;;  %v7495_v9 = vld [vmem:[%s8869_s17 + $0x78] ss:$12 sps:$4 sm:$0xff]   ;;  %v7496_v10 = vld [vmem:[%s8869_s17 + $0x94] ss:$12 sps:$4 sm:$0xff]  }
 0x350   : > { %7168 = vmatprep.subr.bf16.mxu1 %v8269_v60  ;;  %v7505_v11 = vld [vmem:[%s8869_s17 + $0x50] ss:$12 sps:$4 sm:$0xff]   ;;  %v7499_v13 = vld [vmem:[%s8869_s17 + $0xac] ss:$12 sps:$4 sm:$0xff]   ;;  %v7506_v14 = vld [vmem:[%s8869_s17 + $0x68] ss:$12 sps:$4 sm:$0xff]  }
 0x351   : > { %1512 = vmatpush1.bf16.msra.mxu0 %v7483_v62  ;;  %v7498_v12 = vld [vmem:[%s8869_s17 + $0x90] ss:$12 sps:$4 sm:$0xff]   ;;  %v7501_v15 = vld [vmem:[%s8869_s17 + $0xa8] ss:$12 sps:$4 sm:$0xff]   ;;  %v7507_v18 = vld [vmem:[%s8869_s17 + $0x80] ss:$12 sps:$4 sm:$0xff]  }
 0x352   : > { %1513 = vmatprep.subr.bf16.mxu0 %v7484_v63  ;;  %v1329_v16 = vld [vmem:[#allocation2] sm:$0xff]  ;;  %v1330_v17 = vld [vmem:[#allocation2 + $0x8] sm:$0xff]  ;;  %v8973_v23 = vshrl.u32 %v1366_v22, 7  ;;  %v1364_v25 = vld [vmem:[%s8877_s13] sm:$0x7]  ;;  %s8271_s19 = smov 96  }
 0x353   : > { %7169 = vmatpush3.bf16.msra.mxu1 %v7503_v5  ;;  %v1331_v19 = vpack.c.bf16 %v1330_v17, %v1329_v16  ;;  %v7508_v20 = vld [vmem:[%s8869_s17 + $0x98] ss:$12 sps:$4 sm:$0xff]   ;;  %v7509_v21 = vld [vmem:[%s8869_s17 + $0xb0] ss:$12 sps:$4 sm:$0xff]   ;;  %vm1748_vm14 = vcmask 64512   ;;  %s8272_s17 = smov 64  }
 0x354   : > { %7170 = vmatprep.subr.bf16.mxu1 %v8269_v60  ;;  %v8976_v24 = vsub.s32 0, %v8973_v23  ;;  %v8980_v26 = vsub.s32 1, %v8973_v23  ;;  %v8991_v37 = vsub.s32 2, %v8973_v23  ;;  %s8273_s13 = smov 32  }
 0x355   : > { %1514 = vmatpush1.bf16.msra.mxu0 %v7486_v0 }
 0x356   : > { %1515 = vmatprep.subr.bf16.mxu0 %v7487_v1  ;;  %v1369_v27 = vrot.slane %v1364_v25, %v8976_v24  ;;  %v1373_v28 = vrot.slane %v1364_v25, %v8980_v26  ;;  %v1377_v40 = vrot.slane %v1364_v25, %v8991_v37 }
 0x357   : > { %7171 = vmatpush3.bf16.msra.mxu1 %v7504_v8 }
 0x358   : > { %7172 = vmatprep.subr.bf16.mxu1 %v8269_v60 }
 0x359   : > { %1516 = vmatpush1.bf16.msra.mxu0 %v7489_v2 }
 0x35a   : > { %1517 = vmatprep.subr.bf16.mxu0 %v7490_v3 }
 0x35b   : > { %7173 = vmatpush3.bf16.msra.mxu1 %v7505_v11 }
 0x35c   : > { %7174 = vmatprep.subr.bf16.mxu1 %v8269_v60 }
 0x35d   : > { %1518 = vmatpush1.bf16.msra.mxu0 %v7492_v6 }
 0x35e   : > { %1519 = vmatprep.subr.bf16.mxu0 %v7493_v7 }
 0x35f   : > { %7175 = vmatpush3.bf16.msra.mxu1 %v7506_v14 }
 0x360   : > { %7176 = vmatprep.subr.bf16.mxu1 %v8269_v60 }
 0x361   : > { %1520 = vmatpush1.bf16.msra.mxu0 %v7495_v9 }
 0x362   : > { %1521 = vmatprep.subr.bf16.mxu0 %v7496_v10 }
 0x363   : > { %7177 = vmatpush3.bf16.msra.mxu1 %v7507_v18 }
 0x364   : > { %7178 = vmatprep.subr.bf16.mxu1 %v8269_v60 }
 0x365   : > { %1522 = vmatpush1.bf16.msra.mxu0 %v7498_v12 }
 0x366   : > { %1523 = vmatprep.subr.bf16.mxu0 %v7499_v13 }
 0x367   : > { %7179 = vmatpush3.bf16.msra.mxu1 %v7508_v20 }
 0x368   : > { %7180 = vmatprep.subr.bf16.mxu1 %v8269_v60 }
 0x369   : > { %1524 = vmatpush1.bf16.msra.mxu0 %v7501_v15 }
 0x36a   : > { %7186 = vmatprep.subr.mxu0 %v8269_v60 }
 0x36b   : > { %7181 = vmatpush3.bf16.msra.mxu1 %v7509_v21 }
 0x36c   : > { %1542 = vmatmul.mubr.bf16.vlgmr.msra.gmra.mrb[0].mxu0 %v1331_v19  ;;  %7191 = vmatprep.subr.mxu1 %v8269_v60 }
 0x36d   : > { %7188 = vmatprep.mubr.msk.f32.mxu0 %vm8270_vm12, %v8269_v60 }
 0x36e   : > { %7183 = vmatmul.mubr.bf16.vlgmr.msra.gmra.mrb[0].mxu1 %v1331_v19 }
 0x36f   : > { %7193 = vmatprep.mubr.msk.f32.mxu1 %vm8270_vm12, %v8269_v60 }
 0x43f   : > { %v1543_v29 = vpop.f32.mrb[0].mxu0 }
 0x440   : > { %v1544_v30 = vadd.f32 %v1543_v29, %v1369_v27  ;;  %v1545_v31 = vpop.f32.mrb[1].mxu0 }
 0x441   : > { %v8984_v32 = vadd.f32 %v1545_v31, %v1373_v28  ;;  %v1547_v33 = vpop.f32.mrb[2].mxu0  ;;  %v1586_v41 = vpop.f32.mrb[0].mxu1 }
 0x442   : > { %v1548_v34 = vadd.f32 %v1547_v33, %v1369_v27  ;;  %v1549_v35 = vpop.f32.mrb[3].mxu0  ;;  %v8993_v38 = vmul.f32 0.17677669, %v1544_v30  ;;  %v9014_v42 = vadd.f32 %v1586_v41, %v1377_v40  ;;  %v7184_v43 = vpop.f32.mrb[1].mxu1 }
 0x443   : > { %v8986_v36 = vadd.f32 %v1549_v35, %v1373_v28  ;;  %7187 = vmatpush3.xpose.msk.msra.mxu0 %vm1595_vm13, %v8984_v32  ;;  %v1589_v44 = vpop.f32.mrb[2].mxu1 }
 0x444   : > { %7196 = vmatprep.subr.mxu0 %v8269_v60  ;;  %v9000_v39 = vmul.f32 0.17677669, %v1548_v34  ;;  %v9016_v45 = vadd.f32 %v1589_v44, %v1377_v40  ;;  %v7185_v46 = vpop.f32.mrb[3].mxu1 }
 0x445   : > { %2002 = vrot.lane.b32.xlu1 %v8986_v36, %s8271_s19  ;;  %7192 = vmatpush3.xpose.msk.msra.mxu1 %vm1595_vm13, %v8986_v36 }
 0x446   : > { %7189 = vmatmul.mubr.msk.f32.vlgmr.msra.gmra.mrb[4].mxu0 %vm1595_vm13, %v8993_v38  ;;  %7201 = vmatprep.subr.mxu1 %v8269_v60 }
 0x447   : > { %7198 = vmatprep.mubr.msk.f32.mxu0 %vm8270_vm12, %v8269_v60  ;;  %7197 = vmatpush3.msra.mxu0 %v9014_v42 }
 0x448   : > { %7194 = vmatmul.mubr.msk.f32.vlgmr.msra.gmra.mrb[4].mxu1 %vm1595_vm13, %v9000_v39  ;;  %7206 = vmatprep.subr.mxu0 %v8269_v60 }
 0x449   : > { %1922 = vrot.lane.b32.xlu1 %v8993_v38, %s8271_s19  ;;  %7203 = vmatprep.mubr.msk.f32.mxu1 %vm8270_vm12, %v8269_v60 }
 0x44a   : > { %7202 = vmatpush3.msra.mxu1 %v9016_v45 }
 0x44b   : > { %7211 = vmatprep.subr.mxu1 %v8269_v60 }
 0x4b7   : > { %v2003_v1 = vpop.permute.xlu1 %2002 }
 0x4bb   : > { %v1923_v2 = vpop.permute.xlu1 %1922 }
 0x519   : > { %v1668_v47 = vpop.f32.mrb[4].mxu0 }
 0x51a   : > { %v7190_v48 = vpop.f32.mrb[5].mxu0  ;;  %v1749_v49 = vsel %vm1748_vm14, %v1668_v47, -inf }
 0x51b   : > { %v1744_v50 = vpop.f32.mrb[4].mxu1  ;;  %1750 = vmax.xlane.f32.xlu0 %v1749_v49 }
 0x51c   : > { %v7195_v51 = vpop.f32.mrb[5].mxu1  ;;  %v1752_v52 = vsel %vm1748_vm14, %v1744_v50, -inf }
 0x51d   : > { %v7513_v51 = vld [vmem:[%s8880_s0 + $0x18] sm:$0xff]  }
 0x51f   : > { %1753 = vmax.xlane.f32.xlu0 %v1752_v52  ;;  %v7511_v52 = vld [vmem:[%s8880_s0 + $0x8] sm:$0xff]  }
 0x535   : > { %1924 = vrot.lane.b32.xlu0 %v8984_v32, %s8271_s19 }
 0x5a8   : > { %v1751_v53 = vpop.xlane.xlu0 %1750 }
 0x5a9   : > { %v1755_v54 = vsub.f32 %v1668_v47, %v1751_v53  ;;  %v7512_v47 = vld [vmem:[%s8880_s0 + $0x10] sm:$0xff]  }
 0x5ab   : > { %v1757_v55 = vmul.f32 1.442695, %v1755_v54 }
 0x5ac   : > { %v1754_v56 = vpop.xlane.xlu0 %1753 }
 0x5ad   : > { %7646 = vpow2.f32 %v1757_v55  ;;  %v1756_v57 = vsub.f32 %v1744_v50, %v1754_v56  ;;  %v7510_v50 = vld [vmem:[%s8880_s0] sm:$0xff]  }
 0x5af   : > { %v1759_v58 = vmul.f32 1.442695, %v1756_v57 }
 0x5b0   : > { %v1925_v7 = vpop.permute.xlu0 %1924 }
 0x5b1   : > { %7648 = vpow2.f32 %v1759_v58 }
 0x5b7   : > { %v7647_v61 = vpop.eup %7646 }
 0x5b8   : > { %v1761_v62 = vsel %vm1748_vm14, %v7647_v61, 0.0 }
 0x5b9   : > { %1762 = vadd.xlane.f32.xlu1 %v1761_v62 }
 0x5bb   : > { %v7649_v63 = vpop.eup %7648 }
 0x5bc   : > { %v1764_v0 = vsel %vm1748_vm14, %v7649_v63, 0.0 }
 0x5bd   : > { %1765 = vadd.xlane.f32.xlu1 %v1764_v0 }
 0x5ce   : > { %2000 = vrot.lane.b32.xlu1 %v9000_v39, %s8271_s19 }
 0x646   : > { %v1763_v3 = vpop.xlane.xlu1 %1762 }
 0x647   : > { %7650 = vrcp.f32 %v1763_v3 }
 0x64a   : > { %v1766_v4 = vpop.xlane.xlu1 %1765 }
 0x64b   : > { %7652 = vrcp.f32 %v1766_v4 }
 0x64e   : > { %v2001_v10 = vpop.permute.xlu1 %2000 }
 0x651   : > { %v7651_v5 = vpop.eup %7650 }
 0x652   : > { %v1769_v6 = vmul.f32 %v7651_v5, %v7647_v61 }
 0x654   : > { %7199 = vmatmul.mubr.msk.f32.vlgmr.msra.gmra.mrb[6].mxu0 %vm1748_vm14, %v1769_v6 }
 0x655   : > { %v7653_v8 = vpop.eup %7652  ;;  %7207 = vmatpush3.xpose.msk.msra.mxu0 %vm1595_vm13, %v1925_v7  ;;  %7208 = vmatprep.mubr.msk.f32.mxu0 %vm8270_vm12, %v8269_v60 }
 0x656   : > { %v1770_v9 = vmul.f32 %v7653_v8, %v7649_v63  ;;  %7216 = vmatprep.subr.mxu0 %v8269_v60 }
 0x658   : > { %7204 = vmatmul.mubr.msk.f32.vlgmr.msra.gmra.mrb[6].mxu1 %vm1748_vm14, %v1770_v9  ;;  %7209 = vmatmul.mubr.msk.f32.vlgmr.msra.gmra.mrb[8].mxu0 %vm1595_vm13, %v1923_v2 }
 0x659   : > { %7212 = vmatpush3.xpose.msk.msra.mxu1 %vm1595_vm13, %v2003_v1  ;;  %7213 = vmatprep.mubr.msk.f32.mxu1 %vm8270_vm12, %v8269_v60 }
 0x65a   : > { %7221 = vmatprep.subr.mxu1 %v8269_v60  ;;  %7218 = vmatprep.mubr.msk.f32.mxu0 %vm8270_vm12, %v8269_v60 }
 0x65c   : > { %7214 = vmatmul.mubr.msk.f32.vlgmr.msra.gmra.mrb[8].mxu1 %vm1595_vm13, %v2001_v10 }
 0x65d   : > { %7223 = vmatprep.mubr.msk.f32.mxu1 %vm8270_vm12, %v8269_v60 }
 0x727   : > { %v9046_v11 = vpop.f32.mrb[6].mxu0 }
 0x728   : > { %v7200_v12 = vpop.f32.mrb[7].mxu0 }
 0x72b   : > { %v9048_v13 = vpop.f32.mrb[6].mxu1  ;;  %v1996_v14 = vpop.f32.mrb[8].mxu0 }
 0x72c   : > { %v1917_v15 = vpack.c.bf16 %v9048_v13, %v9046_v11  ;;  %v7205_v16 = vpop.f32.mrb[7].mxu1  ;;  %v7210_v17 = vpop.f32.mrb[9].mxu0  ;;  %v2078_v18 = vsel %vm1748_vm14, %v1996_v14, -inf }
 0x72d   : > { %2079 = vmax.xlane.f32.xlu0 %v2078_v18 }
 0x72f   : > { %v2074_v19 = vpop.f32.mrb[8].mxu1 }
 0x730   : > { %v7215_v20 = vpop.f32.mrb[9].mxu1  ;;  %v2081_v21 = vsel %vm1748_vm14, %v2074_v19, -inf }
 0x731   : > { %2082 = vmax.xlane.f32.xlu1 %v2081_v21 }
 0x742   : > { %2178 = vrot.lane.b32.xlu1 %v9016_v45, %s8271_s19 }
 0x746   : > { %2451 = vrot.lane.b32.xlu1 %v8986_v36, %s8272_s17 }
 0x74a   : > { %2449 = vrot.lane.b32.xlu1 %v9000_v39, %s8272_s17 }
 0x74e   : > { %2371 = vrot.lane.b32.xlu1 %v8993_v38, %s8272_s17 }
 0x752   : > { %2766 = vrot.lane.b32.xlu1 %v8984_v32, %s8273_s13 }
 0x7ba   : > { %v2080_v22 = vpop.xlane.xlu0 %2079 }
 0x7bb   : > { %v2084_v25 = vsub.f32 %v1996_v14, %v2080_v22 }
 0x7bd   : > { %v2086_v27 = vmul.f32 1.442695, %v2084_v25 }
 0x7be   : > { %v2083_v28 = vpop.xlane.xlu1 %2082 }
 0x7bf   : > { %7654 = vpow2.f32 %v2086_v27  ;;  %v2085_v29 = vsub.f32 %v2074_v19, %v2083_v28 }
 0x7c1   : > { %v2088_v30 = vmul.f32 1.442695, %v2085_v29 }
 0x7c2   : > { %v2179_v31 = vpop.permute.xlu1 %2178 }
 0x7c3   : > { %7656 = vpow2.f32 %v2088_v30  ;;  %7222 = vmatpush3.msra.mxu1 %v2179_v31 }
 0x7c4   : > { %7234 = vmatprep.subr.bf16.mxu1 %v8269_v60 }
 0x7c6   : > { %v2452_v53 = vpop.permute.xlu1 %2451 }
 0x7c9   : > { %v7655_v33 = vpop.eup %7654 }
 0x7ca   : > { %v2090_v34 = vsel %vm1748_vm14, %v7655_v33, 0.0  ;;  %v2450_v54 = vpop.permute.xlu1 %2449 }
 0x7cb   : > { %2091 = vadd.xlane.f32.xlu0 %v2090_v34 }
 0x7cd   : > { %v7657_v35 = vpop.eup %7656 }
 0x7ce   : > { %v2093_v40 = vsel %vm1748_vm14, %v7657_v35, 0.0  ;;  %v2372_v1 = vpop.permute.xlu1 %2371 }
 0x7cf   : > { %2094 = vadd.xlane.f32.xlu0 %v2093_v40 }
 0x7d2   : > { %v2767_v20 = vpop.permute.xlu1 %2766 }
 0x7e5   : > { %2101 = vrot.lane.b32.xlu0 %v9014_v42, %s8271_s19 }
 0x7e9   : > { %2373 = vrot.lane.b32.xlu0 %v8984_v32, %s8272_s17 }
 0x858   : > { %v2092_v41 = vpop.xlane.xlu0 %2091 }
 0x859   : > { %7658 = vrcp.f32 %v2092_v41 }
 0x85c   : > { %v2095_v43 = vpop.xlane.xlu0 %2094 }
 0x85d   : > { %7660 = vrcp.f32 %v2095_v43 }
 0x860   : > { %v2102_v44 = vpop.permute.xlu0 %2101 }
 0x861   : > { %7217 = vmatpush3.msra.mxu0 %v2102_v44 }
 0x862   : > { %7226 = vmatprep.subr.bf16.mxu0 %v8269_v60 }
 0x863   : > { %v7659_v46 = vpop.eup %7658 }
 0x864   : > { %v2098_v48 = vmul.f32 %v7659_v46, %v7655_v33  ;;  %v2374_v62 = vpop.permute.xlu0 %2373 }
 0x866   : > { %7219 = vmatmul.mubr.msk.f32.vlgmr.msra.gmra.mrb[10].mxu0 %vm1748_vm14, %v2098_v48 }
 0x867   : > { %v7661_v49 = vpop.eup %7660  ;;  %7227 = vmatpush3.bf16.msra.mxu0 %v7512_v47  ;;  %7230 = vmatprep.mubr.msk.bf16.mxu0 %vm8270_vm12, %v8269_v60 }
 0x868   : > { %v2099_v32 = vmul.f32 %v7661_v49, %v7657_v35  ;;  %7228 = vmatprep.subr.bf16.mxu0 %v8269_v60 }
 0x86a   : > { %7224 = vmatmul.mubr.msk.f32.vlgmr.msra.gmra.mrb[10].mxu1 %vm1748_vm14, %v2099_v32 }
 0x86b   : > { %7235 = vmatpush3.bf16.msra.mxu1 %v7510_v50  ;;  %7238 = vmatprep.mubr.msk.bf16.mxu1 %vm8270_vm12, %v8269_v60 }
 0x86c   : > { %7236 = vmatprep.subr.bf16.mxu1 %v8269_v60  ;;  %7229 = vmatpush3.bf16.msra.mxu0 %v7513_v51  ;;  %v7514_v51 = vld [vmem:[%s8880_s0 + $0x20] sm:$0xff]  }
 0x86d   : > { %7242 = vmatprep.subr.mxu0 %v8269_v60 }
 0x86f   : > { %7237 = vmatpush3.bf16.msra.mxu1 %v7511_v52  ;;  %v7515_v52 = vld [vmem:[%s8880_s0 + $0x28] sm:$0xff]  }
 0x870   : > { %7247 = vmatprep.subr.mxu1 %v8269_v60 }
 0x872   : > { %7239 = vmatmul.mubr.msk.bf16.vlgmr.msra.gmra.mrb[12].mxu1 %vm1595_vm13, %v1917_v15 }
 0x873   : > { %7249 = vmatprep.mubr.msk.f32.mxu1 %vm8270_vm12, %v8269_v60 }
 0x878   : > { %7248 = vmatpush3.xpose.msk.msra.mxu1 %vm1595_vm13, %v2452_v53 }
 0x879   : > { %7257 = vmatprep.subr.mxu1 %v8269_v60 }
 0x87b   : > { %7250 = vmatmul.mubr.msk.f32.vlgmr.msra.gmra.mrb[16].mxu1 %vm1595_vm13, %v2450_v54 }
 0x87c   : > { %7259 = vmatprep.mubr.msk.f32.mxu1 %vm8270_vm12, %v8269_v60 }
 0x939   : > { %v2173_v55 = vpop.f32.mrb[10].mxu0 }
 0x93a   : > { %v7220_v56 = vpop.f32.mrb[11].mxu0 }
 0x93d   : > { %v2250_v57 = vpop.f32.mrb[10].mxu1 }
 0x93e   : > { %v2254_v58 = vpack.c.bf16 %v2250_v57, %v2173_v55  ;;  %v7225_v61 = vpop.f32.mrb[11].mxu1 }
 0x940   : > { %7231 = vmatmul.mubr.msk.bf16.vlgmr.msra.gmra.mrb[12].mxu0 %vm1595_vm13, %v2254_v58 }
 0x941   : > { %7243 = vmatpush3.xpose.msk.msra.mxu0 %vm1595_vm13, %v2374_v62  ;;  %7244 = vmatprep.mubr.msk.f32.mxu0 %vm8270_vm12, %v8269_v60 }
 0x942   : > { %7252 = vmatprep.subr.mxu0 %v8269_v60 }
 0x945   : > { %v2364_v63 = vpop.f32.mrb[12].mxu1 }
 0x946   : > { %v7240_v0 = vpop.f32.mrb[13].mxu1 }
 0x947   : > { %v2367_v2 = vpop.f32.mrb[14].mxu1 }
 0x948   : > { %v7241_v3 = vpop.f32.mrb[15].mxu1  ;;  %7245 = vmatmul.mubr.msk.f32.vlgmr.msra.gmra.mrb[16].mxu0 %vm1595_vm13, %v2372_v1 }
 0x949   : > { %7254 = vmatprep.mubr.msk.f32.mxu0 %vm8270_vm12, %v8269_v60 }
 0x94e   : > { %v2523_v4 = vpop.f32.mrb[16].mxu1 }
 0x94f   : > { %v7251_v5 = vpop.f32.mrb[17].mxu1  ;;  %v2530_v6 = vsel %vm1748_vm14, %v2523_v4, -inf }
 0x950   : > { %2531 = vmax.xlane.f32.xlu0 %v2530_v6 }
 0x966   : > { %2625 = vrot.lane.b32.xlu0 %v9016_v45, %s8272_s17 }
 0x96a   : > { %2764 = vrot.lane.b32.xlu0 %v8993_v38, %s8273_s13 }
 0x96e   : > { %2842 = vrot.lane.b32.xlu0 %v9000_v39, %s8273_s13 }
 0x9dd   : > { %v2532_v7 = vpop.xlane.xlu0 %2531 }
 0x9de   : > { %v2534_v8 = vsub.f32 %v2523_v4, %v2532_v7 }
 0x9e0   : > { %v2537_v9 = vmul.f32 1.442695, %v2534_v8 }
 0x9e1   : > { %v2626_v10 = vpop.permute.xlu0 %2625 }
 0x9e2   : > { %7662 = vpow2.f32 %v2537_v9  ;;  %7258 = vmatpush3.msra.mxu1 %v2626_v10 }
 0x9e3   : > { %7270 = vmatprep.subr.mxu1 %v8269_v60 }
 0x9ec   : > { %v7663_v11 = vpop.eup %7662 }
 0x9ed   : > { %v2542_v12 = vsel %vm1748_vm14, %v7663_v11, 0.0 }
 0x9ee   : > { %2543 = vadd.xlane.f32.xlu1 %v2542_v12  ;;  %v7517_v12 = vld [vmem:[%s8880_s0 + $0x38] sm:$0xff]  }
 0x9ff   : > { %2844 = vrot.lane.b32.xlu1 %v8986_v36, %s8273_s13  ;;  %v2765_v36 = vpop.permute.xlu0 %2764 }
 0xa03   : > { %v2843_v28 = vpop.permute.xlu0 %2842 }
 0xa13   : > { %v2308_v13 = vpop.f32.mrb[12].mxu0 }
 0xa14   : > { %v9113_v38 = vadd.f32 %v2364_v63, %v2308_v13  ;;  %v7232_v14 = vpop.f32.mrb[13].mxu0 }
 0xa15   : > { %v2311_v39 = vpop.f32.mrb[14].mxu0 }
 0xa16   : > { %v9115_v15 = vadd.f32 %v2367_v2, %v2311_v39  ;;  %v7233_v16 = vpop.f32.mrb[15].mxu0 }
 0xa1b   : > { %v2445_v17 = vpop.f32.mrb[16].mxu0 }
 0xa1c   : > { %v7246_v18 = vpop.f32.mrb[17].mxu0  ;;  %v2527_v19 = vsel %vm1748_vm14, %v2445_v17, -inf }
 0xa23   : > { %2528 = vmax.xlane.f32.xlu1 %v2527_v19 }
 0xa7b   : > { %v2544_v21 = vpop.xlane.xlu1 %2543 }
 0xa7c   : > { %7664 = vrcp.f32 %v2544_v21 }
 0xa7f   : > { %v2845_v27 = vpop.permute.xlu1 %2844 }
 0xa86   : > { %v7665_v22 = vpop.eup %7664 }
 0xa87   : > { %v2548_v25 = vmul.f32 %v7665_v22, %v7663_v11  ;;  %v7516_v11 = vld [vmem:[%s8880_s0 + $0x30] sm:$0xff]   ;;  %s9686_s0 = scalar_lea.vmem [#allocation19], %s8865_s28 }
 0xa89   : > { %7260 = vmatmul.mubr.msk.f32.vlgmr.msra.gmra.mrb[18].mxu1 %vm1748_vm14, %v2548_v25 }
 0xa8a   : > { %7271 = vmatpush3.xpose.msk.msra.mxu1 %vm1595_vm13, %v2767_v20  ;;  %7272 = vmatprep.mubr.msk.f32.mxu1 %vm8270_vm12, %v8269_v60 }
 0xa8b   : > { %7275 = vmatprep.subr.mxu1 %v8269_v60 }
 0xa8d   : > { %7273 = vmatmul.mubr.msk.f32.vlgmr.msra.gmra.mrb[20].mxu1 %vm1595_vm13, %v2765_v36  ;;  %v6592_v36 = vld [vmem:[%s783_s11] ss:$0 sm:$0xff]  ;;  %s9687_s11 = scalar_lea.vmem [#allocation20], %s8865_s28 }
 0xa8e   : > { %7276 = vmatpush3.xpose.msk.msra.mxu1 %vm1595_vm13, %v2845_v27  ;;  %7277 = vmatprep.mubr.msk.f32.mxu1 %vm8270_vm12, %v8269_v60 }
 0xa8f   : > { %7280 = vmatprep.subr.mxu1 %v8269_v60 }
 0xa91   : > { %7278 = vmatmul.mubr.msk.f32.vlgmr.msra.gmra.mrb[22].mxu1 %vm1595_vm13, %v2843_v28 }
 0xa92   : > { %7282 = vmatprep.mubr.msk.f32.mxu1 %vm8270_vm12, %v8269_v60 }
 0xab0   : > { %v2529_v29 = vpop.xlane.xlu1 %2528 }
 0xab1   : > { %v2533_v30 = vsub.f32 %v2445_v17, %v2529_v29 }
 0xab3   : > { %v2535_v31 = vmul.f32 1.442695, %v2533_v30 }
 0xab5   : > { %7666 = vpow2.f32 %v2535_v31 }
 0xabf   : > { %v7667_v33 = vpop.eup %7666 }
 0xac0   : > { %v2539_v34 = vsel %vm1748_vm14, %v7667_v33, 0.0 }
 0xac1   : > { %2540 = vadd.xlane.f32.xlu0 %v2539_v34 }
 0xad7   : > { %2549 = vrot.lane.b32.xlu0 %v9014_v42, %s8272_s17 }
 0xadb   : > { %3018 = vrot.lane.b32.xlu0 %v9016_v45, %s8273_s13 }
 0xb4e   : > { %v2541_v35 = vpop.xlane.xlu0 %2540 }
 0xb4f   : > { %7668 = vrcp.f32 %v2541_v35  ;;  %v7687_v35 = vld [vmem:[#allocation2 + $0x8] sm:$0xff] }
 0xb52   : > { %v2550_v40 = vpop.permute.xlu0 %2549 }
 0xb53   : > { %7253 = vmatpush3.msra.mxu0 %v2550_v40 }
 0xb54   : > { %7262 = vmatprep.subr.bf16.mxu0 %v8269_v60 }
 0xb56   : > { %v3019_v4 = vpop.permute.xlu0 %3018 }
 0xb59   : > { %v7669_v41 = vpop.eup %7668 }
 0xb5a   : > { %v2547_v43 = vmul.f32 %v7669_v41, %v7667_v33  ;;  %v7686_v33 = vld [vmem:[#allocation2] sm:$0xff] }
 0xb5b   : > { %v3210_v41 = vld [vmem:[%s8896_s4] sm:$0xff] }
 0xb5c   : > { %7255 = vmatmul.mubr.msk.f32.vlgmr.msra.gmra.mrb[18].mxu0 %vm1748_vm14, %v2547_v43  ;;  %v2697_v44 = vpop.f32.mrb[18].mxu1  ;;  %v3218_v43 = vld [vmem:[%s8896_s4 + $0x40] sm:$0xff] }
 0xb5d   : > { %v7261_v46 = vpop.f32.mrb[19].mxu1  ;;  %7266 = vmatprep.mubr.msk.bf16.mxu0 %vm8270_vm12, %v8269_v60  ;;  %7263 = vmatpush3.bf16.msra.mxu0 %v7514_v51 }
 0xb5e   : > { %7264 = vmatprep.subr.bf16.mxu0 %v8269_v60  ;;  %v6595_v46 = vcombine.low %v3210_v41, %v3218_v43 }
 0xb60   : > { %v2838_v47 = vpop.f32.mrb[20].mxu1 }
 0xb61   : > { %v7274_v48 = vpop.f32.mrb[21].mxu1  ;;  %v2920_v45 = vsel %vm1748_vm14, %v2838_v47, -inf  ;;  %7265 = vmatpush3.bf16.msra.mxu0 %v7515_v52  ;;  %v3227_v52 = vld [vmem:[%s8896_s4 + $0x88] sm:$0xff] }
 0xb62   : > { %2921 = vmax.xlane.f32.xlu1 %v2920_v45  ;;  %7285 = vmatprep.subr.mxu0 %v8269_v60  ;;  %v3219_v48 = vld [vmem:[%s8896_s4 + $0x48] sm:$0xff]  ;;  %v3226_v45 = vld [vmem:[%s8896_s4 + $0x80] sm:$0xff] }
 0xb64   : > { %v2916_v49 = vpop.f32.mrb[22].mxu1 }
 0xb65   : > { %v7279_v50 = vpop.f32.mrb[23].mxu1  ;;  %v2923_v32 = vsel %vm1748_vm14, %v2916_v49, -inf }
 0xb66   : > { %2924 = vmax.xlane.f32.xlu1 %v2923_v32 }
 0xbef   : > { %v2922_v53 = vpop.xlane.xlu1 %2921 }
 0xbf0   : > { %v2926_v54 = vsub.f32 %v2838_v47, %v2922_v53  ;;  %v6596_v47 = vcombine.high %v3210_v41, %v3218_v43  ;;  %v3235_v53 = vld [vmem:[%s8896_s4 + $0xc8] sm:$0xff] }
 0xbf1   : > { %v3315_v43 = vld [vmem:[%s8896_s4 + $0x348] sm:$0xff] }
 0xbf2   : > { %v2928_v55 = vmul.f32 1.442695, %v2926_v54  ;;  %v6614_v54 = vcombine.high %v3227_v52, %v3235_v53 }
 0xbf3   : > { %v2925_v56 = vpop.xlane.xlu1 %2924 }
 0xbf4   : > { %7670 = vpow2.f32 %v2928_v55  ;;  %v2927_v57 = vsub.f32 %v2916_v49, %v2925_v56  ;;  %v3234_v49 = vld [vmem:[%s8896_s4 + $0xc0] sm:$0xff]  ;;  %v6613_v56 = vcombine.low %v3227_v52, %v3235_v53 }
 0xbf5   : > { %v6612_v51 = vcombine.high %v3226_v45, %v3234_v49  ;;  %v6611_v55 = vcombine.low %v3226_v45, %v3234_v49  ;;  %v3330_v45 = vld [vmem:[%s8896_s4 + $0x3c0] sm:$0xff]  ;;  %v3323_v49 = vld [vmem:[%s8896_s4 + $0x388] sm:$0xff] }
 0xbf6   : > { %v2930_v58 = vmul.f32 1.442695, %v2927_v57 }
 0xbf8   : > { %7672 = vpow2.f32 %v2930_v58 }
 0xbfe   : > { %v7671_v61 = vpop.eup %7670 }
 0xbff   : > { %v2932_v62 = vsel %vm1748_vm14, %v7671_v61, 0.0 }
 0xc00   : > { %2933 = vadd.xlane.f32.xlu1 %v2932_v62 }
 0xc02   : > { %v7673_v63 = vpop.eup %7672 }
 0xc03   : > { %v2935_v0 = vsel %vm1748_vm14, %v7673_v63, 0.0 }
 0xc04   : > { %2936 = vadd.xlane.f32.xlu1 %v2935_v0 }
 0xc15   : > { %2942 = vrot.lane.b32.xlu1 %v9014_v42, %s8273_s13 }
 0xc2f   : > { %v2621_v1 = vpop.f32.mrb[18].mxu0 }
 0xc30   : > { %v2701_v2 = vpack.c.bf16 %v2697_v44, %v2621_v1  ;;  %v7256_v3 = vpop.f32.mrb[19].mxu0  ;;  %v3211_v44 = vld [vmem:[%s8896_s4 + $0x8] sm:$0xff] }
 0xc31   : > { %v6597_v50 = vcombine.low %v3211_v44, %v3219_v48  ;;  %v6598_v32 = vcombine.high %v3211_v44, %v3219_v48  ;;  %v3242_v3 = vld [vmem:[%s8896_s4 + $0x100] sm:$0xff] }
 0xc32   : > { %7267 = vmatmul.mubr.msk.bf16.vlgmr.msra.gmra.mrb[20].mxu0 %vm1595_vm13, %v2701_v2  ;;  %v3322_v48 = vld [vmem:[%s8896_s4 + $0x380] sm:$0xff] }
 0xc33   : > { %7286 = vmatpush3.msra.mxu0 %v3019_v4  ;;  %7287 = vmatprep.mubr.msk.f32.mxu0 %vm8270_vm12, %v8269_v60  ;;  %v3250_v4 = vld [vmem:[%s8896_s4 + $0x140] sm:$0xff] }
 0xc34   : > { %4062 = vmatprep.subr.bf16.mxu0 %v6596_v47 }
 0xc8d   : > { %v2934_v5 = vpop.xlane.xlu1 %2933 }
 0xc8e   : > { %7674 = vrcp.f32 %v2934_v5  ;;  %v3243_v5 = vld [vmem:[%s8896_s4 + $0x108] sm:$0xff] }
 0xc91   : > { %v2937_v6 = vpop.xlane.xlu1 %2936 }
 0xc92   : > { %7676 = vrcp.f32 %v2937_v6  ;;  %v6628_v6 = vcombine.high %v3242_v3, %v3250_v4 }
 0xc95   : > { %v2943_v7 = vpop.permute.xlu1 %2942 }
 0xc96   : > { %7281 = vmatpush3.msra.mxu1 %v2943_v7  ;;  %v3251_v7 = vld [vmem:[%s8896_s4 + $0x148] sm:$0xff] }
 0xc97   : > { %7290 = vmatprep.subr.bf16.mxu1 %v8269_v60 }
 0xc98   : > { %v7675_v42 = vpop.eup %7674 }
 0xc99   : > { %v2940_v8 = vmul.f32 %v7675_v42, %v7671_v61  ;;  %v6627_v42 = vcombine.low %v3242_v3, %v3250_v4 }
 0xc9b   : > { %7283 = vmatmul.mubr.msk.f32.vlgmr.msra.gmra.mrb[24].mxu1 %vm1748_vm14, %v2940_v8  ;;  %v6629_v8 = vcombine.low %v3243_v5, %v3251_v7 }
 0xc9c   : > { %v7677_v9 = vpop.eup %7676  ;;  %7294 = vmatprep.mubr.msk.bf16.mxu1 %vm8270_vm12, %v8269_v60  ;;  %7291 = vmatpush3.bf16.msra.mxu1 %v7516_v11  ;;  %v3266_v11 = vld [vmem:[%s8896_s4 + $0x1c0] sm:$0xff] }
 0xc9d   : > { %v2941_v10 = vmul.f32 %v7677_v9, %v7673_v63  ;;  %7292 = vmatprep.subr.bf16.mxu1 %v8269_v60  ;;  %v6630_v9 = vcombine.high %v3243_v5, %v3251_v7 }
 0xc9f   : > { %7288 = vmatmul.mubr.msk.f32.vlgmr.msra.gmra.mrb[24].mxu0 %vm1748_vm14, %v2941_v10  ;;  %v3258_v10 = vld [vmem:[%s8896_s4 + $0x180] sm:$0xff] }
 0xca0   : > { %4094 = vmatprep.mubr.bf16.mxu0 %v8268_v59  ;;  %7293 = vmatpush3.bf16.msra.mxu1 %v7517_v12  ;;  %v3259_v12 = vld [vmem:[%s8896_s4 + $0x188] sm:$0xff] }
 0xca1   : > { %4105 = vmatprep.subr.bf16.mxu1 %v6598_v32  ;;  %4063 = vmatpush1.bf16.msra.mxu0 %v6595_v46  ;;  %v3331_v32 = vld [vmem:[%s8896_s4 + $0x3c8] sm:$0xff] }
 0xca2   : > { %4064 = vmatprep.subr.bf16.mxu0 %v6612_v51  ;;  %v6707_v51 = vcombine.low %v3322_v48, %v3330_v45  ;;  %v6709_v52 = vcombine.low %v3323_v49, %v3331_v32  ;;  %v6710_v53 = vcombine.high %v3323_v49, %v3331_v32  ;;  %v3292_v32 = vld [vmem:[%s8896_s4 + $0x290] sm:$0xff] }
 0xca5   : > { %4065 = vmatpush1.bf16.msra.mxu0 %v6611_v55  ;;  %v3220_v55 = vld [vmem:[%s8896_s4 + $0x50] sm:$0xff] }
 0xca6   : > { %4066 = vmatprep.subr.bf16.mxu0 %v6628_v6 }
 0xca9   : > { %4067 = vmatpush1.bf16.msra.mxu0 %v6627_v42 }
 0xd05   : > { %v2755_v13 = vpop.f32.mrb[20].mxu0 }
 0xd06   : > { %v2762_v14 = vadd.f32 %v2755_v13, %v9113_v38  ;;  %v7268_v39 = vpop.f32.mrb[21].mxu0  ;;  %v6644_v13 = vcombine.high %v3258_v10, %v3266_v11 }
 0xd07   : > { %v2758_v16 = vpop.f32.mrb[22].mxu0  ;;  %v6643_v39 = vcombine.low %v3258_v10, %v3266_v11 }
 0xd08   : > { %v2763_v17 = vadd.f32 %v2758_v16, %v9115_v15  ;;  %v7269_v18 = vpop.f32.mrb[23].mxu0  ;;  %4068 = vmatprep.subr.bf16.mxu0 %v6644_v13  ;;  %v6594_v13 = vld [vmem:[%s799_s25] ss:$0 sm:$0xff] }
 0xd09   : > { %4069 = vmatpush1.bf16.msra.mxu0 %v6643_v39  ;;  %v3274_v18 = vld [vmem:[%s8896_s4 + $0x200] sm:$0xff]  ;;  %v3228_v39 = vld [vmem:[%s8896_s4 + $0x90] sm:$0xff] }
 0xd6e   : > { %v3014_v19 = vpop.f32.mrb[24].mxu1 }
 0xd6f   : > { %v7284_v20 = vpop.f32.mrb[25].mxu1 }
 0xd70   : > { %v3275_v20 = vld [vmem:[%s8896_s4 + $0x208] sm:$0xff] }
 0xd72   : > { %v3090_v21 = vpop.f32.mrb[24].mxu0 }
 0xd73   : > { %v3094_v22 = vpack.c.bf16 %v3090_v21, %v3014_v19  ;;  %v7289_v25 = vpop.f32.mrb[25].mxu0  ;;  %v3282_v19 = vld [vmem:[%s8896_s4 + $0x240] sm:$0xff] }
 0xd74   : > { %v6660_v21 = vcombine.high %v3274_v18, %v3282_v19  ;;  %v6659_v25 = vcombine.low %v3274_v18, %v3282_v19  ;;  %v3237_v18 = vld [vmem:[%s8896_s4 + $0xd8] sm:$0xff] }
 0xd75   : > { %7295 = vmatmul.mubr.msk.bf16.vlgmr.msra.gmra.mrb[28].mxu1 %vm1595_vm13, %v3094_v22  ;;  %v3283_v22 = vld [vmem:[%s8896_s4 + $0x248] sm:$0xff] }
 0xd76   : > { %4137 = vmatprep.mubr.bf16.mxu1 %v8268_v59  ;;  %4106 = vmatpush1.bf16.msra.mxu1 %v6597_v50  ;;  %v6708_v50 = vcombine.high %v3322_v48, %v3330_v45 }
 0xd77   : > { %4107 = vmatprep.subr.bf16.mxu1 %v6614_v54  ;;  %4070 = vmatprep.subr.bf16.mxu0 %v6660_v21  ;;  %v3212_v54 = vld [vmem:[%s8896_s4 + $0x10] sm:$0xff] }
 0xd78   : > { %4071 = vmatpush1.bf16.msra.mxu0 %v6659_v25  ;;  %v3252_v25 = vld [vmem:[%s8896_s4 + $0x150] sm:$0xff] }
 0xd7a   : > { %4108 = vmatpush1.bf16.msra.mxu1 %v6613_v56  ;;  %v3213_v56 = vld [vmem:[%s8896_s4 + $0x18] sm:$0xff] }
 0xd7b   : > { %4109 = vmatprep.subr.bf16.mxu1 %v6630_v9  ;;  %v6593_v9 = vld [vmem:[%s791_s30] ss:$0 sm:$0xff]  ;;  %s9688_s30 = sld [smem:[#allocation36_spill]] }
 0xd7e   : > { %4110 = vmatpush1.bf16.msra.mxu1 %v6629_v8 }
 0xd81   : > { %p6854_p2 = scmp.ne.s32.totalorder %s9688_s30, 3 }
 0xe48   : > { %v3148_v60 = vpop.f32.mrb[28].mxu1 }
 0xe49   : > { %v3155_v38 = vadd.f32 %v3148_v60, %v2762_v14  ;;  %v7296_v27 = vpop.f32.mrb[29].mxu1  ;;  %v3267_v14 = vld [vmem:[%s8896_s4 + $0x1c8] sm:$0xff]  ;;  %v6661_v60 = vcombine.low %v3275_v20, %v3283_v22 }
 0xe4a   : > { %v3151_v28 = vpop.f32.mrb[30].mxu1  ;;  %v6645_v16 = vcombine.low %v3259_v12, %v3267_v14  ;;  %v3298_v27 = vld [vmem:[%s8896_s4 + $0x2c0] sm:$0xff] }
 0xe4b   : > { %v3164_v15 = vadd.f32 %v6592_v36, %v3155_v38  ;;  %v3156_v29 = vadd.f32 %v3151_v28, %v2763_v17  ;;  %v7297_v30 = vpop.f32.mrb[31].mxu1  ;;  %v6646_v17 = vcombine.high %v3259_v12, %v3267_v14  ;;  %v3290_v38 = vld [vmem:[%s8896_s4 + $0x280] sm:$0xff]  ;;  %v3291_v28 = vld [vmem:[%s8896_s4 + $0x288] sm:$0xff] }
 0xe4c   : > { %v6675_v30 = vcombine.low %v3290_v38, %v3298_v27 }
 0xe4d   : > { %v3165_v31 = vadd.f32 %v6592_v36, %v3156_v29  ;;  %v3166_v34 = vadd.f32 %v7686_v33, %v3164_v15  ;;  %4111 = vmatprep.subr.bf16.mxu1 %v6646_v17  ;;  %v6662_v36 = vcombine.high %v3275_v20, %v3283_v22  ;;  %v6676_v15 = vcombine.high %v3290_v38, %v3298_v27  ;;  %v3299_v29 = vld [vmem:[%s8896_s4 + $0x2c8] sm:$0xff]  ;;  %v3229_v17 = vld [vmem:[%s8896_s4 + $0x98] sm:$0xff] }
 0xe4e   : > { %4112 = vmatpush1.bf16.msra.mxu1 %v6645_v16  ;;  %v6678_v33 = vcombine.high %v3291_v28, %v3299_v29  ;;  %v3236_v16 = vld [vmem:[%s8896_s4 + $0xd0] sm:$0xff]  ;;  %v6618_v22 = vcombine.high %v3229_v17, %v3237_v18  ;;  %v6617_v27 = vcombine.low %v3229_v17, %v3237_v18 }
 0xe4f   : > { %3170 = vadd.xlane.f32.xlu0 %v3166_v34  ;;  %v3167_v40 = vadd.f32 %v7687_v35, %v3165_v31  ;;  %4113 = vmatprep.subr.bf16.mxu1 %v6662_v36  ;;  %v6677_v31 = vcombine.low %v3291_v28, %v3299_v29  ;;  %v3314_v35 = vld [vmem:[%s8896_s4 + $0x340] sm:$0xff]  ;;  %v6616_v21 = vcombine.high %v3228_v39, %v3236_v16  ;;  %v3253_v36 = vld [vmem:[%s8896_s4 + $0x158] sm:$0xff]  ;;  %v3260_v29 = vld [vmem:[%s8896_s4 + $0x190] sm:$0xff] }
 0xe50   : > { %4072 = vmatprep.subr.bf16.mxu0 %v6676_v15  ;;  %v6615_v38 = vcombine.low %v3228_v39, %v3236_v16  ;;  %v3215_v39 = vld [vmem:[%s8896_s4 + $0x28] sm:$0xff] }
 0xe51   : > { %3172 = vadd.xlane.f32.xlu1 %v3167_v40  ;;  %4073 = vmatpush1.bf16.msra.mxu0 %v6675_v30  ;;  %v3268_v30 = vld [vmem:[%s8896_s4 + $0x1d0] sm:$0xff]  ;;  %v3223_v16 = vld [vmem:[%s8896_s4 + $0x68] sm:$0xff] }
 0xe52   : > { %4114 = vmatpush1.bf16.msra.mxu1 %v6661_v60  ;;  %v3245_v60 = vld [vmem:[%s8896_s4 + $0x118] sm:$0xff]  ;;  %v6647_v48 = vcombine.low %v3260_v29, %v3268_v30 }
 0xe53   : > { %4115 = vmatprep.subr.bf16.mxu1 %v6678_v33  ;;  %v6634_v15 = vcombine.high %v3245_v60, %v3253_v36  ;;  %v3269_v33 = vld [vmem:[%s8896_s4 + $0x1d8] sm:$0xff] }
 0xe56   : > { %4116 = vmatpush1.bf16.msra.mxu1 %v6677_v31  ;;  %v3261_v31 = vld [vmem:[%s8896_s4 + $0x198] sm:$0xff] }
 0xe57   : > { %v6649_v45 = vcombine.low %v3261_v31, %v3269_v33 }
 0xedc   : > { %v3171_v57 = vpop.xlane.xlu0 %3170 }
 0xedd   : > { %v3175_v58 = vmul.f32 0.0078125, %v3171_v57  ;;  %v6599_v57 = vcombine.low %v3212_v54, %v3220_v55 }
 0xede   : > { %v3173_v61 = vpop.xlane.xlu1 %3172 }
 0xedf   : > { %v9176_v62 = vsub.f32 %v3166_v34, %v3175_v58  ;;  %v3176_v63 = vmul.f32 0.0078125, %v3173_v61  ;;  %v3306_v34 = vld [vmem:[%s8896_s4 + $0x300] sm:$0xff]  ;;  %v6600_v58 = vcombine.high %v3212_v54, %v3220_v55  ;;  %v3221_v61 = vld [vmem:[%s8896_s4 + $0x58] sm:$0xff] }
 0xee0   : > { %v6692_v41 = vcombine.high %v3306_v34, %v3314_v35  ;;  %v6691_v44 = vcombine.low %v3306_v34, %v3314_v35  ;;  %v6633_v35 = vcombine.low %v3245_v60, %v3253_v36  ;;  %v3231_v60 = vld [vmem:[%s8896_s4 + $0xa8] sm:$0xff] }
 0xee1   : > { %v9178_v0 = vsub.f32 %v3167_v40, %v3176_v63  ;;  %v3179_v1 = vmul.f32 %v9176_v62, %v9176_v62  ;;  %v3307_v40 = vld [vmem:[%s8896_s4 + $0x308] sm:$0xff]  ;;  %v6601_v63 = vcombine.low %v3213_v56, %v3221_v61 }
 0xee2   : > { %v6693_v46 = vcombine.low %v3307_v40, %v3315_v43  ;;  %v6694_v47 = vcombine.high %v3307_v40, %v3315_v43  ;;  %4074 = vmatprep.subr.bf16.mxu0 %v6692_v41  ;;  %v6648_v40 = vcombine.high %v3260_v29, %v3268_v30  ;;  %v6650_v41 = vcombine.high %v3261_v31, %v3269_v33  ;;  %v3276_v43 = vld [vmem:[%s8896_s4 + $0x210] sm:$0xff]  ;;  %v3239_v36 = vld [vmem:[%s8896_s4 + $0xe8] sm:$0xff]  ;;  %v3246_v29 = vld [vmem:[%s8896_s4 + $0x120] sm:$0xff] }
 0xee3   : > { %3181 = vadd.xlane.f32.xlu0 %v3179_v1  ;;  %v3180_v2 = vmul.f32 %v9178_v0, %v9178_v0  ;;  %4075 = vmatpush1.bf16.msra.mxu0 %v6691_v44  ;;  %v6602_v1 = vcombine.high %v3213_v56, %v3221_v61  ;;  %v3284_v44 = vld [vmem:[%s8896_s4 + $0x250] sm:$0xff]  ;;  %v3254_v30 = vld [vmem:[%s8896_s4 + $0x160] sm:$0xff]  ;;  %v3247_v31 = vld [vmem:[%s8896_s4 + $0x128] sm:$0xff] }
 0xee4   : > { %4117 = vmatprep.subr.bf16.mxu1 %v6694_v47  ;;  %4076 = vmatprep.subr.bf16.mxu0 %v6708_v50  ;;  %v3285_v47 = vld [vmem:[%s8896_s4 + $0x258] sm:$0xff]  ;;  %v6664_v49 = vcombine.high %v3276_v43, %v3284_v44  ;;  %v6663_v54 = vcombine.low %v3276_v43, %v3284_v44  ;;  %v3316_v61 = vld [vmem:[%s8896_s4 + $0x350] sm:$0xff]  ;;  %v3255_v33 = vld [vmem:[%s8896_s4 + $0x168] sm:$0xff] }
 0xee5   : > { %4118 = vmatpush1.bf16.msra.mxu1 %v6693_v46  ;;  %v3277_v46 = vld [vmem:[%s8896_s4 + $0x218] sm:$0xff]  ;;  %v3262_v43 = vld [vmem:[%s8896_s4 + $0x1a0] sm:$0xff] }
 0xee6   : > { %4119 = vmatprep.subr.bf16.mxu1 %v6710_v53  ;;  %v6666_v50 = vcombine.high %v3277_v46, %v3285_v47  ;;  %v3301_v53 = vld [vmem:[%s8896_s4 + $0x2d8] sm:$0xff]  ;;  %v6665_v55 = vcombine.low %v3277_v46, %v3285_v47  ;;  %v3270_v44 = vld [vmem:[%s8896_s4 + $0x1e0] sm:$0xff]  ;;  %v3263_v46 = vld [vmem:[%s8896_s4 + $0x1a8] sm:$0xff] }
 0xee7   : > { %3183 = vadd.xlane.f32.xlu0 %v3180_v2  ;;  %4077 = vmatpush1.bf16.msra.mxu0 %v6707_v51  ;;  %v3300_v51 = vld [vmem:[%s8896_s4 + $0x2d0] sm:$0xff]  ;;  %v3271_v47 = vld [vmem:[%s8896_s4 + $0x1e8] sm:$0xff] }
 0xee8   : > { %4148 = vmatprep.subr.bf16.mxu0 %v6600_v58  ;;  %v6680_v56 = vcombine.high %v3292_v32, %v3300_v51  ;;  %v3308_v58 = vld [vmem:[%s8896_s4 + $0x310] sm:$0xff] }
 0xee9   : > { %4120 = vmatpush1.bf16.msra.mxu1 %v6709_v52  ;;  %v3293_v52 = vld [vmem:[%s8896_s4 + $0x298] sm:$0xff] }
 0xeea   : > { %4191 = vmatprep.subr.bf16.mxu1 %v6602_v1  ;;  %v3317_v1 = vld [vmem:[%s8896_s4 + $0x358] sm:$0xff] }
 0xf70   : > { %v3182_v2 = vpop.xlane.xlu0 %3181 }
 0xf71   : > { %v3185_v3 = vmul.f32 0.0078125, %v3182_v2  ;;  %v6679_v2 = vcombine.low %v3292_v32, %v3300_v51  ;;  %v3278_v32 = vld [vmem:[%s8896_s4 + $0x220] sm:$0xff] }
 0xf72   : > { %v3286_v51 = vld [vmem:[%s8896_s4 + $0x260] sm:$0xff] }
 0xf73   : > { %v3187_v4 = vadd.f32 1e-05, %v3185_v3  ;;  %v6681_v3 = vcombine.low %v3293_v52, %v3301_v53 }
 0xf74   : > { %v3184_v5 = vpop.xlane.xlu0 %3183 }
 0xf75   : > { %7678 = vrsqrt.f32 %v3187_v4  ;;  %v3186_v6 = vmul.f32 0.0078125, %v3184_v5  ;;  %v6696_v4 = vcombine.high %v3308_v58, %v3316_v61 }
 0xf77   : > { %v3188_v7 = vadd.f32 1e-05, %v3186_v6  ;;  %v3324_v6 = vld [vmem:[%s8896_s4 + $0x390] sm:$0xff] }
 0xf79   : > { %7680 = vrsqrt.f32 %v3188_v7  ;;  %v3332_v7 = vld [vmem:[%s8896_s4 + $0x3d0] sm:$0xff] }
 0xf7a   : > { %v6711_v17 = vcombine.low %v3324_v6, %v3332_v7 }
 0xf7f   : > { %v7679_v42 = vpop.eup %7678 }
 0xf80   : > { %v3191_v8 = vmul.f32 %v7679_v42, %v9176_v62  ;;  %v3325_v42 = vld [vmem:[%s8896_s4 + $0x398] sm:$0xff] }
 0xf82   : > { %v3199_v11 = vmul.f32 %v6593_v9, %v3191_v8  ;;  %v3333_v8 = vld [vmem:[%s8896_s4 + $0x3d8] sm:$0xff] }
 0xf83   : > { %v7681_v10 = vpop.eup %7680  ;;  %v6713_v18 = vcombine.low %v3325_v42, %v3333_v8 }
 0xf84   : > { %v3192_v12 = vmul.f32 %v7681_v10, %v9178_v0  ;;  %v9222_v19 = vadd.f32 %v6594_v13, %v3199_v11  ;;  %v3244_v0 = vld [vmem:[%s8896_s4 + $0x110] sm:$0xff]  ;;  %v6712_v11 = vcombine.high %v3324_v6, %v3332_v7  ;;  %v3310_v6 = vld [vmem:[%s8896_s4 + $0x320] sm:$0xff] }
 0xf85   : > { %v6632_v28 = vcombine.high %v3244_v0, %v3252_v25  ;;  %v6631_v34 = vcombine.low %v3244_v0, %v3252_v25  ;;  %v3230_v0 = vld [vmem:[%s8896_s4 + $0xa0] sm:$0xff] }
 0xf86   : > { %v3200_v14 = vmul.f32 %v6593_v9, %v3192_v12  ;;  %v6695_v9 = vcombine.low %v3308_v58, %v3316_v61  ;;  %v6714_v12 = vcombine.high %v3325_v42, %v3333_v8  ;;  %v3238_v25 = vld [vmem:[%s8896_s4 + $0xe0] sm:$0xff]  ;;  %v3311_v42 = vld [vmem:[%s8896_s4 + $0x328] sm:$0xff] }
 0xf87   : > { %v3294_v58 = vld [vmem:[%s8896_s4 + $0x2a0] sm:$0xff]  ;;  %v3319_v8 = vld [vmem:[%s8896_s4 + $0x368] sm:$0xff] }
 0xf88   : > { %v9224_v62 = vadd.f32 %v6594_v13, %v3200_v14  ;;  %v3214_v13 = vld [vmem:[%s8896_s4 + $0x20] sm:$0xff] }
 0xf89   : > { %v3222_v14 = vld [vmem:[%s8896_s4 + $0x60] sm:$0xff] }
 0xf8a   : > { %v9228_v20 = vpack.c.bf16 %v9224_v62, %v9222_v19  ;;  %v3302_v61 = vld [vmem:[%s8896_s4 + $0x2e0] sm:$0xff] }
 0xf8b   : > { %v3318_v7 = vld [vmem:[%s8896_s4 + $0x360] sm:$0xff] }
 0xf8c   : > { %4095 = vmatmul.mubr.bf16.vlgmr.msra.gmra.mrb[28].mxu0 %v9228_v20  ;;  %4138 = vmatmul.mubr.bf16.vlgmr.msra.gmra.mrb[32].mxu1 %v9228_v20 }
 0xf8d   : > { %4149 = vmatpush1.bf16.msra.mxu0 %v6599_v57  ;;  %4192 = vmatpush1.bf16.msra.mxu1 %v6601_v63  ;;  %v6682_v57 = vcombine.high %v3293_v52, %v3301_v53  ;;  %v3309_v63 = vld [vmem:[%s8896_s4 + $0x318] sm:$0xff]  ;;  %v3279_v52 = vld [vmem:[%s8896_s4 + $0x228] sm:$0xff] }
 0xf8e   : > { %4150 = vmatprep.subr.bf16.mxu0 %v6616_v21  ;;  %4193 = vmatprep.subr.bf16.mxu1 %v6618_v22  ;;  %v6698_v5 = vcombine.high %v3309_v63, %v3317_v1  ;;  %v6697_v10 = vcombine.low %v3309_v63, %v3317_v1  ;;  %v6604_v21 = vcombine.high %v3214_v13, %v3222_v14  ;;  %v3287_v53 = vld [vmem:[%s8896_s4 + $0x268] sm:$0xff] }
 0xf8f   : > { %4180 = vmatprep.mubr.bf16.mxu0 %v8268_v59  ;;  %4223 = vmatprep.mubr.bf16.mxu1 %v8268_v59  ;;  %v6606_v22 = vcombine.high %v3215_v39, %v3223_v16  ;;  %v3295_v63 = vld [vmem:[%s8896_s4 + $0x2a8] sm:$0xff] }
 0xf90   : > { %v3303_v1 = vld [vmem:[%s8896_s4 + $0x2e8] sm:$0xff] }
 0xf91   : > { %4151 = vmatpush1.bf16.msra.mxu0 %v6615_v38  ;;  %4194 = vmatpush1.bf16.msra.mxu1 %v6617_v27  ;;  %v6603_v38 = vcombine.low %v3214_v13, %v3222_v14  ;;  %v6605_v27 = vcombine.low %v3215_v39, %v3223_v16  ;;  %v3326_v13 = vld [vmem:[%s8896_s4 + $0x3a0] sm:$0xff]  ;;  %v3327_v39 = vld [vmem:[%s8896_s4 + $0x3a8] sm:$0xff] }
 0xf92   : > { %4152 = vmatprep.subr.bf16.mxu0 %v6632_v28  ;;  %4195 = vmatprep.subr.bf16.mxu1 %v6634_v15  ;;  %v6620_v28 = vcombine.high %v3230_v0, %v3238_v25  ;;  %v6622_v15 = vcombine.high %v3231_v60, %v3239_v36  ;;  %v3334_v14 = vld [vmem:[%s8896_s4 + $0x3e0] sm:$0xff]  ;;  %v3335_v16 = vld [vmem:[%s8896_s4 + $0x3e8] sm:$0xff] }
 0xf95   : > { %4153 = vmatpush1.bf16.msra.mxu0 %v6631_v34  ;;  %4196 = vmatpush1.bf16.msra.mxu1 %v6633_v35  ;;  %v6619_v34 = vcombine.low %v3230_v0, %v3238_v25  ;;  %v6621_v35 = vcombine.low %v3231_v60, %v3239_v36  ;;  %v3216_v0 = vld [vmem:[%s8896_s4 + $0x30] sm:$0xff]  ;;  %v3217_v60 = vld [vmem:[%s8896_s4 + $0x38] sm:$0xff] }
 0xf96   : > { %4154 = vmatprep.subr.bf16.mxu0 %v6648_v40  ;;  %4197 = vmatprep.subr.bf16.mxu1 %v6650_v41  ;;  %v6636_v40 = vcombine.high %v3246_v29, %v3254_v30  ;;  %v6638_v41 = vcombine.high %v3247_v31, %v3255_v33  ;;  %v3224_v25 = vld [vmem:[%s8896_s4 + $0x70] sm:$0xff]  ;;  %v3225_v36 = vld [vmem:[%s8896_s4 + $0x78] sm:$0xff] }
 0xf99   : > { %4155 = vmatpush1.bf16.msra.mxu0 %v6647_v48  ;;  %4198 = vmatpush1.bf16.msra.mxu1 %v6649_v45  ;;  %v6635_v48 = vcombine.low %v3246_v29, %v3254_v30  ;;  %v6637_v45 = vcombine.low %v3247_v31, %v3255_v33  ;;  %v3232_v29 = vld [vmem:[%s8896_s4 + $0xb0] sm:$0xff]  ;;  %v3233_v31 = vld [vmem:[%s8896_s4 + $0xb8] sm:$0xff] }
 0xf9a   : > { %4156 = vmatprep.subr.bf16.mxu0 %v6664_v49  ;;  %4199 = vmatprep.subr.bf16.mxu1 %v6666_v50  ;;  %v6652_v49 = vcombine.high %v3262_v43, %v3270_v44  ;;  %v6654_v50 = vcombine.high %v3263_v46, %v3271_v47  ;;  %v3240_v30 = vld [vmem:[%s8896_s4 + $0xf0] sm:$0xff]  ;;  %v3241_v33 = vld [vmem:[%s8896_s4 + $0xf8] sm:$0xff] }
 0xf9d   : > { %4157 = vmatpush1.bf16.msra.mxu0 %v6663_v54  ;;  %4200 = vmatpush1.bf16.msra.mxu1 %v6665_v55  ;;  %v6651_v54 = vcombine.low %v3262_v43, %v3270_v44  ;;  %v6653_v55 = vcombine.low %v3263_v46, %v3271_v47  ;;  %v3248_v43 = vld [vmem:[%s8896_s4 + $0x130] sm:$0xff]  ;;  %v3249_v46 = vld [vmem:[%s8896_s4 + $0x138] sm:$0xff] }
 0xf9e   : > { %4158 = vmatprep.subr.bf16.mxu0 %v6680_v56  ;;  %4201 = vmatprep.subr.bf16.mxu1 %v6682_v57  ;;  %v6668_v56 = vcombine.high %v3278_v32, %v3286_v51  ;;  %v6670_v57 = vcombine.high %v3279_v52, %v3287_v53  ;;  %v3256_v44 = vld [vmem:[%s8896_s4 + $0x170] sm:$0xff]  ;;  %v3257_v47 = vld [vmem:[%s8896_s4 + $0x178] sm:$0xff] }
 0xfa1   : > { %4159 = vmatpush1.bf16.msra.mxu0 %v6679_v2  ;;  %4202 = vmatpush1.bf16.msra.mxu1 %v6681_v3  ;;  %v6667_v2 = vcombine.low %v3278_v32, %v3286_v51  ;;  %v6669_v3 = vcombine.low %v3279_v52, %v3287_v53  ;;  %v3264_v32 = vld [vmem:[%s8896_s4 + $0x1b0] sm:$0xff]  ;;  %v3265_v52 = vld [vmem:[%s8896_s4 + $0x1b8] sm:$0xff] }
 0xfa2   : > { %4160 = vmatprep.subr.bf16.mxu0 %v6696_v4  ;;  %4203 = vmatprep.subr.bf16.mxu1 %v6698_v5  ;;  %v6684_v4 = vcombine.high %v3294_v58, %v3302_v61  ;;  %v6686_v5 = vcombine.high %v3295_v63, %v3303_v1  ;;  %v3272_v51 = vld [vmem:[%s8896_s4 + $0x1f0] sm:$0xff]  ;;  %v3273_v53 = vld [vmem:[%s8896_s4 + $0x1f8] sm:$0xff] }
 0xfa5   : > { %4161 = vmatpush1.bf16.msra.mxu0 %v6695_v9  ;;  %4204 = vmatpush1.bf16.msra.mxu1 %v6697_v10  ;;  %v6683_v9 = vcombine.low %v3294_v58, %v3302_v61  ;;  %v6685_v10 = vcombine.low %v3295_v63, %v3303_v1  ;;  %v3280_v58 = vld [vmem:[%s8896_s4 + $0x230] sm:$0xff]  ;;  %v3281_v63 = vld [vmem:[%s8896_s4 + $0x238] sm:$0xff] }
 0xfa6   : > { %4162 = vmatprep.subr.bf16.mxu0 %v6712_v11  ;;  %4205 = vmatprep.subr.bf16.mxu1 %v6714_v12  ;;  %v6700_v11 = vcombine.high %v3310_v6, %v3318_v7  ;;  %v6702_v12 = vcombine.high %v3311_v42, %v3319_v8  ;;  %v3288_v61 = vld [vmem:[%s8896_s4 + $0x270] sm:$0xff]  ;;  %v3289_v1 = vld [vmem:[%s8896_s4 + $0x278] sm:$0xff] }
 0xfa9   : > { %4163 = vmatpush1.bf16.msra.mxu0 %v6711_v17  ;;  %4206 = vmatpush1.bf16.msra.mxu1 %v6713_v18  ;;  %v6699_v17 = vcombine.low %v3310_v6, %v3318_v7  ;;  %v6701_v18 = vcombine.low %v3311_v42, %v3319_v8  ;;  %v3304_v6 = vld [vmem:[%s8896_s4 + $0x2f0] sm:$0xff]  ;;  %v3297_v7 = vld [vmem:[%s8896_s4 + $0x2b8] sm:$0xff]  ;;  %v6671_v8 = vcombine.low %v3280_v58, %v3288_v61 }
 0xfaa   : > { %4234 = vmatprep.subr.bf16.mxu0 %v6604_v21  ;;  %4277 = vmatprep.subr.bf16.mxu1 %v6606_v22  ;;  %v6716_v21 = vcombine.high %v3326_v13, %v3334_v14  ;;  %v6718_v22 = vcombine.high %v3327_v39, %v3335_v16  ;;  %v3305_v42 = vld [vmem:[%s8896_s4 + $0x2f8] sm:$0xff] }
 0xfac   : > { %4181 = vmatmul.mubr.bf16.vlgmr.msra.gmra.mrb[32].mxu0 %v9228_v20  ;;  %4224 = vmatmul.mubr.bf16.vlgmr.msra.gmra.mrb[36].mxu1 %v9228_v20 }
 0xfad   : > { %4235 = vmatpush1.bf16.msra.mxu0 %v6603_v38  ;;  %4278 = vmatpush1.bf16.msra.mxu1 %v6605_v27  ;;  %v6715_v38 = vcombine.low %v3326_v13, %v3334_v14  ;;  %v6717_v27 = vcombine.low %v3327_v39, %v3335_v16  ;;  %v3320_v13 = vld [vmem:[%s8896_s4 + $0x370] sm:$0xff]  ;;  %v3313_v14 = vld [vmem:[%s8896_s4 + $0x338] sm:$0xff] }
 0xfae   : > { %4236 = vmatprep.subr.bf16.mxu0 %v6620_v28  ;;  %4279 = vmatprep.subr.bf16.mxu1 %v6622_v15  ;;  %v6608_v28 = vcombine.high %v3216_v0, %v3224_v25  ;;  %v6610_v15 = vcombine.high %v3217_v60, %v3225_v36  ;;  %v3321_v39 = vld [vmem:[%s8896_s4 + $0x378] sm:$0xff] }
 0xfaf   : > { %4266 = vmatprep.mubr.bf16.mxu0 %v8268_v59  ;;  %4309 = vmatprep.mubr.bf16.mxu1 %v8268_v59 }
 0xfb1   : > { %4237 = vmatpush1.bf16.msra.mxu0 %v6619_v34  ;;  %4280 = vmatpush1.bf16.msra.mxu1 %v6621_v35  ;;  %v6607_v34 = vcombine.low %v3216_v0, %v3224_v25  ;;  %v6609_v35 = vcombine.low %v3217_v60, %v3225_v36  ;;  %v3336_v0 = vld [vmem:[%s8896_s4 + $0x3f0] sm:$0xff]  ;;  %v3329_v25 = vld [vmem:[%s8896_s4 + $0x3b8] sm:$0xff] }
 0xfb2   : > { %4238 = vmatprep.subr.bf16.mxu0 %v6636_v40  ;;  %4281 = vmatprep.subr.bf16.mxu1 %v6638_v41  ;;  %v6624_v40 = vcombine.high %v3232_v29, %v3240_v30  ;;  %v6626_v41 = vcombine.high %v3233_v31, %v3241_v33  ;;  %v3337_v60 = vld [vmem:[%s8896_s4 + $0x3f8] sm:$0xff] }
 0xfb5   : > { %4239 = vmatpush1.bf16.msra.mxu0 %v6635_v48  ;;  %4282 = vmatpush1.bf16.msra.mxu1 %v6637_v45  ;;  %v6623_v48 = vcombine.low %v3232_v29, %v3240_v30  ;;  %v6625_v45 = vcombine.low %v3233_v31, %v3241_v33  ;;  %v6721_v29 = vcombine.low %v3329_v25, %v3337_v60  ;;  %v7518_v30 = vld [vmem:[%s8906_s18 + $0x40] sm:$0xff]  }
 0xfb6   : > { %4240 = vmatprep.subr.bf16.mxu0 %v6652_v49  ;;  %4283 = vmatprep.subr.bf16.mxu1 %v6654_v50  ;;  %v6640_v49 = vcombine.high %v3248_v43, %v3256_v44  ;;  %v6642_v50 = vcombine.high %v3249_v46, %v3257_v47  ;;  %v7519_v31 = vld [vmem:[%s8906_s18 + $0xc0] sm:$0xff]  }
 0xfb7   : > { %v7520_v33 = vld [vmem:[%s8906_s18] sm:$0xff]  }
 0xfb9   : > { %4241 = vmatpush1.bf16.msra.mxu0 %v6651_v54  ;;  %4284 = vmatpush1.bf16.msra.mxu1 %v6653_v55  ;;  %v6639_v54 = vcombine.low %v3248_v43, %v3256_v44  ;;  %v6641_v55 = vcombine.low %v3249_v46, %v3257_v47  ;;  %v7525_v43 = vld [vmem:[%s8906_s18 + $0x88] sm:$0xff]   ;;  %v7526_v44 = vld [vmem:[%s8906_s18 + $0x50] sm:$0xff]  }
 0xfba   : > { %4242 = vmatprep.subr.bf16.mxu0 %v6668_v56  ;;  %4285 = vmatprep.subr.bf16.mxu1 %v6670_v57  ;;  %v6656_v56 = vcombine.high %v3264_v32, %v3272_v51  ;;  %v6658_v57 = vcombine.high %v3265_v52, %v3273_v53  ;;  %v7527_v46 = vld [vmem:[%s8906_s18 + $0xd0] sm:$0xff]  }
 0xfbb   : > { %v7528_v47 = vld [vmem:[%s8906_s18 + $0x10] sm:$0xff]  }
 0xfbd   : > { %4243 = vmatpush1.bf16.msra.mxu0 %v6667_v2  ;;  %4286 = vmatpush1.bf16.msra.mxu1 %v6669_v3  ;;  %v6655_v2 = vcombine.low %v3264_v32, %v3272_v51  ;;  %v6672_v3 = vcombine.high %v3280_v58, %v3288_v61  ;;  %v7534_v32 = vld [vmem:[%s8906_s18 + $0x60] sm:$0xff]   ;;  %v7542_v58 = vld [vmem:[%s8906_s18 + $0x70] sm:$0xff]  }
 0xfbe   : > { %4244 = vmatprep.subr.bf16.mxu0 %v6684_v4  ;;  %4287 = vmatprep.subr.bf16.mxu1 %v6686_v5  ;;  %v6674_v4 = vcombine.high %v3281_v63, %v3289_v1  ;;  %v3296_v5 = vld [vmem:[%s8896_s4 + $0x2b0] sm:$0xff]  ;;  %v7535_v51 = vld [vmem:[%s8906_s18 + $0xe0] sm:$0xff]  }
 0xfbf   : > { %v6687_v16 = vcombine.low %v3296_v5, %v3304_v6  ;;  %v7543_v61 = vld [vmem:[%s8906_s18 + $0xf0] sm:$0xff]  }
 0xfc1   : > { %4245 = vmatpush1.bf16.msra.mxu0 %v6683_v9  ;;  %4288 = vmatpush1.bf16.msra.mxu1 %v6685_v10  ;;  %v6673_v9 = vcombine.low %v3281_v63, %v3289_v1  ;;  %v6688_v10 = vcombine.high %v3296_v5, %v3304_v6  ;;  %v7544_v63 = vld [vmem:[%s8906_s18 + $0x30] sm:$0xff]   ;;  %v7550_v5 = vld [vmem:[%s8906_s18 + $0x140] sm:$0xff]  }
 0xfc2   : > { %4246 = vmatprep.subr.bf16.mxu0 %v6700_v11  ;;  %4289 = vmatprep.subr.bf16.mxu1 %v6702_v12  ;;  %v6690_v11 = vcombine.high %v3297_v7, %v3305_v42  ;;  %v3312_v12 = vld [vmem:[%s8896_s4 + $0x330] sm:$0xff]  ;;  %v7551_v6 = vld [vmem:[%s8906_s18 + $0x1c0] sm:$0xff]  }
 0xfc3   : > { %v6703_v36 = vcombine.low %v3312_v12, %v3320_v13  ;;  %v7545_v1 = vld [vmem:[%s8906_s18 + $0xb0] sm:$0xff]  }
 0xfc5   : > { %4247 = vmatpush1.bf16.msra.mxu0 %v6699_v17  ;;  %4290 = vmatpush1.bf16.msra.mxu1 %v6701_v18  ;;  %v6689_v17 = vcombine.low %v3297_v7, %v3305_v42  ;;  %v6704_v18 = vcombine.high %v3312_v12, %v3320_v13  ;;  %v9367_v7 = vld [vmem:[%s8903_s26] sm:$0xff]  ;;  %v9370_v42 = vsub.s32 3, %v8973_v23 }
 0xfc6   : > { %4248 = vmatprep.subr.bf16.mxu0 %v6716_v21  ;;  %4291 = vmatprep.subr.bf16.mxu1 %v6718_v22  ;;  %v6706_v21 = vcombine.high %v3313_v14, %v3321_v39  ;;  %v3328_v22 = vld [vmem:[%s8896_s4 + $0x3b0] sm:$0xff]  ;;  %s9689_s4 = sld [smem:[#allocation49_spill]] (!%p6854_p2) }
 0xfc9   : > { %4249 = vmatpush1.bf16.msra.mxu0 %v6715_v38  ;;  %4292 = vmatpush1.bf16.msra.mxu1 %v6717_v27  ;;  %v6705_v38 = vcombine.low %v3313_v14, %v3321_v39  ;;  %v6720_v27 = vcombine.high %v3328_v22, %v3336_v0 }
 0xfca   : > { %4320 = vmatprep.subr.bf16.mxu0 %v6608_v28  ;;  %4363 = vmatprep.subr.bf16.mxu1 %v6610_v15  ;;  %v6722_v28 = vcombine.high %v3329_v25, %v3337_v60  ;;  %v6719_v15 = vcombine.low %v3328_v22, %v3336_v0 }
 0xfcc   : > { %4267 = vmatmul.mubr.bf16.vlgmr.msra.gmra.mrb[36].mxu0 %v9228_v20  ;;  %4310 = vmatmul.mubr.bf16.vlgmr.msra.gmra.mrb[40].mxu1 %v9228_v20 }
 0xfcd   : > { %4321 = vmatpush1.bf16.msra.mxu0 %v6607_v34  ;;  %4364 = vmatpush1.bf16.msra.mxu1 %v6609_v35  ;;  %v7521_v34 = vld [vmem:[%s8906_s18 + $0x80] sm:$0xff]   ;;  %v7522_v35 = vld [vmem:[%s8906_s18 + $0x48] sm:$0xff]  }
 0xfce   : > { %4322 = vmatprep.subr.bf16.mxu0 %v6624_v40  ;;  %4365 = vmatprep.subr.bf16.mxu1 %v6626_v41  ;;  %v7523_v40 = vld [vmem:[%s8906_s18 + $0xc8] sm:$0xff]  }
 0xfcf   : > { %4352 = vmatprep.mubr.bf16.mxu0 %v8268_v59  ;;  %4395 = vmatprep.mubr.bf16.mxu1 %v8268_v59  ;;  %v6657_v59 = vcombine.low %v3265_v52, %v3273_v53  ;;  %v7524_v41 = vld [vmem:[%s8906_s18 + $0x8] sm:$0xff]   ;;  %v7536_v52 = vld [vmem:[%s8906_s18 + $0x20] sm:$0xff]  }
 0xfd0   : > { %v7537_v53 = vld [vmem:[%s8906_s18 + $0xa0] sm:$0xff]  }
 0xfd1   : > { %4323 = vmatpush1.bf16.msra.mxu0 %v6623_v48  ;;  %4366 = vmatpush1.bf16.msra.mxu1 %v6625_v45  ;;  %v7529_v48 = vld [vmem:[%s8906_s18 + $0x90] sm:$0xff]   ;;  %v7531_v45 = vld [vmem:[%s8906_s18 + $0xd8] sm:$0xff]  }
 0xfd2   : > { %4324 = vmatprep.subr.bf16.mxu0 %v6640_v49  ;;  %4367 = vmatprep.subr.bf16.mxu1 %v6642_v50  ;;  %v7532_v49 = vld [vmem:[%s8906_s18 + $0x18] sm:$0xff]  }
 0xfd3   : > { %v7533_v50 = vld [vmem:[%s8906_s18 + $0x98] sm:$0xff]  }
 0xfd5   : > { %4325 = vmatpush1.bf16.msra.mxu0 %v6639_v54  ;;  %4368 = vmatpush1.bf16.msra.mxu1 %v6641_v55  ;;  %v7538_v54 = vld [vmem:[%s8906_s18 + $0x68] sm:$0xff]  }
 0xfd6   : > { %4326 = vmatprep.subr.bf16.mxu0 %v6656_v56  ;;  %4369 = vmatprep.subr.bf16.mxu1 %v6658_v57  ;;  %v7539_v55 = vld [vmem:[%s8906_s18 + $0xe8] sm:$0xff]  }
 0xfd7   : > { %v7540_v56 = vld [vmem:[%s8906_s18 + $0x28] sm:$0xff]  }
 0xfd8   : > { %v7541_v57 = vld [vmem:[%s8906_s18 + $0xa8] sm:$0xff]  }
 0xfd9   : > { %4327 = vmatpush1.bf16.msra.mxu0 %v6655_v2  ;;  %4370 = vmatpush1.bf16.msra.mxu1 %v6657_v59  ;;  %v7546_v2 = vld [vmem:[%s8906_s18 + $0x78] sm:$0xff]  }
 0xfda   : > { %4328 = vmatprep.subr.bf16.mxu0 %v6672_v3  ;;  %4371 = vmatprep.subr.bf16.mxu1 %v6674_v4  ;;  %v7547_v59 = vld [vmem:[%s8906_s18 + $0xf8] sm:$0xff]  }
 0xfdb   : > { %v7548_v3 = vld [vmem:[%s8906_s18 + $0x38] sm:$0xff]  }
 0xfdc   : > { %v7549_v4 = vld [vmem:[%s8906_s18 + $0xb8] sm:$0xff]  }
 0xfdd   : > { %4329 = vmatpush1.bf16.msra.mxu0 %v6671_v8  ;;  %4372 = vmatpush1.bf16.msra.mxu1 %v6673_v9  ;;  %v3345_v8 = vrot.slane %v9367_v7, %v8976_v24  ;;  %v3353_v9 = vrot.slane %v9367_v7, %v8991_v37 }
 0xfde   : > { %4330 = vmatprep.subr.bf16.mxu0 %v6688_v10  ;;  %4373 = vmatprep.subr.bf16.mxu1 %v6690_v11  ;;  %v3349_v10 = vrot.slane %v9367_v7, %v8980_v26  ;;  %v3357_v11 = vrot.slane %v9367_v7, %v9370_v42 }
 0xfe1   : > { %4331 = vmatpush1.bf16.msra.mxu0 %v6687_v16  ;;  %4374 = vmatpush1.bf16.msra.mxu1 %v6689_v17 }
 0xfe2   : > { %4332 = vmatprep.subr.bf16.mxu0 %v6704_v18  ;;  %4375 = vmatprep.subr.bf16.mxu1 %v6706_v21 }
 0xfe5   : > { %4333 = vmatpush1.bf16.msra.mxu0 %v6703_v36  ;;  %4376 = vmatpush1.bf16.msra.mxu1 %v6705_v38 }
 0xfe6   : > { %4334 = vmatprep.subr.bf16.mxu0 %v6720_v27  ;;  %4377 = vmatprep.subr.bf16.mxu1 %v6722_v28 }
 0xfe9   : > { %4335 = vmatpush1.bf16.msra.mxu0 %v6719_v15  ;;  %4378 = vmatpush1.bf16.msra.mxu1 %v6721_v29 }
 0xfea   : > { %6990 = vmatprep.subr.bf16.mxu0 %v7518_v30  ;;  %7012 = vmatprep.subr.bf16.mxu1 %v7519_v31 }
 0xfec   : > { %4353 = vmatmul.mubr.bf16.vlgmr.msra.gmra.mrb[40].mxu0 %v9228_v20  ;;  %4396 = vmatmul.mubr.bf16.vlgmr.msra.gmra.mrb[44].mxu1 %v9228_v20  ;;  %v7530_v20 = vld [vmem:[%s8906_s18 + $0x58] sm:$0xff]  }
 0xfed   : > { %6991 = vmatpush3.bf16.msra.mxu0 %v7520_v33  ;;  %7013 = vmatpush3.bf16.msra.mxu1 %v7521_v34 }
 0xfee   : > { %6992 = vmatprep.subr.bf16.mxu0 %v7522_v35  ;;  %7014 = vmatprep.subr.bf16.mxu1 %v7523_v40 }
 0xff1   : > { %6993 = vmatpush3.bf16.msra.mxu0 %v7524_v41  ;;  %7015 = vmatpush3.bf16.msra.mxu1 %v7525_v43 }
 0xff2   : > { %6994 = vmatprep.subr.bf16.mxu0 %v7526_v44  ;;  %7016 = vmatprep.subr.bf16.mxu1 %v7527_v46 }
 0xff5   : > { %6995 = vmatpush3.bf16.msra.mxu0 %v7528_v47  ;;  %7017 = vmatpush3.bf16.msra.mxu1 %v7529_v48  ;;  %v7552_v47 = vld [vmem:[%s8906_s18 + $0x100] sm:$0xff]  }
 0xff6   : > { %6996 = vmatprep.subr.bf16.mxu0 %v7530_v20  ;;  %7018 = vmatprep.subr.bf16.mxu1 %v7531_v45  ;;  %v7553_v48 = vld [vmem:[%s8906_s18 + $0x180] sm:$0xff]   ;;  %v7554_v20 = vld [vmem:[%s8906_s18 + $0x148] sm:$0xff]  }
 0xff7   : > { %v7555_v45 = vld [vmem:[%s8906_s18 + $0x1c8] sm:$0xff]  }
 0xff9   : > { %6997 = vmatpush3.bf16.msra.mxu0 %v7532_v49  ;;  %7019 = vmatpush3.bf16.msra.mxu1 %v7533_v50  ;;  %v7556_v49 = vld [vmem:[%s8906_s18 + $0x108] sm:$0xff]  }
 0xffa   : > { %6998 = vmatprep.subr.bf16.mxu0 %v7534_v32  ;;  %7020 = vmatprep.subr.bf16.mxu1 %v7535_v51  ;;  %v7557_v50 = vld [vmem:[%s8906_s18 + $0x188] sm:$0xff]   ;;  %v7558_v32 = vld [vmem:[%s8906_s18 + $0x150] sm:$0xff]  }
 0xffb   : > { %v7559_v51 = vld [vmem:[%s8906_s18 + $0x1d0] sm:$0xff]  }
 0xffd   : > { %6999 = vmatpush3.bf16.msra.mxu0 %v7536_v52  ;;  %7021 = vmatpush3.bf16.msra.mxu1 %v7537_v53  ;;  %v7560_v52 = vld [vmem:[%s8906_s18 + $0x110] sm:$0xff]  }
 0xffe   : > { %7000 = vmatprep.subr.bf16.mxu0 %v7538_v54  ;;  %7022 = vmatprep.subr.bf16.mxu1 %v7539_v55  ;;  %v7561_v53 = vld [vmem:[%s8906_s18 + $0x190] sm:$0xff]   ;;  %v7562_v54 = vld [vmem:[%s8906_s18 + $0x158] sm:$0xff]  }
 0xfff   : > { %v7563_v55 = vld [vmem:[%s8906_s18 + $0x1d8] sm:$0xff]  }
0x1001   : > { %7001 = vmatpush3.bf16.msra.mxu0 %v7540_v56  ;;  %7023 = vmatpush3.bf16.msra.mxu1 %v7541_v57  ;;  %v7564_v56 = vld [vmem:[%s8906_s18 + $0x118] sm:$0xff]  }
0x1002   : > { %7002 = vmatprep.subr.bf16.mxu0 %v7542_v58  ;;  %7024 = vmatprep.subr.bf16.mxu1 %v7543_v61  ;;  %v7565_v57 = vld [vmem:[%s8906_s18 + $0x198] sm:$0xff]   ;;  %v7566_v58 = vld [vmem:[%s8906_s18 + $0x160] sm:$0xff]  }
0x1003   : > { %v7567_v61 = vld [vmem:[%s8906_s18 + $0x1e0] sm:$0xff]  }
0x1005   : > { %7003 = vmatpush3.bf16.msra.mxu0 %v7544_v63  ;;  %7025 = vmatpush3.bf16.msra.mxu1 %v7545_v1  ;;  %v7568_v63 = vld [vmem:[%s8906_s18 + $0x120] sm:$0xff]  }
0x1006   : > { %7004 = vmatprep.subr.bf16.mxu0 %v7546_v2  ;;  %7026 = vmatprep.subr.bf16.mxu1 %v7547_v59  ;;  %v7569_v1 = vld [vmem:[%s8906_s18 + $0x1a0] sm:$0xff]   ;;  %v7570_v2 = vld [vmem:[%s8906_s18 + $0x168] sm:$0xff]  }
0x1007   : > { %v7571_v59 = vld [vmem:[%s8906_s18 + $0x1e8] sm:$0xff]  }
0x1009   : > { %7005 = vmatpush3.bf16.msra.mxu0 %v7548_v3  ;;  %7027 = vmatpush3.bf16.msra.mxu1 %v7549_v4  ;;  %v3360_v3 = vsub.s32 4, %v8973_v23  ;;  %v3368_v4 = vsub.s32 6, %v8973_v23 }
0x100a   : > { %7034 = vmatprep.subr.bf16.mxu0 %v7550_v5  ;;  %7056 = vmatprep.subr.bf16.mxu1 %v7551_v6  ;;  %v3364_v5 = vsub.s32 5, %v8973_v23  ;;  %v3372_v6 = vsub.s32 7, %v8973_v23 }
0x105f   : > { %v4096_v12 = vpop.f32.mrb[28].mxu0  ;;  %v4139_v13 = vpop.f32.mrb[32].mxu1 }
0x1060   : > { %v4097_v14 = vadd.f32 %v4096_v12, %v3345_v8  ;;  %v4140_v39 = vadd.f32 %v4139_v13, %v3353_v9  ;;  %v4098_v16 = vpop.f32.mrb[29].mxu0  ;;  %v4141_v17 = vpop.f32.mrb[33].mxu1  ;;  %v7574_v12 = vld [vmem:[%s8906_s18 + $0x170] sm:$0xff]  }
0x1061   : > { %v4099_v18 = vadd.f32 %v4098_v16, %v3349_v10  ;;  %v4142_v21 = vadd.f32 %v4141_v17, %v3357_v11  ;;  %v4100_v22 = vpop.f32.mrb[30].mxu0  ;;  %v4143_v0 = vpop.f32.mrb[34].mxu1  ;;  %v7575_v13 = vld [vmem:[%s8906_s18 + $0x1f0] sm:$0xff]  }
0x1062   : > { %v4101_v25 = vadd.f32 %v4100_v22, %v3345_v8  ;;  %v4144_v60 = vadd.f32 %v4143_v0, %v3353_v9  ;;  %v4102_v36 = vpop.f32.mrb[31].mxu0  ;;  %v4145_v38 = vpop.f32.mrb[35].mxu1  ;;  %v4406_v15 = vmax.f32 %v4097_v14, 0.0  ;;  %v4408_v29 = vmax.f32 %v4140_v39, 0.0  ;;  %v7572_v8 = vld [vmem:[%s8906_s18 + $0x128] sm:$0xff]  }
0x1063   : > { %v4103_v27 = vadd.f32 %v4102_v36, %v3349_v10  ;;  %v4146_v28 = vadd.f32 %v4145_v38, %v3357_v11  ;;  %v4407_v33 = vmax.f32 %v4099_v18, 0.0  ;;  %v4409_v34 = vmax.f32 %v4142_v21, 0.0  ;;  %v7573_v9 = vld [vmem:[%s8906_s18 + $0x1a8] sm:$0xff]   ;;  %v7576_v18 = vld [vmem:[%s8906_s18 + $0x130] sm:$0xff]   ;;  %v7578_v36 = vld [vmem:[%s8906_s18 + $0x178] sm:$0xff]  }
0x1064   : > { %v4422_v30 = vmax.f32 %v4101_v25, 0.0  ;;  %v4424_v31 = vmax.f32 %v4144_v60, 0.0  ;;  %v3361_v10 = vrot.slane %v9367_v7, %v3360_v3  ;;  %v3369_v11 = vrot.slane %v9367_v7, %v3368_v4  ;;  %v7577_v21 = vld [vmem:[%s8906_s18 + $0x1b0] sm:$0xff]   ;;  %v7579_v38 = vld [vmem:[%s8906_s18 + $0x1f8] sm:$0xff]  }
0x1065   : > { %v4423_v35 = vmax.f32 %v4103_v27, 0.0  ;;  %v4425_v40 = vmax.f32 %v4146_v28, 0.0  ;;  %v3365_v14 = vrot.slane %v9367_v7, %v3364_v5  ;;  %v3373_v39 = vrot.slane %v9367_v7, %v3372_v6 }
0x1066   : > { %v4438_v41 = vpack.c.bf16 %v4422_v30, %v4406_v15  ;;  %v4440_v43 = vpack.c.bf16 %v4424_v31, %v4408_v29 }
0x1067   : > { %v4439_v44 = vpack.c.bf16 %v4423_v35, %v4407_v33  ;;  %v4441_v46 = vpack.c.bf16 %v4425_v40, %v4409_v34  ;;  %v7580_v40 = vld [vmem:[%s8906_s18 + $0x138] sm:$0xff]  }
0x1069   : > { %5517 = vmatprep.mubr.bf16.mxu0 %v4439_v44  ;;  %5558 = vmatprep.mubr.bf16.mxu1 %v4441_v46 }
0x106a   : > { %5518 = vmatmul.mubr.bf16.vlgmr.msra.gmra.mrb[44].mxu0 %v4438_v41  ;;  %5559 = vmatmul.mubr.bf16.vlgmr.msra.gmra.mrb[48].mxu1 %v4440_v43  ;;  %v7581_v41 = vld [vmem:[%s8906_s18 + $0x1b8] sm:$0xff]  }
0x106b   : > { %7035 = vmatpush3.bf16.msra.mxu0 %v7552_v47  ;;  %7057 = vmatpush3.bf16.msra.mxu1 %v7553_v48  ;;  %v7582_v48 = vld [vmem:[%s8906_s18 + $0x240] sm:$0xff]  }
0x106c   : > { %7036 = vmatprep.subr.bf16.mxu0 %v7554_v20  ;;  %7058 = vmatprep.subr.bf16.mxu1 %v7555_v45  ;;  %v7583_v20 = vld [vmem:[%s8906_s18 + $0x2c0] sm:$0xff]  }
0x106f   : > { %7037 = vmatpush3.bf16.msra.mxu0 %v7556_v49  ;;  %7059 = vmatpush3.bf16.msra.mxu1 %v7557_v50 }
0x1070   : > { %7038 = vmatprep.subr.bf16.mxu0 %v7558_v32  ;;  %7060 = vmatprep.subr.bf16.mxu1 %v7559_v51 }
0x1073   : > { %7039 = vmatpush3.bf16.msra.mxu0 %v7560_v52  ;;  %7061 = vmatpush3.bf16.msra.mxu1 %v7561_v53 }
0x1074   : > { %7040 = vmatprep.subr.bf16.mxu0 %v7562_v54  ;;  %7062 = vmatprep.subr.bf16.mxu1 %v7563_v55  ;;  %v7584_v55 = vld [vmem:[%s8906_s18 + $0x200] sm:$0xff]  }
0x1077   : > { %7041 = vmatpush3.bf16.msra.mxu0 %v7564_v56  ;;  %7063 = vmatpush3.bf16.msra.mxu1 %v7565_v57  ;;  %v7585_v56 = vld [vmem:[%s8906_s18 + $0x280] sm:$0xff]   ;;  %v7586_v57 = vld [vmem:[%s8906_s18 + $0x248] sm:$0xff]  }
0x1078   : > { %7042 = vmatprep.subr.bf16.mxu0 %v7566_v58  ;;  %7064 = vmatprep.subr.bf16.mxu1 %v7567_v61  ;;  %v7587_v58 = vld [vmem:[%s8906_s18 + $0x2c8] sm:$0xff]  }
0x1079   : > { %v7588_v61 = vld [vmem:[%s8906_s18 + $0x208] sm:$0xff]  }
0x107b   : > { %7043 = vmatpush3.bf16.msra.mxu0 %v7568_v63  ;;  %7065 = vmatpush3.bf16.msra.mxu1 %v7569_v1  ;;  %v7589_v63 = vld [vmem:[%s8906_s18 + $0x288] sm:$0xff]   ;;  %v7590_v1 = vld [vmem:[%s8906_s18 + $0x250] sm:$0xff]  }
0x107c   : > { %7044 = vmatprep.subr.bf16.mxu0 %v7570_v2  ;;  %7066 = vmatprep.subr.bf16.mxu1 %v7571_v59  ;;  %v7591_v2 = vld [vmem:[%s8906_s18 + $0x2d0] sm:$0xff]  }
0x107d   : > { %v7592_v59 = vld [vmem:[%s8906_s18 + $0x210] sm:$0xff]  }
0x107f   : > { %v4182_v16 = vpop.f32.mrb[32].mxu0  ;;  %v4225_v17 = vpop.f32.mrb[36].mxu1  ;;  %7045 = vmatpush3.bf16.msra.mxu0 %v7572_v8  ;;  %7067 = vmatpush3.bf16.msra.mxu1 %v7573_v9  ;;  %v7593_v8 = vld [vmem:[%s8906_s18 + $0x290] sm:$0xff]   ;;  %v7594_v9 = vld [vmem:[%s8906_s18 + $0x258] sm:$0xff]  }
0x1080   : > { %v4183_v22 = vadd.f32 %v4182_v16, %v3361_v10  ;;  %v4226_v0 = vadd.f32 %v4225_v17, %v3369_v11  ;;  %v4184_v25 = vpop.f32.mrb[33].mxu0  ;;  %v4227_v60 = vpop.f32.mrb[37].mxu1  ;;  %7046 = vmatprep.subr.bf16.mxu0 %v7574_v12  ;;  %7068 = vmatprep.subr.bf16.mxu1 %v7575_v13  ;;  %v7597_v12 = vld [vmem:[%s8906_s18 + $0x298] sm:$0xff]   ;;  %v7598_v13 = vld [vmem:[%s8906_s18 + $0x260] sm:$0xff]   ;;  %v7602_v17 = vld [vmem:[%s8906_s18 + $0x268] sm:$0xff]  }
0x1081   : > { %v4185_v27 = vadd.f32 %v4184_v25, %v3365_v14  ;;  %v4228_v28 = vadd.f32 %v4227_v60, %v3373_v39  ;;  %v4186_v15 = vpop.f32.mrb[34].mxu0  ;;  %v4229_v7 = vpop.f32.mrb[38].mxu1  ;;  %v7601_v16 = vld [vmem:[%s8906_s18 + $0x2a0] sm:$0xff]  }
0x1082   : > { %v4187_v29 = vadd.f32 %v4186_v15, %v3361_v10  ;;  %v4230_v30 = vadd.f32 %v4229_v7, %v3369_v11  ;;  %v4188_v31 = vpop.f32.mrb[35].mxu0  ;;  %v4231_v33 = vpop.f32.mrb[39].mxu1  ;;  %v4410_v43 = vmax.f32 %v4183_v22, 0.0  ;;  %v4412_v44 = vmax.f32 %v4226_v0, 0.0  ;;  %v7595_v10 = vld [vmem:[%s8906_s18 + $0x2d8] sm:$0xff]   ;;  %v7604_v22 = vld [vmem:[%s8906_s18 + $0x228] sm:$0xff]  }
0x1083   : > { %v4189_v34 = vadd.f32 %v4188_v31, %v3365_v14  ;;  %v4232_v35 = vadd.f32 %v4231_v33, %v3373_v39  ;;  %7047 = vmatpush3.bf16.msra.mxu0 %v7576_v18  ;;  %7069 = vmatpush3.bf16.msra.mxu1 %v7577_v21  ;;  %v4411_v45 = vmax.f32 %v4185_v27, 0.0  ;;  %v4413_v49 = vmax.f32 %v4228_v28, 0.0  ;;  %v7596_v11 = vld [vmem:[%s8906_s18 + $0x218] sm:$0xff]   ;;  %v7599_v14 = vld [vmem:[%s8906_s18 + $0x2e0] sm:$0xff]   ;;  %v7603_v18 = vld [vmem:[%s8906_s18 + $0x2e8] sm:$0xff]  }
0x1084   : > { %v4426_v46 = vmax.f32 %v4187_v29, 0.0  ;;  %v4428_v47 = vmax.f32 %v4230_v30, 0.0  ;;  %7048 = vmatprep.subr.bf16.mxu0 %v7578_v36  ;;  %7070 = vmatprep.subr.bf16.mxu1 %v7579_v38  ;;  %v7600_v39 = vld [vmem:[%s8906_s18 + $0x220] sm:$0xff]   ;;  %v9449_v21 = vld [vmem:[%s8903_s26 + $0x8] sm:$0xff]  ;;  %v7606_v36 = vld [vmem:[%s8906_s18 + $0x270] sm:$0xff]  }
0x1085   : > { %v4427_v50 = vmax.f32 %v4189_v34, 0.0  ;;  %v4429_v32 = vmax.f32 %v4232_v35, 0.0  ;;  %v7605_v0 = vld [vmem:[%s8906_s18 + $0x2a8] sm:$0xff]   ;;  %v3377_v25 = vrot.slane %v9449_v21, %v8976_v24  ;;  %v3385_v60 = vrot.slane %v9449_v21, %v8991_v37  ;;  %v7607_v38 = vld [vmem:[%s8906_s18 + $0x2f0] sm:$0xff]  }
0x1086   : > { %v4442_v51 = vpack.c.bf16 %v4426_v46, %v4410_v43  ;;  %v4444_v52 = vpack.c.bf16 %v4428_v47, %v4412_v44  ;;  %v3381_v27 = vrot.slane %v9449_v21, %v8980_v26  ;;  %v3389_v28 = vrot.slane %v9449_v21, %v9370_v42  ;;  %v7608_v29 = vld [vmem:[%s8906_s18 + $0x230] sm:$0xff]  }
0x1087   : > { %v4443_v53 = vpack.c.bf16 %v4427_v50, %v4411_v45  ;;  %v4445_v54 = vpack.c.bf16 %v4429_v32, %v4413_v49  ;;  %7049 = vmatpush3.bf16.msra.mxu0 %v7580_v40  ;;  %7071 = vmatpush3.bf16.msra.mxu1 %v7581_v41  ;;  %v7609_v30 = vld [vmem:[%s8906_s18 + $0x2b0] sm:$0xff]   ;;  %v7610_v40 = vld [vmem:[%s8906_s18 + $0x278] sm:$0xff]  }
0x1088   : > { %7078 = vmatprep.subr.bf16.mxu0 %v7582_v48  ;;  %7100 = vmatprep.subr.bf16.mxu1 %v7583_v20  ;;  %v7611_v41 = vld [vmem:[%s8906_s18 + $0x2f8] sm:$0xff]  }
0x1089   : > { %5599 = vmatprep.mubr.bf16.mxu0 %v4443_v53  ;;  %5640 = vmatprep.mubr.bf16.mxu1 %v4445_v54 }
0x108a   : > { %5600 = vmatmul.mubr.bf16.vlgmr.msra.gmra.mrb[48].mxu0 %v4442_v51  ;;  %5641 = vmatmul.mubr.bf16.vlgmr.msra.gmra.mrb[52].mxu1 %v4444_v52  ;;  %v7612_v51 = vld [vmem:[%s8906_s18 + $0x238] sm:$0xff]  }
0x108b   : > { %7079 = vmatpush3.bf16.msra.mxu0 %v7584_v55  ;;  %7101 = vmatpush3.bf16.msra.mxu1 %v7585_v56  ;;  %v7613_v52 = vld [vmem:[%s8906_s18 + $0x2b8] sm:$0xff]  }
0x108c   : > { %7080 = vmatprep.subr.bf16.mxu0 %v7586_v57  ;;  %7102 = vmatprep.subr.bf16.mxu1 %v7587_v58  ;;  %v7614_v57 = vld [vmem:[%s8906_s18 + $0x340] sm:$0xff]  }
0x108d   : > { %v7615_v58 = vld [vmem:[%s8906_s18 + $0x3c0] sm:$0xff]  }
0x108f   : > { %7081 = vmatpush3.bf16.msra.mxu0 %v7588_v61  ;;  %7103 = vmatpush3.bf16.msra.mxu1 %v7589_v63 }
0x1090   : > { %7082 = vmatprep.subr.bf16.mxu0 %v7590_v1  ;;  %7104 = vmatprep.subr.bf16.mxu1 %v7591_v2 }
0x1093   : > { %7083 = vmatpush3.bf16.msra.mxu0 %v7592_v59  ;;  %7105 = vmatpush3.bf16.msra.mxu1 %v7593_v8 }
0x1094   : > { %7084 = vmatprep.subr.bf16.mxu0 %v7594_v9  ;;  %7106 = vmatprep.subr.bf16.mxu1 %v7595_v10 }
0x1097   : > { %7085 = vmatpush3.bf16.msra.mxu0 %v7596_v11  ;;  %7107 = vmatpush3.bf16.msra.mxu1 %v7597_v12  ;;  %v7616_v11 = vld [vmem:[%s8906_s18 + $0x300] sm:$0xff]  }
0x1098   : > { %7086 = vmatprep.subr.bf16.mxu0 %v7598_v13  ;;  %7108 = vmatprep.subr.bf16.mxu1 %v7599_v14  ;;  %v7617_v12 = vld [vmem:[%s8906_s18 + $0x380] sm:$0xff]   ;;  %v7618_v13 = vld [vmem:[%s8906_s18 + $0x348] sm:$0xff]  }
0x1099   : > { %v7619_v14 = vld [vmem:[%s8906_s18 + $0x3c8] sm:$0xff]  }
0x109b   : > { %7087 = vmatpush3.bf16.msra.mxu0 %v7600_v39  ;;  %7109 = vmatpush3.bf16.msra.mxu1 %v7601_v16  ;;  %v7620_v39 = vld [vmem:[%s8906_s18 + $0x308] sm:$0xff]  }
0x109c   : > { %7088 = vmatprep.subr.bf16.mxu0 %v7602_v17  ;;  %7110 = vmatprep.subr.bf16.mxu1 %v7603_v18  ;;  %v7621_v16 = vld [vmem:[%s8906_s18 + $0x388] sm:$0xff]   ;;  %v7622_v17 = vld [vmem:[%s8906_s18 + $0x350] sm:$0xff]  }
0x109d   : > { %v7623_v18 = vld [vmem:[%s8906_s18 + $0x3d0] sm:$0xff]  }
0x109f   : > { %v4268_v15 = vpop.f32.mrb[36].mxu0  ;;  %v4311_v7 = vpop.f32.mrb[40].mxu1  ;;  %7089 = vmatpush3.bf16.msra.mxu0 %v7604_v22  ;;  %7111 = vmatpush3.bf16.msra.mxu1 %v7605_v0  ;;  %v7624_v22 = vld [vmem:[%s8906_s18 + $0x310] sm:$0xff]  }
0x10a0   : > { %v4269_v31 = vadd.f32 %v4268_v15, %v3377_v25  ;;  %v4312_v33 = vadd.f32 %v4311_v7, %v3385_v60  ;;  %v4270_v34 = vpop.f32.mrb[37].mxu0  ;;  %v4313_v35 = vpop.f32.mrb[41].mxu1  ;;  %7090 = vmatprep.subr.bf16.mxu0 %v7606_v36  ;;  %7112 = vmatprep.subr.bf16.mxu1 %v7607_v38  ;;  %v7625_v0 = vld [vmem:[%s8906_s18 + $0x390] sm:$0xff]   ;;  %v7628_v36 = vld [vmem:[%s8906_s18 + $0x318] sm:$0xff]   ;;  %v7632_v15 = vld [vmem:[%s8906_s18 + $0x320] sm:$0xff]  }
0x10a1   : > { %v4271_v43 = vadd.f32 %v4270_v34, %v3381_v27  ;;  %v4314_v44 = vadd.f32 %v4313_v35, %v3389_v28  ;;  %v4272_v46 = vpop.f32.mrb[38].mxu0  ;;  %v4315_v47 = vpop.f32.mrb[42].mxu1  ;;  %v7629_v38 = vld [vmem:[%s8906_s18 + $0x398] sm:$0xff]   ;;  %v7633_v7 = vld [vmem:[%s8906_s18 + $0x3a0] sm:$0xff]   ;;  %v3393_v34 = vrot.slane %v9449_v21, %v3360_v3  ;;  %v3401_v35 = vrot.slane %v9449_v21, %v3368_v4  ;;  %v7640_v3 = vld [vmem:[%s8906_s18 + $0x330] sm:$0xff]  }
0x10a2   : > { %v4273_v48 = vadd.f32 %v4272_v46, %v3377_v25  ;;  %v4316_v20 = vadd.f32 %v4315_v47, %v3385_v60  ;;  %v4274_v45 = vpop.f32.mrb[39].mxu0  ;;  %v4317_v49 = vpop.f32.mrb[43].mxu1  ;;  %v4414_v53 = vmax.f32 %v4269_v31, 0.0  ;;  %v4416_v54 = vmax.f32 %v4312_v33, 0.0  ;;  %v7626_v25 = vld [vmem:[%s8906_s18 + $0x358] sm:$0xff]   ;;  %v7636_v31 = vld [vmem:[%s8906_s18 + $0x328] sm:$0xff]  }
0x10a3   : > { %v4275_v50 = vadd.f32 %v4274_v45, %v3381_v27  ;;  %v4318_v32 = vadd.f32 %v4317_v49, %v3389_v28  ;;  %7091 = vmatpush3.bf16.msra.mxu0 %v7608_v29  ;;  %7113 = vmatpush3.bf16.msra.mxu1 %v7609_v30  ;;  %v4415_v61 = vmax.f32 %v4271_v43, 0.0  ;;  %v4417_v63 = vmax.f32 %v4314_v44, 0.0  ;;  %v7627_v60 = vld [vmem:[%s8906_s18 + $0x3d8] sm:$0xff]   ;;  %v7630_v27 = vld [vmem:[%s8906_s18 + $0x360] sm:$0xff]   ;;  %v7634_v29 = vld [vmem:[%s8906_s18 + $0x368] sm:$0xff]  }
0x10a4   : > { %v4430_v55 = vmax.f32 %v4273_v48, 0.0  ;;  %v4432_v56 = vmax.f32 %v4316_v20, 0.0  ;;  %7092 = vmatprep.subr.bf16.mxu0 %v7610_v40  ;;  %7114 = vmatprep.subr.bf16.mxu1 %v7611_v41  ;;  %v7631_v28 = vld [vmem:[%s8906_s18 + $0x3e0] sm:$0xff]   ;;  %v7635_v30 = vld [vmem:[%s8906_s18 + $0x3e8] sm:$0xff]   ;;  %v7638_v40 = vld [vmem:[%s8906_s18 + $0x370] sm:$0xff]   ;;  %v3397_v43 = vrot.slane %v9449_v21, %v3364_v5  ;;  %v3405_v44 = vrot.slane %v9449_v21, %v3372_v6 }
0x10a5   : > { %v4431_v1 = vmax.f32 %v4275_v50, 0.0  ;;  %v4433_v2 = vmax.f32 %v4318_v32, 0.0  ;;  %v7637_v33 = vld [vmem:[%s8906_s18 + $0x3a8] sm:$0xff]   ;;  %v7639_v41 = vld [vmem:[%s8906_s18 + $0x3f0] sm:$0xff]   ;;  %v7642_v50 = vld [vmem:[%s8906_s18 + $0x378] sm:$0xff]  }
0x10a6   : > { %v4446_v59 = vpack.c.bf16 %v4430_v55, %v4414_v53  ;;  %v4448_v8 = vpack.c.bf16 %v4432_v56, %v4416_v54  ;;  %v7641_v48 = vld [vmem:[%s8906_s18 + $0x3b0] sm:$0xff]   ;;  %v7643_v5 = vld [vmem:[%s8906_s18 + $0x3f8] sm:$0xff]  }
0x10a7   : > { %v4447_v9 = vpack.c.bf16 %v4431_v1, %v4415_v61  ;;  %v4449_v10 = vpack.c.bf16 %v4433_v2, %v4417_v63  ;;  %7093 = vmatpush3.bf16.msra.mxu0 %v7612_v51  ;;  %7115 = vmatpush3.bf16.msra.mxu1 %v7613_v52 }
0x10a8   : > { %7122 = vmatprep.subr.bf16.mxu0 %v7614_v57  ;;  %7144 = vmatprep.subr.bf16.mxu1 %v7615_v58  ;;  %v7644_v57 = vld [vmem:[%s8906_s18 + $0x338] sm:$0xff]  }
0x10a9   : > { %5681 = vmatprep.mubr.bf16.mxu0 %v4447_v9  ;;  %5722 = vmatprep.mubr.bf16.mxu1 %v4449_v10  ;;  %v7645_v58 = vld [vmem:[%s8906_s18 + $0x3b8] sm:$0xff]  }
0x10aa   : > { %5682 = vmatmul.mubr.bf16.vlgmr.msra.gmra.mrb[52].mxu0 %v4446_v59  ;;  %5723 = vmatmul.mubr.bf16.vlgmr.msra.gmra.mrb[56].mxu1 %v4448_v8 }
0x10ab   : > { %7123 = vmatpush3.bf16.msra.mxu0 %v7616_v11  ;;  %7145 = vmatpush3.bf16.msra.mxu1 %v7617_v12 }
0x10ac   : > { %7124 = vmatprep.subr.bf16.mxu0 %v7618_v13  ;;  %7146 = vmatprep.subr.bf16.mxu1 %v7619_v14 }
0x10af   : > { %7125 = vmatpush3.bf16.msra.mxu0 %v7620_v39  ;;  %7147 = vmatpush3.bf16.msra.mxu1 %v7621_v16 }
0x10b0   : > { %7126 = vmatprep.subr.bf16.mxu0 %v7622_v17  ;;  %7148 = vmatprep.subr.bf16.mxu1 %v7623_v18  ;;  %v6723_v17 = vld [vmem:[%s9686_s0] ss:$0 sm:$0xff] }
0x10b3   : > { %7127 = vmatpush3.bf16.msra.mxu0 %v7624_v22  ;;  %7149 = vmatpush3.bf16.msra.mxu1 %v7625_v0 }
0x10b4   : > { %7128 = vmatprep.subr.bf16.mxu0 %v7626_v25  ;;  %7150 = vmatprep.subr.bf16.mxu1 %v7627_v60 }
0x10b7   : > { %7129 = vmatpush3.bf16.msra.mxu0 %v7628_v36  ;;  %7151 = vmatpush3.bf16.msra.mxu1 %v7629_v38 }
0x10b8   : > { %7130 = vmatprep.subr.bf16.mxu0 %v7630_v27  ;;  %7152 = vmatprep.subr.bf16.mxu1 %v7631_v28 }
0x10bb   : > { %7131 = vmatpush3.bf16.msra.mxu0 %v7632_v15  ;;  %7153 = vmatpush3.bf16.msra.mxu1 %v7633_v7 }
0x10bc   : > { %7132 = vmatprep.subr.bf16.mxu0 %v7634_v29  ;;  %7154 = vmatprep.subr.bf16.mxu1 %v7635_v30 }
0x10bf   : > { %v4354_v46 = vpop.f32.mrb[40].mxu0  ;;  %v4397_v47 = vpop.f32.mrb[44].mxu1  ;;  %7133 = vmatpush3.bf16.msra.mxu0 %v7636_v31  ;;  %7155 = vmatpush3.bf16.msra.mxu1 %v7637_v33 }
0x10c0   : > { %v4355_v20 = vadd.f32 %v4354_v46, %v3393_v34  ;;  %v4398_v4 = vadd.f32 %v4397_v47, %v3401_v35  ;;  %v4356_v45 = vpop.f32.mrb[41].mxu0  ;;  %v4399_v49 = vpop.f32.mrb[45].mxu1  ;;  %7134 = vmatprep.subr.bf16.mxu0 %v7638_v40  ;;  %7156 = vmatprep.subr.bf16.mxu1 %v7639_v41 }
0x10c1   : > { %v4357_v32 = vadd.f32 %v4356_v45, %v3397_v43  ;;  %v4400_v23 = vadd.f32 %v4399_v49, %v3405_v44  ;;  %v4358_v51 = vpop.f32.mrb[42].mxu0  ;;  %v4401_v6 = vpop.f32.mrb[46].mxu1 }
0x10c2   : > { %v4359_v21 = vadd.f32 %v4358_v51, %v3393_v34  ;;  %v4402_v52 = vadd.f32 %v4401_v6, %v3401_v35  ;;  %v4360_v53 = vpop.f32.mrb[43].mxu0  ;;  %v4403_v54 = vpop.f32.mrb[47].mxu1  ;;  %v4418_v61 = vmax.f32 %v4355_v20, 0.0  ;;  %v4420_v63 = vmax.f32 %v4398_v4, 0.0 }
0x10c3   : > { %v4361_v55 = vadd.f32 %v4360_v53, %v3397_v43  ;;  %v4404_v56 = vadd.f32 %v4403_v54, %v3405_v44  ;;  %7135 = vmatpush3.bf16.msra.mxu0 %v7640_v3  ;;  %7157 = vmatpush3.bf16.msra.mxu1 %v7641_v48  ;;  %v4419_v59 = vmax.f32 %v4357_v32, 0.0  ;;  %v4421_v8 = vmax.f32 %v4400_v23, 0.0 }
0x10c4   : > { %v4434_v1 = vmax.f32 %v4359_v21, 0.0  ;;  %v4436_v2 = vmax.f32 %v4402_v52, 0.0  ;;  %7136 = vmatprep.subr.bf16.mxu0 %v7642_v50  ;;  %7158 = vmatprep.subr.bf16.mxu1 %v7643_v5 }
0x10c5   : > { %v4435_v9 = vmax.f32 %v4361_v55, 0.0  ;;  %v4437_v10 = vmax.f32 %v4404_v56, 0.0 }
0x10c6   : > { %v4450_v11 = vpack.c.bf16 %v4434_v1, %v4418_v61  ;;  %v4452_v12 = vpack.c.bf16 %v4436_v2, %v4420_v63 }
0x10c7   : > { %v4451_v13 = vpack.c.bf16 %v4435_v9, %v4419_v59  ;;  %v4453_v14 = vpack.c.bf16 %v4437_v10, %v4421_v8  ;;  %7137 = vmatpush3.bf16.msra.mxu0 %v7644_v57  ;;  %7159 = vmatpush3.bf16.msra.mxu1 %v7645_v58 }
0x10c9   : > { %5763 = vmatprep.mubr.bf16.mxu0 %v4451_v13  ;;  %5804 = vmatprep.mubr.bf16.mxu1 %v4453_v14 }
0x10ca   : > { %5764 = vmatmul.mubr.bf16.vlgmr.msra.gmra.mrb[56].mxu0 %v4450_v11  ;;  %5805 = vmatmul.mubr.bf16.vlgmr.msra.gmra.mrb[60].mxu1 %v4452_v12 }
0x113d   : > { %v7006_v39 = vpop.f32.mrb[44].mxu0  ;;  %v7028_v16 = vpop.f32.mrb[48].mxu1 }
0x113e   : > { %v7007_v18 = vpop.f32.mrb[45].mxu0  ;;  %v7029_v22 = vpop.f32.mrb[49].mxu1 }
0x113f   : > { %v7008_v0 = vadd.f32 %v7007_v18, %v7006_v39  ;;  %v7030_v25 = vadd.f32 %v7029_v22, %v7028_v16  ;;  %v7009_v60 = vpop.f32.mrb[46].mxu0  ;;  %v7031_v36 = vpop.f32.mrb[50].mxu1 }
0x1140   : > { %v7010_v38 = vpop.f32.mrb[47].mxu0  ;;  %v7032_v27 = vpop.f32.mrb[51].mxu1 }
0x1141   : > { %v5520_v28 = vadd.f32 %v7008_v0, %v6723_v17  ;;  %v7011_v15 = vadd.f32 %v7010_v38, %v7009_v60  ;;  %v7033_v7 = vadd.f32 %v7032_v27, %v7031_v36 }
0x1143   : > { %v5561_v29 = vadd.f32 %v7030_v25, %v5520_v28  ;;  %v5523_v30 = vadd.f32 %v7011_v15, %v6723_v17 }
0x1145   : > { %v5564_v31 = vadd.f32 %v7033_v7, %v5523_v30 }
0x115d   : > { %v7050_v33 = vpop.f32.mrb[48].mxu0  ;;  %v7072_v34 = vpop.f32.mrb[52].mxu1 }
0x115e   : > { %v7051_v35 = vpop.f32.mrb[49].mxu0  ;;  %v7073_v40 = vpop.f32.mrb[53].mxu1 }
0x115f   : > { %v7052_v41 = vadd.f32 %v7051_v35, %v7050_v33  ;;  %v7074_v43 = vadd.f32 %v7073_v40, %v7072_v34  ;;  %v7053_v44 = vpop.f32.mrb[50].mxu0  ;;  %v7075_v46 = vpop.f32.mrb[54].mxu1 }
0x1160   : > { %v7054_v47 = vpop.f32.mrb[51].mxu0  ;;  %v7076_v3 = vpop.f32.mrb[55].mxu1 }
0x1161   : > { %v5602_v48 = vadd.f32 %v7052_v41, %v5561_v29  ;;  %v7055_v20 = vadd.f32 %v7054_v47, %v7053_v44  ;;  %v7077_v4 = vadd.f32 %v7076_v3, %v7075_v46  ;;  %v6853_v46 = vld [vmem:[%s850_s22] ss:$0 sm:$0xff] }
0x1163   : > { %v5643_v45 = vadd.f32 %v7074_v43, %v5602_v48  ;;  %v5605_v49 = vadd.f32 %v7055_v20, %v5564_v31  ;;  %v6852_v43 = vld [vmem:[%s9687_s11] ss:$0 sm:$0xff] }
0x1165   : > { %v5646_v50 = vadd.f32 %v7077_v4, %v5605_v49  ;;  %v7688_v49 = vld [vmem:[#allocation23 + $0x4] ss:$16 sps:$4 sm:$0xff] (!%p6854_p2)  }
0x1166   : > { %6076 = vmatprep.subr.bf16.mxu0 (!%p6854_p2), %v7688_v49 }
0x117d   : > { %v7094_v5 = vpop.f32.mrb[52].mxu0  ;;  %v7116_v32 = vpop.f32.mrb[56].mxu1 }
0x117e   : > { %v7095_v23 = vpop.f32.mrb[53].mxu0  ;;  %v7117_v51 = vpop.f32.mrb[57].mxu1 }
0x117f   : > { %v7096_v6 = vadd.f32 %v7095_v23, %v7094_v5  ;;  %v7118_v21 = vadd.f32 %v7117_v51, %v7116_v32  ;;  %v7097_v52 = vpop.f32.mrb[54].mxu0  ;;  %v7119_v53 = vpop.f32.mrb[58].mxu1  ;;  %v8274_v5 = vmov (!%p6854_p2), 0   ;;  %v7692_v32 = vld [vmem:[#allocation23] ss:$16 sps:$4 sm:$0xff] (!%p6854_p2)  }
0x1180   : > { %v7098_v54 = vpop.f32.mrb[55].mxu0  ;;  %v7120_v55 = vpop.f32.mrb[59].mxu1  ;;  %6108 = vmatprep.mubr.bf16.mxu0 (!%p6854_p2), %v8274_v5  ;;  %6151 = vmatprep.mubr.bf16.mxu1 (!%p6854_p2), %v8274_v5  ;;  %v7693_v23 = vld [vmem:[#allocation23 + $0x8] ss:$16 sps:$4 sm:$0xff] (!%p6854_p2)   ;;  %v7694_v51 = vld [vmem:[#allocation23 + $0x24] ss:$16 sps:$4 sm:$0xff] (!%p6854_p2)  }
0x1181   : > { %v5684_v56 = vadd.f32 %v7096_v6, %v5643_v45  ;;  %v7099_v57 = vadd.f32 %v7098_v54, %v7097_v52  ;;  %v7121_v58 = vadd.f32 %v7120_v55, %v7119_v53  ;;  %6077 = vmatpush1.bf16.msra.mxu0 (!%p6854_p2), %v7692_v32  ;;  %v7696_v6 = vld [vmem:[#allocation23 + $0x2c] ss:$16 sps:$4 sm:$0xff] (!%p6854_p2)   ;;  %v7699_v52 = vld [vmem:[#allocation23 + $0x28] ss:$16 sps:$4 sm:$0xff] (!%p6854_p2)   ;;  %v7700_v53 = vld [vmem:[#allocation23 + $0x44] ss:$16 sps:$4 sm:$0xff] (!%p6854_p2)  }
0x1182   : > { %6078 = vmatprep.subr.bf16.mxu0 (!%p6854_p2), %v7694_v51  ;;  %v7702_v54 = vld [vmem:[#allocation23 + $0x4c] ss:$16 sps:$4 sm:$0xff] (!%p6854_p2)   ;;  %v7704_v55 = vld [vmem:[#allocation23 + $0x40] ss:$16 sps:$4 sm:$0xff] (!%p6854_p2)  }
0x1183   : > { %v5725_v61 = vadd.f32 %v7118_v21, %v5684_v56  ;;  %v5687_v63 = vadd.f32 %v7099_v57, %v5646_v50  ;;  %v7690_v50 = vld [vmem:[#allocation23 + $0xc] ss:$16 sps:$4 sm:$0xff] (!%p6854_p2)   ;;  %v7698_v21 = vld [vmem:[#allocation23 + $0x20] ss:$16 sps:$4 sm:$0xff] (!%p6854_p2)   ;;  %v7705_v56 = vld [vmem:[#allocation23 + $0x48] ss:$16 sps:$4 sm:$0xff] (!%p6854_p2)  }
0x1184   : > { %6119 = vmatprep.subr.bf16.mxu1 (!%p6854_p2), %v7690_v50  ;;  %v7706_v57 = vld [vmem:[#allocation23 + $0x64] ss:$16 sps:$4 sm:$0xff] (!%p6854_p2)  }
0x1185   : > { %v5728_v1 = vadd.f32 %v7121_v58, %v5687_v63  ;;  %6120 = vmatpush1.bf16.msra.mxu1 (!%p6854_p2), %v7693_v23  ;;  %6079 = vmatpush1.bf16.msra.mxu0 (!%p6854_p2), %v7698_v21  ;;  %v7708_v58 = vld [vmem:[#allocation23 + $0x6c] ss:$16 sps:$4 sm:$0xff] (!%p6854_p2)   ;;  %v7711_v63 = vld [vmem:[#allocation23 + $0x68] ss:$16 sps:$4 sm:$0xff] (!%p6854_p2)  }
0x1186   : > { %6121 = vmatprep.subr.bf16.mxu1 (!%p6854_p2), %v7696_v6  ;;  %6080 = vmatprep.subr.bf16.mxu0 (!%p6854_p2), %v7700_v53 }
0x1189   : > { %6122 = vmatpush1.bf16.msra.mxu1 (!%p6854_p2), %v7699_v52  ;;  %6081 = vmatpush1.bf16.msra.mxu0 (!%p6854_p2), %v7704_v55 }
0x118a   : > { %6123 = vmatprep.subr.bf16.mxu1 (!%p6854_p2), %v7702_v54  ;;  %6082 = vmatprep.subr.bf16.mxu0 (!%p6854_p2), %v7706_v57 }
0x118d   : > { %6124 = vmatpush1.bf16.msra.mxu1 (!%p6854_p2), %v7705_v56 }
0x118e   : > { %6125 = vmatprep.subr.bf16.mxu1 (!%p6854_p2), %v7708_v58 }
0x1191   : > { %6126 = vmatpush1.bf16.msra.mxu1 (!%p6854_p2), %v7711_v63 }
0x119d   : > { %v7138_v2 = vpop.f32.mrb[56].mxu0  ;;  %v7160_v59 = vpop.f32.mrb[60].mxu1 }
0x119e   : > { %v7139_v8 = vpop.f32.mrb[57].mxu0  ;;  %v7161_v9 = vpop.f32.mrb[61].mxu1 }
0x119f   : > { %v7140_v10 = vadd.f32 %v7139_v8, %v7138_v2  ;;  %v7162_v11 = vadd.f32 %v7161_v9, %v7160_v59  ;;  %v7141_v12 = vpop.f32.mrb[58].mxu0  ;;  %v7163_v13 = vpop.f32.mrb[62].mxu1  ;;  %v7714_v2 = vld [vmem:[#allocation23 + $0x8c] ss:$16 sps:$4 sm:$0xff] (!%p6854_p2)   ;;  %v7716_v59 = vld [vmem:[#allocation23 + $0x80] ss:$16 sps:$4 sm:$0xff] (!%p6854_p2)  }
0x11a0   : > { %v7142_v14 = vpop.f32.mrb[59].mxu0  ;;  %v7164_v39 = vpop.f32.mrb[63].mxu1  ;;  %v7717_v8 = vld [vmem:[#allocation23 + $0x88] ss:$16 sps:$4 sm:$0xff] (!%p6854_p2)   ;;  %v7718_v9 = vld [vmem:[#allocation23 + $0xa4] ss:$16 sps:$4 sm:$0xff] (!%p6854_p2)   ;;  %6127 = vmatprep.subr.bf16.mxu1 (!%p6854_p2), %v7714_v2 }
0x11a1   : > { %v5766_v16 = vadd.f32 %v7140_v10, %v5725_v61  ;;  %v7143_v17 = vadd.f32 %v7142_v14, %v7141_v12  ;;  %v7165_v18 = vadd.f32 %v7164_v39, %v7163_v13  ;;  %v7710_v61 = vld [vmem:[#allocation23 + $0x60] ss:$16 sps:$4 sm:$0xff] (!%p6854_p2)   ;;  %v7720_v10 = vld [vmem:[#allocation23 + $0xac] ss:$16 sps:$4 sm:$0xff] (!%p6854_p2)   ;;  %6128 = vmatpush1.bf16.msra.mxu1 (!%p6854_p2), %v7717_v8  ;;  %v7723_v12 = vld [vmem:[#allocation23 + $0xa8] ss:$16 sps:$4 sm:$0xff] (!%p6854_p2)  }
0x11a2   : > { %6083 = vmatpush1.bf16.msra.mxu0 (!%p6854_p2), %v7710_v61  ;;  %6129 = vmatprep.subr.bf16.mxu1 (!%p6854_p2), %v7720_v10  ;;  %v7724_v13 = vld [vmem:[#allocation23 + $0xc4] ss:$16 sps:$4 sm:$0xff] (!%p6854_p2)   ;;  %v7726_v14 = vld [vmem:[#allocation23 + $0xcc] ss:$16 sps:$4 sm:$0xff] (!%p6854_p2)   ;;  %v7728_v39 = vld [vmem:[#allocation23 + $0xc0] ss:$16 sps:$4 sm:$0xff] (!%p6854_p2)  }
0x11a3   : > { %v5807_v22 = vadd.f32 %v7162_v11, %v5766_v16  ;;  %v5769_v0 = vadd.f32 %v7143_v17, %v5728_v1  ;;  %v7712_v1 = vld [vmem:[#allocation23 + $0x84] ss:$16 sps:$4 sm:$0xff] (!%p6854_p2)   ;;  %v7722_v11 = vld [vmem:[#allocation23 + $0xa0] ss:$16 sps:$4 sm:$0xff] (!%p6854_p2)   ;;  %v7729_v16 = vld [vmem:[#allocation23 + $0xc8] ss:$16 sps:$4 sm:$0xff] (!%p6854_p2)  }
0x11a4   : > { %6084 = vmatprep.subr.bf16.mxu0 (!%p6854_p2), %v7712_v1  ;;  %v7730_v17 = vld [vmem:[#allocation23 + $0xe4] ss:$16 sps:$4 sm:$0xff] (!%p6854_p2)  }
0x11a5   : > { %v5810_v25 = vadd.f32 %v7165_v18, %v5769_v0  ;;  %v5813_v60 = vadd.f32 %v5807_v22, %v9222_v19  ;;  %6130 = vmatpush1.bf16.msra.mxu1 (!%p6854_p2), %v7723_v12  ;;  %v7732_v18 = vld [vmem:[#allocation23 + $0xec] ss:$16 sps:$4 sm:$0xff] (!%p6854_p2)   ;;  %v7734_v22 = vld [vmem:[#allocation23 + $0xe0] ss:$16 sps:$4 sm:$0xff] (!%p6854_p2)   ;;  %v7735_v0 = vld [vmem:[#allocation23 + $0xe8] ss:$16 sps:$4 sm:$0xff] (!%p6854_p2)  }
0x11a6   : > { %6085 = vmatpush1.bf16.msra.mxu0 (!%p6854_p2), %v7716_v59  ;;  %6131 = vmatprep.subr.bf16.mxu1 (!%p6854_p2), %v7726_v14 }
0x11a7   : > { %5817 = vadd.xlane.f32.xlu0 %v5813_v60  ;;  %v5814_v36 = vadd.f32 %v5810_v25, %v9224_v62  ;;  %6086 = vmatprep.subr.bf16.mxu0 (!%p6854_p2), %v7718_v9 }
0x11a9   : > { %6132 = vmatpush1.bf16.msra.mxu1 (!%p6854_p2), %v7729_v16 }
0x11aa   : > { %6087 = vmatpush1.bf16.msra.mxu0 (!%p6854_p2), %v7722_v11  ;;  %6133 = vmatprep.subr.bf16.mxu1 (!%p6854_p2), %v7732_v18 }
0x11ab   : > { %5819 = vadd.xlane.f32.xlu0 %v5814_v36  ;;  %6088 = vmatprep.subr.bf16.mxu0 (!%p6854_p2), %v7724_v13 }
0x11ad   : > { %6134 = vmatpush1.bf16.msra.mxu1 (!%p6854_p2), %v7735_v0 }
0x11ae   : > { %6089 = vmatpush1.bf16.msra.mxu0 (!%p6854_p2), %v7728_v39 }
0x11af   : > { %6090 = vmatprep.subr.bf16.mxu0 (!%p6854_p2), %v7730_v17 }
0x11b2   : > { %6091 = vmatpush1.bf16.msra.mxu0 (!%p6854_p2), %v7734_v22 }
0x1234   : > { %v5818_v38 = vpop.xlane.xlu0 %5817 }
0x1235   : > { %v5821_v27 = vmul.f32 0.0078125, %v5818_v38 }
0x1237   : > { %v5823_v28 = vsub.f32 %v5813_v60, %v5821_v27  ;;  %v5894_v60 = vld [vmem:[#allocation25] sm:$0xf] (!%p6854_p2) }
0x1238   : > { %v5820_v15 = vpop.xlane.xlu0 %5819  ;;  %v5907_v38 = vrot.slane (!%p6854_p2), %v5894_v60, %v8991_v37  ;;  %v5903_v27 = vrot.slane (!%p6854_p2), %v5894_v60, %v8980_v26 }
0x1239   : > { %v5822_v7 = vmul.f32 0.0078125, %v5820_v15  ;;  %v5825_v29 = vmul.f32 %v5823_v28, %v5823_v28 }
0x123b   : > { %v5824_v30 = vsub.f32 %v5814_v36, %v5822_v7  ;;  %5827 = vadd.xlane.f32.xlu0 %v5825_v29  ;;  %v5899_v36 = vrot.slane (!%p6854_p2), %v5894_v60, %v8976_v24 }
0x123d   : > { %v5826_v31 = vmul.f32 %v5824_v30, %v5824_v30 }
0x123f   : > { %5829 = vadd.xlane.f32.xlu1 %v5826_v31 }
0x12c8   : > { %v5828_v33 = vpop.xlane.xlu0 %5827 }
0x12c9   : > { %v5831_v34 = vmul.f32 0.0078125, %v5828_v33 }
0x12cb   : > { %v5833_v35 = vadd.f32 1e-05, %v5831_v34 }
0x12cc   : > { %v5830_v19 = vpop.xlane.xlu1 %5829 }
0x12cd   : > { %7682 = vrsqrt.f32 %v5833_v35  ;;  %v5832_v40 = vmul.f32 0.0078125, %v5830_v19 }
0x12cf   : > { %v5834_v62 = vadd.f32 1e-05, %v5832_v40 }
0x12d1   : > { %7684 = vrsqrt.f32 %v5834_v62 }
0x12d7   : > { %v7683_v41 = vpop.eup %7682 }
0x12d8   : > { %v5837_v44 = vmul.f32 %v7683_v41, %v5823_v28  ;;  %v5911_v28 = vrot.slane (!%p6854_p2), %v5894_v60, %v9370_v42 }
0x12da   : > { %v5845_v47 = vmul.f32 %v6852_v43, %v5837_v44 }
0x12db   : > { %v7685_v3 = vpop.eup %7684 }
0x12dc   : > { %v9521_v48 = vadd.f32 %v6853_v46, %v5845_v47  ;;  %v5838_v20 = vmul.f32 %v7685_v3, %v5824_v30  ;;  %5860 = sbr.rel (%p6854_p2) target bundleno = 5054 (0x13be), region = 152 }
0x12de   : > { %5855 = vst [vmem:[#allocation2] sm:$0xff] %v9521_v48  ;;  %v5846_v4 = vmul.f32 %v6852_v43, %v5838_v20 }
0x12e0   : > { %v9524_v45 = vadd.f32 %v6853_v46, %v5846_v4 }
0x12e2   : > { %5856 = vst [vmem:[#allocation2 + $0x8] sm:$0xff] %v9524_v45  ;;  %v5861_v25 = vpack.c.bf16 (!%p6854_p2), %v9524_v45, %v9521_v48 }
0x12e4   : > { %6109 = vmatmul.mubr.bf16.vlgmr.msra.gmra.mrb[0].mxu0 %v5861_v25  ;;  %6152 = vmatmul.mubr.bf16.vlgmr.msra.gmra.mrb[0].mxu1 %v5861_v25 }
0x13b7   : > { %v6110_v15 = vpop.f32.mrb[0].mxu0  ;;  %v6153_v7 = vpop.f32.mrb[0].mxu1 }
0x13b8   : > { %v6111_v29 = vadd.f32 %v6110_v15, %v5899_v36  ;;  %v6154_v30 = vadd.f32 %v6153_v7, %v5907_v38  ;;  %v6112_v31 = vpop.f32.mrb[1].mxu0  ;;  %v6155_v33 = vpop.f32.mrb[1].mxu1 }
0x13b9   : > { %v6113_v34 = vadd.f32 %v6112_v31, %v5903_v27  ;;  %v6156_v35 = vadd.f32 %v6155_v33, %v5911_v28  ;;  %v6114_v19 = vpop.f32.mrb[2].mxu0  ;;  %v6157_v40 = vpop.f32.mrb[2].mxu1 }
0x13ba   : > { %6162 = vst [vmem:[%s9689_s4] sm:$0xff] %v6111_v29  ;;  %6164 = vst [vmem:[%s9689_s4 + $0x10] sm:$0xff] %v6154_v30  ;;  %v6115_v24 = vadd.f32 %v6114_v19, %v5899_v36  ;;  %v6158_v26 = vadd.f32 %v6157_v40, %v5907_v38  ;;  %v6116_v37 = vpop.f32.mrb[3].mxu0  ;;  %v6159_v42 = vpop.f32.mrb[3].mxu1 }
0x13bb   : > { %6163 = vst [vmem:[%s9689_s4 + $0x8] sm:$0xff] %v6113_v34  ;;  %6165 = vst [vmem:[%s9689_s4 + $0x18] sm:$0xff] %v6156_v35  ;;  %v6117_v62 = vadd.f32 %v6116_v37, %v5903_v27  ;;  %v6160_v41 = vadd.f32 %v6159_v42, %v5911_v28 }
0x13bc   : > { %6166 = vst [vmem:[%s9689_s4 + $0x20] sm:$0xff] %v6115_v24  ;;  %6168 = vst [vmem:[%s9689_s4 + $0x30] sm:$0xff] %v6158_v26 }
0x13bd   : > { %6167 = vst [vmem:[%s9689_s4 + $0x28] sm:$0xff] %v6117_v62  ;;  %6169 = vst [vmem:[%s9689_s4 + $0x38] sm:$0xff] %v6160_v41 }
0x13be PF: > { %s9690_s24 = sld [smem:[#allocation37_spill]]  ;;  %s9691_s21 = sld [smem:[#allocation34_spill]] }
0x13bf   : > { %s9692_s22 = sld [smem:[#allocation35_spill]]  ;;  %s9693_s23 = sld [smem:[#allocation38_spill]] }
0x13c4   : > { %p43_p5 = scmp.ge.s32.totalorder %s9690_s24, 6  }
0x13c6   :  { %45 = sbr.rel (!%p43_p5) target bundleno = 25 (0x19), region = 272 }
0x13cd   :  { %6181 = vsyncpa [#allocation4], 1 }
0x13ce   :  { %6183 = vsyncpa [#allocation4 + $0x1], 1 }
0x13cf   :  { %6184 = vsyncpa [#allocation6], 1 }
0x13d0   :  { %6186 = vsyncpa [#allocation6 + $0x1], 1 }
0x13d1   :  { %6187 = vsyncpa [#allocation9], 1 }
0x13d2   :  { %6189 = vsyncpa [#allocation9 + $0x1], 1 }
0x13d3   :  { %6190 = vsyncpa [#allocation12], 1 }
0x13d4   :  { %6192 = vsyncpa [#allocation12 + $0x1], 1 }
0x13d5   :  { %6193 = vsyncpa [#allocation15], 1 }
0x13d6   :  { %6195 = vsyncpa [#allocation15 + $0x1], 1 }
0x13d7   :  { %6196 = vsyncpa [#allocation18], 1 }
0x13d8   :  { %6198 = vsyncpa [#allocation18 + $0x1], 1 }
0x13d9   :  { %6199 = vsyncpa [#allocation21], 1 }
0x13da   :  { %6201 = vsyncpa [#allocation21 + $0x1], 1 }
0x13db   :  { %6202 = vsyncpa [#allocation24], 1 }

</bundles_post_ra>
